<compile_context>
chip_gen: v7x
topology: tpu7x:2x2x1
jax: 0.10.0
libtpu: 0.0.40
codegen_flags: <defaults>
</compile_context>

<pallas_src>
import jax
import jax.numpy as jnp
from jax.experimental import pallas as pl
from jax.experimental.pallas import tpu as pltpu


LRELU_SLOPE = 0.2
BN_EPS = 1e-5


def _round_up(x, m):
    return ((x + m - 1) // m) * m


# ----------------------------------------------------------------------------
# Pallas kernels
# ----------------------------------------------------------------------------
def _make_conv_kernel(stride, kH, kW, Wo, Cp, with_stats, act):
    """Fused conv (kH*kW accumulating MXU dots over phase taps) + optional
    per-channel sum / sum-of-squares + optional sigmoid epilogue.

    Grid = (N, Ho): one batch image / one output spatial row per step.
    """
    n_phase = stride * stride

    def kernel(*refs):
        phase_refs = refs[:n_phase]          # each: (Hph, Wph, Cin) for image n
        w_ref = refs[n_phase]                # (kH*kW, Cin, Cp), bf16
        out_ref = refs[n_phase + 1]          # (Wo, Cp)

        n = pl.program_id(0)
        ho = pl.program_id(1)

        acc = jnp.zeros((Wo, Cp), jnp.float32)
        for kh in range(kH):
            for kw in range(kW):
                p = (kh % stride) * stride + (kw % stride)
                qh, qw = kh // stride, kw // stride
                # contiguous slice: all Wo output columns of this tap
                tap = phase_refs[p][ho + qh, pl.ds(qw, Wo), :]
                acc = acc + jnp.dot(tap.astype(jnp.bfloat16),
                                    w_ref[kh * kW + kw],
                                    preferred_element_type=jnp.float32)

        if act == "sigmoid":
            out_ref[...] = 1.0 / (1.0 + jnp.exp(-acc))
        else:
            out_ref[...] = acc

        if with_stats:
            sum_ref, sq_ref = refs[n_phase + 2], refs[n_phase + 3]

            @pl.when(jnp.logical_and(n == 0, ho == 0))
            def _init():
                sum_ref[...] = jnp.zeros_like(sum_ref)
                sq_ref[...] = jnp.zeros_like(sq_ref)

            sum_ref[...] += jnp.sum(acc, axis=0, keepdims=True)
            sq_ref[...] += jnp.sum(acc * acc, axis=0, keepdims=True)

    return kernel


def _affine_lrelu_kernel(x_ref, scale_ref, shift_ref, o_ref):
    """Per-channel y = LeakyReLU(x * scale + shift)  (BatchNorm + LeakyReLU)."""
    y = x_ref[...] * scale_ref[...] + shift_ref[...]
    o_ref[...] = jnp.maximum(y, LRELU_SLOPE * y)


# ----------------------------------------------------------------------------
# Layer wrappers
# ----------------------------------------------------------------------------
def conv2d_fused(x, w_taps, *, stride, padding, with_stats, act=None):
    """x: (N, H, W, Cin) f32 NHWC; w_taps: (kH*kW, Cin, Cp) bf16, zero padded.

    Returns conv output (N, Ho, Wo, Cp) f32 and, if with_stats, per-channel
    sum and sum-of-squares (1, Cp) of the conv output.
    """
    N, H, W, Cin = x.shape
    kHW, cin_w, Cp = w_taps.shape
    assert cin_w == Cin, (cin_w, Cin)
    kH = kW = 4
    assert kHW == kH * kW
    Ho = (H + 2 * padding - kH) // stride + 1
    Wo = (W + 2 * padding - kW) // stride + 1

    xp = (jnp.pad(x, ((0, 0), (padding, padding), (padding, padding), (0, 0)))
          if padding else x)
    # Phase decomposition: strided taps of xp become contiguous slices of these.
    phases = [xp[:, a::stride, b::stride, :]
              for a in range(stride) for b in range(stride)]

    kernel = _make_conv_kernel(stride, kH, kW, Wo, Cp, with_stats, act)

    in_specs = [pl.BlockSpec((None,) + tuple(p.shape[1:]),
                             lambda n, h: (n, 0, 0, 0))
                for p in phases]
    in_specs.append(pl.BlockSpec((kHW, Cin, Cp), lambda n, h: (0, 0, 0)))

    out_block = pl.BlockSpec((None, None, Wo, Cp), lambda n, h: (n, h, 0, 0))
    if with_stats:
        out_shape = (jax.ShapeDtypeStruct((N, Ho, Wo, Cp), jnp.float32),
                     jax.ShapeDtypeStruct((1, Cp), jnp.float32),
                     jax.ShapeDtypeStruct((1, Cp), jnp.float32))
        out_specs = [out_block,
                     pl.BlockSpec((1, Cp), lambda n, h: (0, 0)),
                     pl.BlockSpec((1, Cp), lambda n, h: (0, 0))]
        sem = ("arbitrary", "arbitrary")      # stats accumulate across the grid
    else:
        out_shape = jax.ShapeDtypeStruct((N, Ho, Wo, Cp), jnp.float32)
        out_specs = out_block
        sem = ("parallel", "arbitrary")

    return pl.pallas_call(
        kernel,
        out_shape=out_shape,
        grid_spec=pltpu.PrefetchScalarGridSpec(
            num_scalar_prefetch=0,
            grid=(N, Ho),
            in_specs=in_specs,
            out_specs=out_specs),
        compiler_params=pltpu.CompilerParams(dimension_semantics=sem),
    )(*phases, w_taps)


def batchnorm_lrelu(y, s, sq, gamma_p, beta_p, eps=BN_EPS):
    """Train-mode BatchNorm (batch statistics) + LeakyReLU, one Pallas pass."""
    N, Ho, Wo, Cp = y.shape
    M = N * Ho * Wo
    mean = s / M                                      # (1, Cp)
    var = jnp.maximum(sq / M - mean * mean, 0.0)      # clamp: no negative variance
    scale = gamma_p / jnp.sqrt(var + eps)             # (1, Cp)
    shift = beta_p - mean * scale
    scale = scale.reshape(1, 1, Cp)
    shift = shift.reshape(1, 1, Cp)

    return pl.pallas_call(
        _affine_lrelu_kernel,
        out_shape=jax.ShapeDtypeStruct((N, Ho, Wo, Cp), jnp.float32),
        grid_spec=pltpu.PrefetchScalarGridSpec(
            num_scalar_prefetch=0,
            grid=(N,),
            in_specs=[pl.BlockSpec((None, Ho, Wo, Cp), lambda n: (n, 0, 0, 0)),
                      pl.BlockSpec((1, 1, Cp), lambda n: (0, 0, 0)),
                      pl.BlockSpec((1, 1, Cp), lambda n: (0, 0, 0))],
            out_specs=pl.BlockSpec((None, Ho, Wo, Cp), lambda n: (n, 0, 0, 0))),
        compiler_params=pltpu.CompilerParams(dimension_semantics=("parallel",)),
    )(y, scale, shift)


# ----------------------------------------------------------------------------
# Parameters / forward
# ----------------------------------------------------------------------------
def _prep_conv_taps(w, cin_carry):
    """PyTorch Conv2d weight (Cout, Cin, kH, kW) -> (kH*kW, cin_carry, Cp) bf16,
    zero padded on both channel dims (lane-dense Cp = round_up(Cout, 128))."""
    cout, cin, kh, kw = w.shape
    cp = _round_up(cout, 128)
    t = jnp.transpose(w, (2, 3, 1, 0)).reshape(kh * kw, cin, cout)
    t = jnp.pad(t, ((0, 0), (0, cin_carry - cin), (0, cp - cout)))
    return t.astype(jnp.bfloat16)


def init_discriminator_params(key, nc, ndf, n_label=2):
    ks = jax.random.split(key, 4)
    std = 0.02

    def conv_w(k, cout, cin):
        return jax.random.normal(k, (cout, cin, 4, 4), jnp.float32) * std

    w1 = conv_w(ks[0], ndf, nc + n_label)
    w2 = conv_w(ks[1], ndf * 2, ndf)
    w3 = conv_w(ks[2], ndf * 4, ndf * 2)
    w4 = conv_w(ks[3], 1, ndf * 4)

    cp1, cp2, cp3 = (_round_up(c, 128) for c in (ndf, ndf * 2, ndf * 4))
    return {
        "w1_taps": _prep_conv_taps(w1, _round_up(nc + n_label, 8)),
        "w2_taps": _prep_conv_taps(w2, cp1),
        "w3_taps": _prep_conv_taps(w3, cp2),
        "w4_taps": _prep_conv_taps(w4, cp3),
        # BatchNorm2d default init: gamma = 1, beta = 0 (padded channels harmless)
        "bn1_g": jnp.ones((cp1,), jnp.float32), "bn1_b": jnp.zeros((cp1,), jnp.float32),
        "bn2_g": jnp.ones((cp2,), jnp.float32), "bn2_b": jnp.zeros((cp2,), jnp.float32),
        "bn3_g": jnp.ones((cp3,), jnp.float32), "bn3_b": jnp.zeros((cp3,), jnp.float32),
    }


def _combine_inputs(x, labels):
    """NCHW image + per-sample labels -> NHWC (image ++ broadcast labels)."""
    N, _, H, W = x.shape
    h = jnp.transpose(x, (0, 2, 3, 1)).astype(jnp.float32)
    lab = jnp.broadcast_to(labels.astype(jnp.float32)[:, None, None, :],
                           (N, H, W, labels.shape[-1]))
    h = jnp.concatenate([h, lab], axis=-1)
    c = h.shape[-1]
    cpad = _round_up(c, 8)
    if cpad != c:
        h = jnp.pad(h, ((0, 0), (0, 0), (0, 0), (0, cpad - c)))
    return h


@jax.jit
def discriminator_forward(params, x, labels):
    """x: (N, nc, H, W); labels: (N, 2).  Returns sigmoid scores, NCHW."""
    h = _combine_inputs(x, labels)                                  # (N, H, W, 8)

    # three Conv(4, 2, 1, bias=False) -> BatchNorm -> LeakyReLU(0.2) blocks
    for i in (1, 2, 3):
        y, s, sq = conv2d_fused(h, params[f"w{i}_taps"], stride=2, padding=1,
                                with_stats=True)
        h = batchnorm_lrelu(y, s, sq, params[f"bn{i}_g"], params[f"bn{i}_b"])

    # Conv(4, 1, 0, bias=False) -> Sigmoid (fused epilogue, real Cout = 1)
    y = conv2d_fused(h, params["w4_taps"], stride=1, padding=0,
                     with_stats=False, act="sigmoid")
    return jnp.transpose(y[:, :, :, :1], (0, 3, 1, 2))              # NCHW


# ----------------------------------------------------------------------------
# Pure-JAX reference (identical numerics: same bf16 taps, same stats formula)
# ----------------------------------------------------------------------------
def _ref_conv(x, w_taps, stride, padding):
    N, H, W, _ = x.shape
    kH = kW = 4
    Ho = (H + 2 * padding - kH) // stride + 1
    Wo = (W + 2 * padding - kW) // stride + 1
    xp = (jnp.pad(x, ((0, 0), (padding, padding), (padding, padding), (0, 0)))
          if padding else x)
    Cp = w_taps.shape[-1]
    acc = jnp.zeros((N, Ho, Wo, Cp), jnp.float32)
    for kh in range(kH):
        for kw in range(kW):
            tap = xp[:, kh:kh + stride * Ho:stride, kw:kw + stride * Wo:stride, :]
            acc = acc + jnp.einsum("nhwc,cd->nhwd", tap.astype(jnp.bfloat16),
                                   w_taps[kh * kW + kw],
                                   preferred_element_type=jnp.float32)
    return acc


def _ref_forward(params, x, labels):
    h = _combine_inputs(x, labels)
    for i in (1, 2, 3):
        y = _ref_conv(h, params[f"w{i}_taps"], 2, 1)
        M = y.shape[0] * y.shape[1] * y.shape[2]
        s = jnp.sum(y, axis=(0, 1, 2))
        sq = jnp.sum(y * y, axis=(0, 1, 2))
        mean = s / M
        var = jnp.maximum(sq / M - mean * mean, 0.0)
        scale = params[f"bn{i}_g"] / jnp.sqrt(var + BN_EPS)
        shift = params[f"bn{i}_b"] - mean * scale
        z = y * scale + shift
        h = jnp.maximum(z, LRELU_SLOPE * z)
    y = _ref_conv(h, params["w4_taps"], 1, 0)
    y = 1.0 / (1.0 + jnp.exp(-y))
    return jnp.transpose(y[:, :, :, :1], (0, 3, 1, 2))


if __name__ == "__main__":
    # Small, module-consistent shapes: batch=2, nc=3 (+2 label channels),
    # 32x32 images, ndf=16  ->  output (2, 1, 1, 1).
    nc, ndf, n_label = 3, 16, 2
    batch, H = 2, 32

    key = jax.random.PRNGKey(0)
    k_param, k_x, k_lab = jax.random.split(key, 3)

    params = init_discriminator_params(k_param, nc, ndf, n_label)
    x = jax.random.normal(k_x, (batch, nc, H, H), jnp.float32)
    labels = jax.random.normal(k_lab, (batch, n_label), jnp.float32)

    out = discriminator_forward(params, x, labels)
    out = jax.block_until_ready(out)

    assert out.shape == (batch, 1, 1, 1), out.shape
    assert bool(jnp.all(jnp.isfinite(out)))
    assert bool(jnp.all((out > 0.0) & (out < 1.0)))

    ref = _ref_forward(params, x, labels)
    assert bool(jnp.allclose(out, ref, atol=1e-3, rtol=1e-3)), (
        float(jnp.max(jnp.abs(out - ref))))

    print("KERNEL_OK")
</pallas_src>

<mosaic_0001>
module attributes {stable_mosaic.version = 11 : i64} {
  func.func @_affine_lrelu_kernel(%arg0: i32, %arg1: memref<1x16x16x128xf32, #tpu.memory_space<vmem>>, %arg2: memref<1x1x128xf32, #tpu.memory_space<vmem>>, %arg3: memref<1x1x128xf32, #tpu.memory_space<vmem>>, %arg4: memref<1x16x16x128xf32, #tpu.memory_space<vmem>>) attributes {dimension_semantics = [#tpu.dimension_semantics<parallel>], iteration_bounds = array<i64: 2>, scalar_prefetch = 0 : i64, scratch_operands = 0 : i64, tpu.core_type = #tpu.core_type<tc>, window_params = [{transform_indices = @transform_0, window_bounds = array<i64: 1, 16, 16, 128>}, {pipeline_mode = #tpu.pipeline_mode<synchronous>, transform_indices = @transform_1, window_bounds = array<i64: 1, 1, 128>}, {pipeline_mode = #tpu.pipeline_mode<synchronous>, transform_indices = @transform_2, window_bounds = array<i64: 1, 1, 128>}, {transform_indices = @transform_3, window_bounds = array<i64: 1, 16, 16, 128>}]} {
    %c0 = arith.constant 0 : index
    %c0_0 = arith.constant 0 : index
    %c0_1 = arith.constant 0 : index
    %c0_2 = arith.constant 0 : index
    %0 = vector.load %arg1[%c0, %c0_0, %c0_1, %c0_2] : memref<1x16x16x128xf32, #tpu.memory_space<vmem>>, vector<1x16x16x128xf32>
    %1 = vector.shape_cast %0 : vector<1x16x16x128xf32> to vector<16x16x128xf32>
    %c0_3 = arith.constant 0 : index
    %c0_4 = arith.constant 0 : index
    %c0_5 = arith.constant 0 : index
    %2 = vector.load %arg2[%c0_3, %c0_4, %c0_5] : memref<1x1x128xf32, #tpu.memory_space<vmem>>, vector<1x1x128xf32>
    %3 = vector.broadcast %2 : vector<1x1x128xf32> to vector<16x16x128xf32>
    %4 = arith.mulf %1, %3 : vector<16x16x128xf32>
    %c0_6 = arith.constant 0 : index
    %c0_7 = arith.constant 0 : index
    %c0_8 = arith.constant 0 : index
    %5 = vector.load %arg3[%c0_6, %c0_7, %c0_8] : memref<1x1x128xf32, #tpu.memory_space<vmem>>, vector<1x1x128xf32>
    %6 = vector.broadcast %5 : vector<1x1x128xf32> to vector<16x16x128xf32>
    %7 = arith.addf %4, %6 : vector<16x16x128xf32>
    %cst = arith.constant 2.000000e-01 : f32
    %8 = vector.broadcast %cst : f32 to vector<16x16x128xf32>
    %9 = arith.mulf %8, %7 : vector<16x16x128xf32>
    %10 = arith.maximumf %7, %9 : vector<16x16x128xf32>
    %c0_9 = arith.constant 0 : index
    %c0_10 = arith.constant 0 : index
    %c0_11 = arith.constant 0 : index
    %c0_12 = arith.constant 0 : index
    %11 = vector.load %arg4[%c0_9, %c0_10, %c0_11, %c0_12] : memref<1x16x16x128xf32, #tpu.memory_space<vmem>>, vector<1x16x16x128xf32>
    %12 = vector.shape_cast %11 : vector<1x16x16x128xf32> to vector<16x16x128xf32>
    %13 = vector.shape_cast %10 : vector<16x16x128xf32> to vector<1x16x16x128xf32>
    tpu.vector_store %arg4[%c0_9, %c0_10, %c0_11, %c0_12], %13 {strides = array<i32>} : memref<1x16x16x128xf32, #tpu.memory_space<vmem>>, vector<1x16x16x128xf32>,
    return
  }
  func.func @transform_0(%arg0: i32) -> (i32, i32, i32, i32) {
    %c0_i32 = arith.constant 0 : i32
    %c0_i32_0 = arith.constant 0 : i32
    %c0_i32_1 = arith.constant 0 : i32
    %c0_i32_2 = arith.constant 0 : i32
    return %arg0, %c0_i32, %c0_i32_0, %c0_i32_1 : i32, i32, i32, i32
  }
  func.func @transform_1(%arg0: i32) -> (i32, i32, i32) {
    %c0_i32 = arith.constant 0 : i32
    %c0_i32_0 = arith.constant 0 : i32
    %c0_i32_1 = arith.constant 0 : i32
    %c0_i32_2 = arith.constant 0 : i32
    return %c0_i32, %c0_i32_0, %c0_i32_1 : i32, i32, i32
  }
  func.func @transform_2(%arg0: i32) -> (i32, i32, i32) {
    %c0_i32 = arith.constant 0 : i32
    %c0_i32_0 = arith.constant 0 : i32
    %c0_i32_1 = arith.constant 0 : i32
    %c0_i32_2 = arith.constant 0 : i32
    return %c0_i32, %c0_i32_0, %c0_i32_1 : i32, i32, i32
  }
  func.func @transform_3(%arg0: i32) -> (i32, i32, i32, i32) {
    %c0_i32 = arith.constant 0 : i32
    %c0_i32_0 = arith.constant 0 : i32
    %c0_i32_1 = arith.constant 0 : i32
    %c0_i32_2 = arith.constant 0 : i32
    return %arg0, %c0_i32, %c0_i32_0, %c0_i32_1 : i32, i32, i32, i32
  }
}

module attributes {stable_mosaic.version = 11 : i64} {
  func.func @kernel(%arg0: i32, %arg1: i32, %arg2: memref<1x17x17x8xf32, #tpu.memory_space<vmem>>, %arg3: memref<1x17x17x8xf32, #tpu.memory_space<vmem>>, %arg4: memref<1x17x17x8xf32, #tpu.memory_space<vmem>>, %arg5: memref<1x17x17x8xf32, #tpu.memory_space<vmem>>, %arg6: memref<16x8x128xbf16, #tpu.memory_space<vmem>>, %arg7: memref<1x1x16x128xf32, #tpu.memory_space<vmem>>, %arg8: memref<1x128xf32, #tpu.memory_space<vmem>>, %arg9: memref<1x128xf32, #tpu.memory_space<vmem>>) attributes {dimension_semantics = [#tpu.dimension_semantics<arbitrary>, #tpu.dimension_semantics<arbitrary>], iteration_bounds = array<i64: 2, 16>, scalar_prefetch = 0 : i64, scratch_operands = 0 : i64, tpu.core_type = #tpu.core_type<tc>, window_params = [{transform_indices = @transform_0, window_bounds = array<i64: 1, 17, 17, 8>}, {transform_indices = @transform_1, window_bounds = array<i64: 1, 17, 17, 8>}, {transform_indices = @transform_2, window_bounds = array<i64: 1, 17, 17, 8>}, {transform_indices = @transform_3, window_bounds = array<i64: 1, 17, 17, 8>}, {pipeline_mode = #tpu.pipeline_mode<synchronous>, transform_indices = @transform_4, window_bounds = array<i64: 16, 8, 128>}, {transform_indices = @transform_5, window_bounds = array<i64: 1, 1, 16, 128>}, {pipeline_mode = #tpu.pipeline_mode<synchronous>, transform_indices = @transform_6, window_bounds = array<i64: 1, 128>}, {pipeline_mode = #tpu.pipeline_mode<synchronous>, transform_indices = @transform_7, window_bounds = array<i64: 1, 128>}]} {
    %cst = arith.constant 0.000000e+00 : f32
    %0 = vector.broadcast %cst : f32 to vector<16x128xf32>
    %c0_i32 = arith.constant 0 : i32
    %1 = arith.addi %arg1, %c0_i32 : i32
    %c0 = arith.constant 0 : index
    %2 = arith.index_cast %1 : i32 to index
    %c0_0 = arith.constant 0 : index
    %c0_1 = arith.constant 0 : index
    %3 = vector.load %arg2[%c0, %2, %c0_0, %c0_1] : memref<1x17x17x8xf32, #tpu.memory_space<vmem>>, vector<1x1x16x8xf32>
    %4 = vector.shape_cast %3 : vector<1x1x16x8xf32> to vector<16x8xf32>
    %5 = arith.truncf %4 : vector<16x8xf32> to vector<16x8xbf16>
    %c0_2 = arith.constant 0 : index
    %c0_3 = arith.constant 0 : index
    %c0_4 = arith.constant 0 : index
    %6 = vector.load %arg6[%c0_2, %c0_3, %c0_4] : memref<16x8x128xbf16, #tpu.memory_space<vmem>>, vector<1x8x128xbf16>
    %7 = vector.shape_cast %6 : vector<1x8x128xbf16> to vector<8x128xbf16>
    %cst_5 = arith.constant dense<0.000000e+00> : vector<16x128xf32>
    %8 = tpu.matmul %5, %7, %cst_5 {dimension_numbers = #tpu.dot_dimension_numbers<[1], [0], [0], [1], [0, 0, 1, 1], [], []>} : vector<16x8xbf16>, vector<8x128xbf16>, vector<16x128xf32> -> vector<16x128xf32>
    %9 = arith.addf %0, %8 : vector<16x128xf32>
    %c0_i32_6 = arith.constant 0 : i32
    %10 = arith.addi %arg1, %c0_i32_6 : i32
    %c0_7 = arith.constant 0 : index
    %11 = arith.index_cast %10 : i32 to index
    %c0_8 = arith.constant 0 : index
    %c0_9 = arith.constant 0 : index
    %12 = vector.load %arg3[%c0_7, %11, %c0_8, %c0_9] : memref<1x17x17x8xf32, #tpu.memory_space<vmem>>, vector<1x1x16x8xf32>
    %13 = vector.shape_cast %12 : vector<1x1x16x8xf32> to vector<16x8xf32>
    %14 = arith.truncf %13 : vector<16x8xf32> to vector<16x8xbf16>
    %c1 = arith.constant 1 : index
    %c0_10 = arith.constant 0 : index
    %c0_11 = arith.constant 0 : index
    %15 = vector.load %arg6[%c1, %c0_10, %c0_11] : memref<16x8x128xbf16, #tpu.memory_space<vmem>>, vector<1x8x128xbf16>
    %16 = vector.shape_cast %15 : vector<1x8x128xbf16> to vector<8x128xbf16>
    %cst_12 = arith.constant dense<0.000000e+00> : vector<16x128xf32>
    %17 = tpu.matmul %14, %16, %cst_12 {dimension_numbers = #tpu.dot_dimension_numbers<[1], [0], [0], [1], [0, 0, 1, 1], [], []>} : vector<16x8xbf16>, vector<8x128xbf16>, vector<16x128xf32> -> vector<16x128xf32>
    %18 = arith.addf %9, %17 : vector<16x128xf32>
    %c0_i32_13 = arith.constant 0 : i32
    %19 = arith.addi %arg1, %c0_i32_13 : i32
    %c0_14 = arith.constant 0 : index
    %20 = arith.index_cast %19 : i32 to index
    %c1_15 = arith.constant 1 : index
    %c0_16 = arith.constant 0 : index
    %21 = vector.load %arg2[%c0_14, %20, %c1_15, %c0_16] : memref<1x17x17x8xf32, #tpu.memory_space<vmem>>, vector<1x1x16x8xf32>
    %22 = vector.shape_cast %21 : vector<1x1x16x8xf32> to vector<16x8xf32>
    %23 = arith.truncf %22 : vector<16x8xf32> to vector<16x8xbf16>
    %c2 = arith.constant 2 : index
    %c0_17 = arith.constant 0 : index
    %c0_18 = arith.constant 0 : index
    %24 = vector.load %arg6[%c2, %c0_17, %c0_18] : memref<16x8x128xbf16, #tpu.memory_space<vmem>>, vector<1x8x128xbf16>
    %25 = vector.shape_cast %24 : vector<1x8x128xbf16> to vector<8x128xbf16>
    %cst_19 = arith.constant dense<0.000000e+00> : vector<16x128xf32>
    %26 = tpu.matmul %23, %25, %cst_19 {dimension_numbers = #tpu.dot_dimension_numbers<[1], [0], [0], [1], [0, 0, 1, 1], [], []>} : vector<16x8xbf16>, vector<8x128xbf16>, vector<16x128xf32> -> vector<16x128xf32>
    %27 = arith.addf %18, %26 : vector<16x128xf32>
    %c0_i32_20 = arith.constant 0 : i32
    %28 = arith.addi %arg1, %c0_i32_20 : i32
    %c0_21 = arith.constant 0 : index
    %29 = arith.index_cast %28 : i32 to index
    %c1_22 = arith.constant 1 : index
    %c0_23 = arith.constant 0 : index
    %30 = vector.load %arg3[%c0_21, %29, %c1_22, %c0_23] : memref<1x17x17x8xf32, #tpu.memory_space<vmem>>, vector<1x1x16x8xf32>
    %31 = vector.shape_cast %30 : vector<1x1x16x8xf32> to vector<16x8xf32>
    %32 = arith.truncf %31 : vector<16x8xf32> to vector<16x8xbf16>
    %c3 = arith.constant 3 : index
    %c0_24 = arith.constant 0 : index
    %c0_25 = arith.constant 0 : index
    %33 = vector.load %arg6[%c3, %c0_24, %c0_25] : memref<16x8x128xbf16, #tpu.memory_space<vmem>>, vector<1x8x128xbf16>
    %34 = vector.shape_cast %33 : vector<1x8x128xbf16> to vector<8x128xbf16>
    %cst_26 = arith.constant dense<0.000000e+00> : vector<16x128xf32>
    %35 = tpu.matmul %32, %34, %cst_26 {dimension_numbers = #tpu.dot_dimension_numbers<[1], [0], [0], [1], [0, 0, 1, 1], [], []>} : vector<16x8xbf16>, vector<8x128xbf16>, vector<16x128xf32> -> vector<16x128xf32>
    %36 = arith.addf %27, %35 : vector<16x128xf32>
    %c0_i32_27 = arith.constant 0 : i32
    %37 = arith.addi %arg1, %c0_i32_27 : i32
    %c0_28 = arith.constant 0 : index
    %38 = arith.index_cast %37 : i32 to index
    %c0_29 = arith.constant 0 : index
    %c0_30 = arith.constant 0 : index
    %39 = vector.load %arg4[%c0_28, %38, %c0_29, %c0_30] : memref<1x17x17x8xf32, #tpu.memory_space<vmem>>, vector<1x1x16x8xf32>
    %40 = vector.shape_cast %39 : vector<1x1x16x8xf32> to vector<16x8xf32>
    %41 = arith.truncf %40 : vector<16x8xf32> to vector<16x8xbf16>
    %c4 = arith.constant 4 : index
    %c0_31 = arith.constant 0 : index
    %c0_32 = arith.constant 0 : index
    %42 = vector.load %arg6[%c4, %c0_31, %c0_32] : memref<16x8x128xbf16, #tpu.memory_space<vmem>>, vector<1x8x128xbf16>
    %43 = vector.shape_cast %42 : vector<1x8x128xbf16> to vector<8x128xbf16>
    %cst_33 = arith.constant dense<0.000000e+00> : vector<16x128xf32>
    %44 = tpu.matmul %41, %43, %cst_33 {dimension_numbers = #tpu.dot_dimension_numbers<[1], [0], [0], [1], [0, 0, 1, 1], [], []>} : vector<16x8xbf16>, vector<8x128xbf16>, vector<16x128xf32> -> vector<16x128xf32>
    %45 = arith.addf %36, %44 : vector<16x128xf32>
    %c0_i32_34 = arith.constant 0 : i32
    %46 = arith.addi %arg1, %c0_i32_34 : i32
    %c0_35 = arith.constant 0 : index
    %47 = arith.index_cast %46 : i32 to index
    %c0_36 = arith.constant 0 : index
    %c0_37 = arith.constant 0 : index
    %48 = vector.load %arg5[%c0_35, %47, %c0_36, %c0_37] : memref<1x17x17x8xf32, #tpu.memory_space<vmem>>, vector<1x1x16x8xf32>
    %49 = vector.shape_cast %48 : vector<1x1x16x8xf32> to vector<16x8xf32>
    %50 = arith.truncf %49 : vector<16x8xf32> to vector<16x8xbf16>
    %c5 = arith.constant 5 : index
    %c0_38 = arith.constant 0 : index
    %c0_39 = arith.constant 0 : index
    %51 = vector.load %arg6[%c5, %c0_38, %c0_39] : memref<16x8x128xbf16, #tpu.memory_space<vmem>>, vector<1x8x128xbf16>
    %52 = vector.shape_cast %51 : vector<1x8x128xbf16> to vector<8x128xbf16>
    %cst_40 = arith.constant dense<0.000000e+00> : vector<16x128xf32>
    %53 = tpu.matmul %50, %52, %cst_40 {dimension_numbers = #tpu.dot_dimension_numbers<[1], [0], [0], [1], [0, 0, 1, 1], [], []>} : vector<16x8xbf16>, vector<8x128xbf16>, vector<16x128xf32> -> vector<16x128xf32>
    %54 = arith.addf %45, %53 : vector<16x128xf32>
    %c0_i32_41 = arith.constant 0 : i32
    %55 = arith.addi %arg1, %c0_i32_41 : i32
    %c0_42 = arith.constant 0 : index
    %56 = arith.index_cast %55 : i32 to index
    %c1_43 = arith.constant 1 : index
    %c0_44 = arith.constant 0 : index
    %57 = vector.load %arg4[%c0_42, %56, %c1_43, %c0_44] : memref<1x17x17x8xf32, #tpu.memory_space<vmem>>, vector<1x1x16x8xf32>
    %58 = vector.shape_cast %57 : vector<1x1x16x8xf32> to vector<16x8xf32>
    %59 = arith.truncf %58 : vector<16x8xf32> to vector<16x8xbf16>
    %c6 = arith.constant 6 : index
    %c0_45 = arith.constant 0 : index
    %c0_46 = arith.constant 0 : index
    %60 = vector.load %arg6[%c6, %c0_45, %c0_46] : memref<16x8x128xbf16, #tpu.memory_space<vmem>>, vector<1x8x128xbf16>
    %61 = vector.shape_cast %60 : vector<1x8x128xbf16> to vector<8x128xbf16>
    %cst_47 = arith.constant dense<0.000000e+00> : vector<16x128xf32>
    %62 = tpu.matmul %59, %61, %cst_47 {dimension_numbers = #tpu.dot_dimension_numbers<[1], [0], [0], [1], [0, 0, 1, 1], [], []>} : vector<16x8xbf16>, vector<8x128xbf16>, vector<16x128xf32> -> vector<16x128xf32>
    %63 = arith.addf %54, %62 : vector<16x128xf32>
    %c0_i32_48 = arith.constant 0 : i32
    %64 = arith.addi %arg1, %c0_i32_48 : i32
    %c0_49 = arith.constant 0 : index
    %65 = arith.index_cast %64 : i32 to index
    %c1_50 = arith.constant 1 : index
    %c0_51 = arith.constant 0 : index
    %66 = vector.load %arg5[%c0_49, %65, %c1_50, %c0_51] : memref<1x17x17x8xf32, #tpu.memory_space<vmem>>, vector<1x1x16x8xf32>
    %67 = vector.shape_cast %66 : vector<1x1x16x8xf32> to vector<16x8xf32>
    %68 = arith.truncf %67 : vector<16x8xf32> to vector<16x8xbf16>
    %c7 = arith.constant 7 : index
    %c0_52 = arith.constant 0 : index
    %c0_53 = arith.constant 0 : index
    %69 = vector.load %arg6[%c7, %c0_52, %c0_53] : memref<16x8x128xbf16, #tpu.memory_space<vmem>>, vector<1x8x128xbf16>
    %70 = vector.shape_cast %69 : vector<1x8x128xbf16> to vector<8x128xbf16>
    %cst_54 = arith.constant dense<0.000000e+00> : vector<16x128xf32>
    %71 = tpu.matmul %68, %70, %cst_54 {dimension_numbers = #tpu.dot_dimension_numbers<[1], [0], [0], [1], [0, 0, 1, 1], [], []>} : vector<16x8xbf16>, vector<8x128xbf16>, vector<16x128xf32> -> vector<16x128xf32>
    %72 = arith.addf %63, %71 : vector<16x128xf32>
    %c1_i32 = arith.constant 1 : i32
    %73 = arith.addi %arg1, %c1_i32 : i32
    %c0_55 = arith.constant 0 : index
    %74 = arith.index_cast %73 : i32 to index
    %c0_56 = arith.constant 0 : index
    %c0_57 = arith.constant 0 : index
    %75 = vector.load %arg2[%c0_55, %74, %c0_56, %c0_57] : memref<1x17x17x8xf32, #tpu.memory_space<vmem>>, vector<1x1x16x8xf32>
    %76 = vector.shape_cast %75 : vector<1x1x16x8xf32> to vector<16x8xf32>
    %77 = arith.truncf %76 : vector<16x8xf32> to vector<16x8xbf16>
    %c8 = arith.constant 8 : index
    %c0_58 = arith.constant 0 : index
    %c0_59 = arith.constant 0 : index
    %78 = vector.load %arg6[%c8, %c0_58, %c0_59] : memref<16x8x128xbf16, #tpu.memory_space<vmem>>, vector<1x8x128xbf16>
    %79 = vector.shape_cast %78 : vector<1x8x128xbf16> to vector<8x128xbf16>
    %cst_60 = arith.constant dense<0.000000e+00> : vector<16x128xf32>
    %80 = tpu.matmul %77, %79, %cst_60 {dimension_numbers = #tpu.dot_dimension_numbers<[1], [0], [0], [1], [0, 0, 1, 1], [], []>} : vector<16x8xbf16>, vector<8x128xbf16>, vector<16x128xf32> -> vector<16x128xf32>
    %81 = arith.addf %72, %80 : vector<16x128xf32>
    %c1_i32_61 = arith.constant 1 : i32
    %82 = arith.addi %arg1, %c1_i32_61 : i32
    %c0_62 = arith.constant 0 : index
    %83 = arith.index_cast %82 : i32 to index
    %c0_63 = arith.constant 0 : index
    %c0_64 = arith.constant 0 : index
    %84 = vector.load %arg3[%c0_62, %83, %c0_63, %c0_64] : memref<1x17x17x8xf32, #tpu.memory_space<vmem>>, vector<1x1x16x8xf32>
    %85 = vector.shape_cast %84 : vector<1x1x16x8xf32> to vector<16x8xf32>
    %86 = arith.truncf %85 : vector<16x8xf32> to vector<16x8xbf16>
    %c9 = arith.constant 9 : index
    %c0_65 = arith.constant 0 : index
    %c0_66 = arith.constant 0 : index
    %87 = vector.load %arg6[%c9, %c0_65, %c0_66] : memref<16x8x128xbf16, #tpu.memory_space<vmem>>, vector<1x8x128xbf16>
    %88 = vector.shape_cast %87 : vector<1x8x128xbf16> to vector<8x128xbf16>
    %cst_67 = arith.constant dense<0.000000e+00> : vector<16x128xf32>
    %89 = tpu.matmul %86, %88, %cst_67 {dimension_numbers = #tpu.dot_dimension_numbers<[1], [0], [0], [1], [0, 0, 1, 1], [], []>} : vector<16x8xbf16>, vector<8x128xbf16>, vector<16x128xf32> -> vector<16x128xf32>
    %90 = arith.addf %81, %89 : vector<16x128xf32>
    %c1_i32_68 = arith.constant 1 : i32
    %91 = arith.addi %arg1, %c1_i32_68 : i32
    %c0_69 = arith.constant 0 : index
    %92 = arith.index_cast %91 : i32 to index
    %c1_70 = arith.constant 1 : index
    %c0_71 = arith.constant 0 : index
    %93 = vector.load %arg2[%c0_69, %92, %c1_70, %c0_71] : memref<1x17x17x8xf32, #tpu.memory_space<vmem>>, vector<1x1x16x8xf32>
    %94 = vector.shape_cast %93 : vector<1x1x16x8xf32> to vector<16x8xf32>
    %95 = arith.truncf %94 : vector<16x8xf32> to vector<16x8xbf16>
    %c10 = arith.constant 10 : index
    %c0_72 = arith.constant 0 : index
    %c0_73 = arith.constant 0 : index
    %96 = vector.load %arg6[%c10, %c0_72, %c0_73] : memref<16x8x128xbf16, #tpu.memory_space<vmem>>, vector<1x8x128xbf16>
    %97 = vector.shape_cast %96 : vector<1x8x128xbf16> to vector<8x128xbf16>
    %cst_74 = arith.constant dense<0.000000e+00> : vector<16x128xf32>
    %98 = tpu.matmul %95, %97, %cst_74 {dimension_numbers = #tpu.dot_dimension_numbers<[1], [0], [0], [1], [0, 0, 1, 1], [], []>} : vector<16x8xbf16>, vector<8x128xbf16>, vector<16x128xf32> -> vector<16x128xf32>
    %99 = arith.addf %90, %98 : vector<16x128xf32>
    %c1_i32_75 = arith.constant 1 : i32
    %100 = arith.addi %arg1, %c1_i32_75 : i32
    %c0_76 = arith.constant 0 : index
    %101 = arith.index_cast %100 : i32 to index
    %c1_77 = arith.constant 1 : index
    %c0_78 = arith.constant 0 : index
    %102 = vector.load %arg3[%c0_76, %101, %c1_77, %c0_78] : memref<1x17x17x8xf32, #tpu.memory_space<vmem>>, vector<1x1x16x8xf32>
    %103 = vector.shape_cast %102 : vector<1x1x16x8xf32> to vector<16x8xf32>
    %104 = arith.truncf %103 : vector<16x8xf32> to vector<16x8xbf16>
    %c11 = arith.constant 11 : index
    %c0_79 = arith.constant 0 : index
    %c0_80 = arith.constant 0 : index
    %105 = vector.load %arg6[%c11, %c0_79, %c0_80] : memref<16x8x128xbf16, #tpu.memory_space<vmem>>, vector<1x8x128xbf16>
    %106 = vector.shape_cast %105 : vector<1x8x128xbf16> to vector<8x128xbf16>
    %cst_81 = arith.constant dense<0.000000e+00> : vector<16x128xf32>
    %107 = tpu.matmul %104, %106, %cst_81 {dimension_numbers = #tpu.dot_dimension_numbers<[1], [0], [0], [1], [0, 0, 1, 1], [], []>} : vector<16x8xbf16>, vector<8x128xbf16>, vector<16x128xf32> -> vector<16x128xf32>
    %108 = arith.addf %99, %107 : vector<16x128xf32>
    %c1_i32_82 = arith.constant 1 : i32
    %109 = arith.addi %arg1, %c1_i32_82 : i32
    %c0_83 = arith.constant 0 : index
    %110 = arith.index_cast %109 : i32 to index
    %c0_84 = arith.constant 0 : index
    %c0_85 = arith.constant 0 : index
    %111 = vector.load %arg4[%c0_83, %110, %c0_84, %c0_85] : memref<1x17x17x8xf32, #tpu.memory_space<vmem>>, vector<1x1x16x8xf32>
    %112 = vector.shape_cast %111 : vector<1x1x16x8xf32> to vector<16x8xf32>
    %113 = arith.truncf %112 : vector<16x8xf32> to vector<16x8xbf16>
    %c12 = arith.constant 12 : index
    %c0_86 = arith.constant 0 : index
    %c0_87 = arith.constant 0 : index
    %114 = vector.load %arg6[%c12, %c0_86, %c0_87] : memref<16x8x128xbf16, #tpu.memory_space<vmem>>, vector<1x8x128xbf16>
    %115 = vector.shape_cast %114 : vector<1x8x128xbf16> to vector<8x128xbf16>
    %cst_88 = arith.constant dense<0.000000e+00> : vector<16x128xf32>
    %116 = tpu.matmul %113, %115, %cst_88 {dimension_numbers = #tpu.dot_dimension_numbers<[1], [0], [0], [1], [0, 0, 1, 1], [], []>} : vector<16x8xbf16>, vector<8x128xbf16>, vector<16x128xf32> -> vector<16x128xf32>
    %117 = arith.addf %108, %116 : vector<16x128xf32>
    %c1_i32_89 = arith.constant 1 : i32
    %118 = arith.addi %arg1, %c1_i32_89 : i32
    %c0_90 = arith.constant 0 : index
    %119 = arith.index_cast %118 : i32 to index
    %c0_91 = arith.constant 0 : index
    %c0_92 = arith.constant 0 : index
    %120 = vector.load %arg5[%c0_90, %119, %c0_91, %c0_92] : memref<1x17x17x8xf32, #tpu.memory_space<vmem>>, vector<1x1x16x8xf32>
    %121 = vector.shape_cast %120 : vector<1x1x16x8xf32> to vector<16x8xf32>
    %122 = arith.truncf %121 : vector<16x8xf32> to vector<16x8xbf16>
    %c13 = arith.constant 13 : index
    %c0_93 = arith.constant 0 : index
    %c0_94 = arith.constant 0 : index
    %123 = vector.load %arg6[%c13, %c0_93, %c0_94] : memref<16x8x128xbf16, #tpu.memory_space<vmem>>, vector<1x8x128xbf16>
    %124 = vector.shape_cast %123 : vector<1x8x128xbf16> to vector<8x128xbf16>
    %cst_95 = arith.constant dense<0.000000e+00> : vector<16x128xf32>
    %125 = tpu.matmul %122, %124, %cst_95 {dimension_numbers = #tpu.dot_dimension_numbers<[1], [0], [0], [1], [0, 0, 1, 1], [], []>} : vector<16x8xbf16>, vector<8x128xbf16>, vector<16x128xf32> -> vector<16x128xf32>
    %126 = arith.addf %117, %125 : vector<16x128xf32>
    %c1_i32_96 = arith.constant 1 : i32
    %127 = arith.addi %arg1, %c1_i32_96 : i32
    %c0_97 = arith.constant 0 : index
    %128 = arith.index_cast %127 : i32 to index
    %c1_98 = arith.constant 1 : index
    %c0_99 = arith.constant 0 : index
    %129 = vector.load %arg4[%c0_97, %128, %c1_98, %c0_99] : memref<1x17x17x8xf32, #tpu.memory_space<vmem>>, vector<1x1x16x8xf32>
    %130 = vector.shape_cast %129 : vector<1x1x16x8xf32> to vector<16x8xf32>
    %131 = arith.truncf %130 : vector<16x8xf32> to vector<16x8xbf16>
    %c14 = arith.constant 14 : index
    %c0_100 = arith.constant 0 : index
    %c0_101 = arith.constant 0 : index
    %132 = vector.load %arg6[%c14, %c0_100, %c0_101] : memref<16x8x128xbf16, #tpu.memory_space<vmem>>, vector<1x8x128xbf16>
    %133 = vector.shape_cast %132 : vector<1x8x128xbf16> to vector<8x128xbf16>
    %cst_102 = arith.constant dense<0.000000e+00> : vector<16x128xf32>
    %134 = tpu.matmul %131, %133, %cst_102 {dimension_numbers = #tpu.dot_dimension_numbers<[1], [0], [0], [1], [0, 0, 1, 1], [], []>} : vector<16x8xbf16>, vector<8x128xbf16>, vector<16x128xf32> -> vector<16x128xf32>
    %135 = arith.addf %126, %134 : vector<16x128xf32>
    %c1_i32_103 = arith.constant 1 : i32
    %136 = arith.addi %arg1, %c1_i32_103 : i32
    %c0_104 = arith.constant 0 : index
    %137 = arith.index_cast %136 : i32 to index
    %c1_105 = arith.constant 1 : index
    %c0_106 = arith.constant 0 : index
    %138 = vector.load %arg5[%c0_104, %137, %c1_105, %c0_106] : memref<1x17x17x8xf32, #tpu.memory_space<vmem>>, vector<1x1x16x8xf32>
    %139 = vector.shape_cast %138 : vector<1x1x16x8xf32> to vector<16x8xf32>
    %140 = arith.truncf %139 : vector<16x8xf32> to vector<16x8xbf16>
    %c15 = arith.constant 15 : index
    %c0_107 = arith.constant 0 : index
    %c0_108 = arith.constant 0 : index
    %141 = vector.load %arg6[%c15, %c0_107, %c0_108] : memref<16x8x128xbf16, #tpu.memory_space<vmem>>, vector<1x8x128xbf16>
    %142 = vector.shape_cast %141 : vector<1x8x128xbf16> to vector<8x128xbf16>
    %cst_109 = arith.constant dense<0.000000e+00> : vector<16x128xf32>
    %143 = tpu.matmul %140, %142, %cst_109 {dimension_numbers = #tpu.dot_dimension_numbers<[1], [0], [0], [1], [0, 0, 1, 1], [], []>} : vector<16x8xbf16>, vector<8x128xbf16>, vector<16x128xf32> -> vector<16x128xf32>
    %144 = arith.addf %135, %143 : vector<16x128xf32>
    %c0_110 = arith.constant 0 : index
    %c0_111 = arith.constant 0 : index
    %c0_112 = arith.constant 0 : index
    %c0_113 = arith.constant 0 : index
    %145 = vector.load %arg7[%c0_110, %c0_111, %c0_112, %c0_113] : memref<1x1x16x128xf32, #tpu.memory_space<vmem>>, vector<1x1x16x128xf32>
    %146 = vector.shape_cast %145 : vector<1x1x16x128xf32> to vector<16x128xf32>
    %147 = vector.shape_cast %144 : vector<16x128xf32> to vector<1x1x16x128xf32>
    tpu.vector_store %arg7[%c0_110, %c0_111, %c0_112, %c0_113], %147 {strides = array<i32>} : memref<1x1x16x128xf32, #tpu.memory_space<vmem>>, vector<1x1x16x128xf32>,
    %c0_i32_114 = arith.constant 0 : i32
    %148 = arith.cmpi eq, %arg0, %c0_i32_114 : i32
    %c0_i32_115 = arith.constant 0 : i32
    %149 = arith.cmpi eq, %arg1, %c0_i32_115 : i32
    %150 = arith.andi %148, %149 : i1
    %151 = arith.extui %150 : i1 to i32
    %c0_i32_116 = arith.constant 0 : i32
    %152 = arith.cmpi ne, %151, %c0_i32_116 : i32
    scf.if %152 {
      %cst_127 = arith.constant 0.000000e+00 : f32
      %164 = vector.broadcast %cst_127 : f32 to vector<1x128xf32>
      %c0_128 = arith.constant 0 : index
      %c0_129 = arith.constant 0 : index
      %165 = vector.load %arg8[%c0_128, %c0_129] : memref<1x128xf32, #tpu.memory_space<vmem>>, vector<1x128xf32>
      tpu.vector_store %arg8[%c0_128, %c0_129], %164 {strides = array<i32>} : memref<1x128xf32, #tpu.memory_space<vmem>>, vector<1x128xf32>,
      %cst_130 = arith.constant 0.000000e+00 : f32
      %166 = vector.broadcast %cst_130 : f32 to vector<1x128xf32>
      %c0_131 = arith.constant 0 : index
      %c0_132 = arith.constant 0 : index
      %167 = vector.load %arg9[%c0_131, %c0_132] : memref<1x128xf32, #tpu.memory_space<vmem>>, vector<1x128xf32>
      tpu.vector_store %arg9[%c0_131, %c0_132], %166 {strides = array<i32>} : memref<1x128xf32, #tpu.memory_space<vmem>>, vector<1x128xf32>,
    } else {
    }
    %c0_117 = arith.constant 0 : index
    %c0_118 = arith.constant 0 : index
    %153 = vector.load %arg8[%c0_117, %c0_118] : memref<1x128xf32, #tpu.memory_space<vmem>>, vector<1x128xf32>
    %cst_119 = arith.constant dense<0.000000e+00> : vector<128xf32>
    %154 = vector.multi_reduction <add>, %144, %cst_119 [0] : vector<16x128xf32> to vector<128xf32>
    %155 = vector.shape_cast %154 : vector<128xf32> to vector<1x128xf32>
    %156 = arith.addf %153, %155 : vector<1x128xf32>
    %c0_120 = arith.constant 0 : index
    %c0_121 = arith.constant 0 : index
    %157 = vector.load %arg8[%c0_120, %c0_121] : memref<1x128xf32, #tpu.memory_space<vmem>>, vector<1x128xf32>
    tpu.vector_store %arg8[%c0_120, %c0_121], %156 {strides = array<i32>} : memref<1x128xf32, #tpu.memory_space<vmem>>, vector<1x128xf32>,
    %c0_122 = arith.constant 0 : index
    %c0_123 = arith.constant 0 : index
    %158 = vector.load %arg9[%c0_122, %c0_123] : memref<1x128xf32, #tpu.memory_space<vmem>>, vector<1x128xf32>
    %159 = arith.mulf %144, %144 : vector<16x128xf32>
    %cst_124 = arith.constant dense<0.000000e+00> : vector<128xf32>
    %160 = vector.multi_reduction <add>, %159, %cst_124 [0] : vector<16x128xf32> to vector<128xf32>
    %161 = vector.shape_cast %160 : vector<128xf32> to vector<1x128xf32>
    %162 = arith.addf %158, %161 : vector<1x128xf32>
    %c0_125 = arith.constant 0 : index
    %c0_126 = arith.constant 0 : index
    %163 = vector.load %arg9[%c0_125, %c0_126] : memref<1x128xf32, #tpu.memory_space<vmem>>, vector<1x128xf32>
    tpu.vector_store %arg9[%c0_125, %c0_126], %162 {strides = array<i32>} : memref<1x128xf32, #tpu.memory_space<vmem>>, vector<1x128xf32>,
    return
  }
  func.func @transform_0(%arg0: i32, %arg1: i32) -> (i32, i32, i32, i32) {
    %c0_i32 = arith.constant 0 : i32
    %c0_i32_0 = arith.constant 0 : i32
    %c0_i32_1 = arith.constant 0 : i32
    %c0_i32_2 = arith.constant 0 : i32
    return %arg0, %c0_i32, %c0_i32_0, %c0_i32_1 : i32, i32, i32, i32
  }
  func.func @transform_1(%arg0: i32, %arg1: i32) -> (i32, i32, i32, i32) {
    %c0_i32 = arith.constant 0 : i32
    %c0_i32_0 = arith.constant 0 : i32
    %c0_i32_1 = arith.constant 0 : i32
    %c0_i32_2 = arith.constant 0 : i32
    return %arg0, %c0_i32, %c0_i32_0, %c0_i32_1 : i32, i32, i32, i32
  }
  func.func @transform_2(%arg0: i32, %arg1: i32) -> (i32, i32, i32, i32) {
    %c0_i32 = arith.constant 0 : i32
    %c0_i32_0 = arith.constant 0 : i32
    %c0_i32_1 = arith.constant 0 : i32
    %c0_i32_2 = arith.constant 0 : i32
    return %arg0, %c0_i32, %c0_i32_0, %c0_i32_1 : i32, i32, i32, i32
  }
  func.func @transform_3(%arg0: i32, %arg1: i32) -> (i32, i32, i32, i32) {
    %c0_i32 = arith.constant 0 : i32
    %c0_i32_0 = arith.constant 0 : i32
    %c0_i32_1 = arith.constant 0 : i32
    %c0_i32_2 = arith.constant 0 : i32
    return %arg0, %c0_i32, %c0_i32_0, %c0_i32_1 : i32, i32, i32, i32
  }
  func.func @transform_4(%arg0: i32, %arg1: i32) -> (i32, i32, i32) {
    %c0_i32 = arith.constant 0 : i32
    %c0_i32_0 = arith.constant 0 : i32
    %c0_i32_1 = arith.constant 0 : i32
    %c0_i32_2 = arith.constant 0 : i32
    return %c0_i32, %c0_i32_0, %c0_i32_1 : i32, i32, i32
  }
  func.func @transform_5(%arg0: i32, %arg1: i32) -> (i32, i32, i32, i32) {
    %c0_i32 = arith.constant 0 : i32
    %c0_i32_0 = arith.constant 0 : i32
    %c0_i32_1 = arith.constant 0 : i32
    return %arg0, %arg1, %c0_i32, %c0_i32_0 : i32, i32, i32, i32
  }
  func.func @transform_6(%arg0: i32, %arg1: i32) -> (i32, i32) {
    %c0_i32 = arith.constant 0 : i32
    %c0_i32_0 = arith.constant 0 : i32
    %c0_i32_1 = arith.constant 0 : i32
    return %c0_i32, %c0_i32_0 : i32, i32
  }
  func.func @transform_7(%arg0: i32, %arg1: i32) -> (i32, i32) {
    %c0_i32 = arith.constant 0 : i32
    %c0_i32_0 = arith.constant 0 : i32
    %c0_i32_1 = arith.constant 0 : i32
    return %c0_i32, %c0_i32_0 : i32, i32
  }
}

module attributes {stable_mosaic.version = 11 : i64} {
  func.func @_affine_lrelu_kernel(%arg0: i32, %arg1: memref<1x8x8x128xf32, #tpu.memory_space<vmem>>, %arg2: memref<1x1x128xf32, #tpu.memory_space<vmem>>, %arg3: memref<1x1x128xf32, #tpu.memory_space<vmem>>, %arg4: memref<1x8x8x128xf32, #tpu.memory_space<vmem>>) attributes {dimension_semantics = [#tpu.dimension_semantics<parallel>], iteration_bounds = array<i64: 2>, scalar_prefetch = 0 : i64, scratch_operands = 0 : i64, tpu.core_type = #tpu.core_type<tc>, window_params = [{transform_indices = @transform_0, window_bounds = array<i64: 1, 8, 8, 128>}, {pipeline_mode = #tpu.pipeline_mode<synchronous>, transform_indices = @transform_1, window_bounds = array<i64: 1, 1, 128>}, {pipeline_mode = #tpu.pipeline_mode<synchronous>, transform_indices = @transform_2, window_bounds = array<i64: 1, 1, 128>}, {transform_indices = @transform_3, window_bounds = array<i64: 1, 8, 8, 128>}]} {
    %c0 = arith.constant 0 : index
    %c0_0 = arith.constant 0 : index
    %c0_1 = arith.constant 0 : index
    %c0_2 = arith.constant 0 : index
    %0 = vector.load %arg1[%c0, %c0_0, %c0_1, %c0_2] : memref<1x8x8x128xf32, #tpu.memory_space<vmem>>, vector<1x8x8x128xf32>
    %1 = vector.shape_cast %0 : vector<1x8x8x128xf32> to vector<8x8x128xf32>
    %c0_3 = arith.constant 0 : index
    %c0_4 = arith.constant 0 : index
    %c0_5 = arith.constant 0 : index
    %2 = vector.load %arg2[%c0_3, %c0_4, %c0_5] : memref<1x1x128xf32, #tpu.memory_space<vmem>>, vector<1x1x128xf32>
    %3 = vector.broadcast %2 : vector<1x1x128xf32> to vector<8x8x128xf32>
    %4 = arith.mulf %1, %3 : vector<8x8x128xf32>
    %c0_6 = arith.constant 0 : index
    %c0_7 = arith.constant 0 : index
    %c0_8 = arith.constant 0 : index
    %5 = vector.load %arg3[%c0_6, %c0_7, %c0_8] : memref<1x1x128xf32, #tpu.memory_space<vmem>>, vector<1x1x128xf32>
    %6 = vector.broadcast %5 : vector<1x1x128xf32> to vector<8x8x128xf32>
    %7 = arith.addf %4, %6 : vector<8x8x128xf32>
    %cst = arith.constant 2.000000e-01 : f32
    %8 = vector.broadcast %cst : f32 to vector<8x8x128xf32>
    %9 = arith.mulf %8, %7 : vector<8x8x128xf32>
    %10 = arith.maximumf %7, %9 : vector<8x8x128xf32>
    %c0_9 = arith.constant 0 : index
    %c0_10 = arith.constant 0 : index
    %c0_11 = arith.constant 0 : index
    %c0_12 = arith.constant 0 : index
    %11 = vector.load %arg4[%c0_9, %c0_10, %c0_11, %c0_12] : memref<1x8x8x128xf32, #tpu.memory_space<vmem>>, vector<1x8x8x128xf32>
    %12 = vector.shape_cast %11 : vector<1x8x8x128xf32> to vector<8x8x128xf32>
    %13 = vector.shape_cast %10 : vector<8x8x128xf32> to vector<1x8x8x128xf32>
    tpu.vector_store %arg4[%c0_9, %c0_10, %c0_11, %c0_12], %13 {strides = array<i32>} : memref<1x8x8x128xf32, #tpu.memory_space<vmem>>, vector<1x8x8x128xf32>,
    return
  }
  func.func @transform_0(%arg0: i32) -> (i32, i32, i32, i32) {
    %c0_i32 = arith.constant 0 : i32
    %c0_i32_0 = arith.constant 0 : i32
    %c0_i32_1 = arith.constant 0 : i32
    %c0_i32_2 = arith.constant 0 : i32
    return %arg0, %c0_i32, %c0_i32_0, %c0_i32_1 : i32, i32, i32, i32
  }
  func.func @transform_1(%arg0: i32) -> (i32, i32, i32) {
    %c0_i32 = arith.constant 0 : i32
    %c0_i32_0 = arith.constant 0 : i32
    %c0_i32_1 = arith.constant 0 : i32
    %c0_i32_2 = arith.constant 0 : i32
    return %c0_i32, %c0_i32_0, %c0_i32_1 : i32, i32, i32
  }
  func.func @transform_2(%arg0: i32) -> (i32, i32, i32) {
    %c0_i32 = arith.constant 0 : i32
    %c0_i32_0 = arith.constant 0 : i32
    %c0_i32_1 = arith.constant 0 : i32
    %c0_i32_2 = arith.constant 0 : i32
    return %c0_i32, %c0_i32_0, %c0_i32_1 : i32, i32, i32
  }
  func.func @transform_3(%arg0: i32) -> (i32, i32, i32, i32) {
    %c0_i32 = arith.constant 0 : i32
    %c0_i32_0 = arith.constant 0 : i32
    %c0_i32_1 = arith.constant 0 : i32
    %c0_i32_2 = arith.constant 0 : i32
    return %arg0, %c0_i32, %c0_i32_0, %c0_i32_1 : i32, i32, i32, i32
  }
}

module attributes {stable_mosaic.version = 11 : i64} {
  func.func @kernel(%arg0: i32, %arg1: i32, %arg2: memref<1x9x9x128xf32, #tpu.memory_space<vmem>>, %arg3: memref<1x9x9x128xf32, #tpu.memory_space<vmem>>, %arg4: memref<1x9x9x128xf32, #tpu.memory_space<vmem>>, %arg5: memref<1x9x9x128xf32, #tpu.memory_space<vmem>>, %arg6: memref<16x128x128xbf16, #tpu.memory_space<vmem>>, %arg7: memref<1x1x8x128xf32, #tpu.memory_space<vmem>>, %arg8: memref<1x128xf32, #tpu.memory_space<vmem>>, %arg9: memref<1x128xf32, #tpu.memory_space<vmem>>) attributes {dimension_semantics = [#tpu.dimension_semantics<arbitrary>, #tpu.dimension_semantics<arbitrary>], iteration_bounds = array<i64: 2, 8>, scalar_prefetch = 0 : i64, scratch_operands = 0 : i64, tpu.core_type = #tpu.core_type<tc>, window_params = [{transform_indices = @transform_0, window_bounds = array<i64: 1, 9, 9, 128>}, {transform_indices = @transform_1, window_bounds = array<i64: 1, 9, 9, 128>}, {transform_indices = @transform_2, window_bounds = array<i64: 1, 9, 9, 128>}, {transform_indices = @transform_3, window_bounds = array<i64: 1, 9, 9, 128>}, {pipeline_mode = #tpu.pipeline_mode<synchronous>, transform_indices = @transform_4, window_bounds = array<i64: 16, 128, 128>}, {transform_indices = @transform_5, window_bounds = array<i64: 1, 1, 8, 128>}, {pipeline_mode = #tpu.pipeline_mode<synchronous>, transform_indices = @transform_6, window_bounds = array<i64: 1, 128>}, {pipeline_mode = #tpu.pipeline_mode<synchronous>, transform_indices = @transform_7, window_bounds = array<i64: 1, 128>}]} {
    %cst = arith.constant 0.000000e+00 : f32
    %0 = vector.broadcast %cst : f32 to vector<8x128xf32>
    %c0_i32 = arith.constant 0 : i32
    %1 = arith.addi %arg1, %c0_i32 : i32
    %c0 = arith.constant 0 : index
    %2 = arith.index_cast %1 : i32 to index
    %c0_0 = arith.constant 0 : index
    %c0_1 = arith.constant 0 : index
    %3 = vector.load %arg2[%c0, %2, %c0_0, %c0_1] : memref<1x9x9x128xf32, #tpu.memory_space<vmem>>, vector<1x1x8x128xf32>
    %4 = vector.shape_cast %3 : vector<1x1x8x128xf32> to vector<8x128xf32>
    %5 = arith.truncf %4 : vector<8x128xf32> to vector<8x128xbf16>
    %c0_2 = arith.constant 0 : index
    %c0_3 = arith.constant 0 : index
    %c0_4 = arith.constant 0 : index
    %6 = vector.load %arg6[%c0_2, %c0_3, %c0_4] : memref<16x128x128xbf16, #tpu.memory_space<vmem>>, vector<1x128x128xbf16>
    %7 = vector.shape_cast %6 : vector<1x128x128xbf16> to vector<128x128xbf16>
    %cst_5 = arith.constant dense<0.000000e+00> : vector<8x128xf32>
    %8 = tpu.matmul %5, %7, %cst_5 {dimension_numbers = #tpu.dot_dimension_numbers<[1], [0], [0], [1], [0, 0, 1, 1], [], []>} : vector<8x128xbf16>, vector<128x128xbf16>, vector<8x128xf32> -> vector<8x128xf32>
    %9 = arith.addf %0, %8 : vector<8x128xf32>
    %c0_i32_6 = arith.constant 0 : i32
    %10 = arith.addi %arg1, %c0_i32_6 : i32
    %c0_7 = arith.constant 0 : index
    %11 = arith.index_cast %10 : i32 to index
    %c0_8 = arith.constant 0 : index
    %c0_9 = arith.constant 0 : index
    %12 = vector.load %arg3[%c0_7, %11, %c0_8, %c0_9] : memref<1x9x9x128xf32, #tpu.memory_space<vmem>>, vector<1x1x8x128xf32>
    %13 = vector.shape_cast %12 : vector<1x1x8x128xf32> to vector<8x128xf32>
    %14 = arith.truncf %13 : vector<8x128xf32> to vector<8x128xbf16>
    %c1 = arith.constant 1 : index
    %c0_10 = arith.constant 0 : index
    %c0_11 = arith.constant 0 : index
    %15 = vector.load %arg6[%c1, %c0_10, %c0_11] : memref<16x128x128xbf16, #tpu.memory_space<vmem>>, vector<1x128x128xbf16>
    %16 = vector.shape_cast %15 : vector<1x128x128xbf16> to vector<128x128xbf16>
    %cst_12 = arith.constant dense<0.000000e+00> : vector<8x128xf32>
    %17 = tpu.matmul %14, %16, %cst_12 {dimension_numbers = #tpu.dot_dimension_numbers<[1], [0], [0], [1], [0, 0, 1, 1], [], []>} : vector<8x128xbf16>, vector<128x128xbf16>, vector<8x128xf32> -> vector<8x128xf32>
    %18 = arith.addf %9, %17 : vector<8x128xf32>
    %c0_i32_13 = arith.constant 0 : i32
    %19 = arith.addi %arg1, %c0_i32_13 : i32
    %c0_14 = arith.constant 0 : index
    %20 = arith.index_cast %19 : i32 to index
    %c1_15 = arith.constant 1 : index
    %c0_16 = arith.constant 0 : index
    %21 = vector.load %arg2[%c0_14, %20, %c1_15, %c0_16] : memref<1x9x9x128xf32, #tpu.memory_space<vmem>>, vector<1x1x8x128xf32>
    %22 = vector.shape_cast %21 : vector<1x1x8x128xf32> to vector<8x128xf32>
    %23 = arith.truncf %22 : vector<8x128xf32> to vector<8x128xbf16>
    %c2 = arith.constant 2 : index
    %c0_17 = arith.constant 0 : index
    %c0_18 = arith.constant 0 : index
    %24 = vector.load %arg6[%c2, %c0_17, %c0_18] : memref<16x128x128xbf16, #tpu.memory_space<vmem>>, vector<1x128x128xbf16>
    %25 = vector.shape_cast %24 : vector<1x128x128xbf16> to vector<128x128xbf16>
    %cst_19 = arith.constant dense<0.000000e+00> : vector<8x128xf32>
    %26 = tpu.matmul %23, %25, %cst_19 {dimension_numbers = #tpu.dot_dimension_numbers<[1], [0], [0], [1], [0, 0, 1, 1], [], []>} : vector<8x128xbf16>, vector<128x128xbf16>, vector<8x128xf32> -> vector<8x128xf32>
    %27 = arith.addf %18, %26 : vector<8x128xf32>
    %c0_i32_20 = arith.constant 0 : i32
    %28 = arith.addi %arg1, %c0_i32_20 : i32
    %c0_21 = arith.constant 0 : index
    %29 = arith.index_cast %28 : i32 to index
    %c1_22 = arith.constant 1 : index
    %c0_23 = arith.constant 0 : index
    %30 = vector.load %arg3[%c0_21, %29, %c1_22, %c0_23] : memref<1x9x9x128xf32, #tpu.memory_space<vmem>>, vector<1x1x8x128xf32>
    %31 = vector.shape_cast %30 : vector<1x1x8x128xf32> to vector<8x128xf32>
    %32 = arith.truncf %31 : vector<8x128xf32> to vector<8x128xbf16>
    %c3 = arith.constant 3 : index
    %c0_24 = arith.constant 0 : index
    %c0_25 = arith.constant 0 : index
    %33 = vector.load %arg6[%c3, %c0_24, %c0_25] : memref<16x128x128xbf16, #tpu.memory_space<vmem>>, vector<1x128x128xbf16>
    %34 = vector.shape_cast %33 : vector<1x128x128xbf16> to vector<128x128xbf16>
    %cst_26 = arith.constant dense<0.000000e+00> : vector<8x128xf32>
    %35 = tpu.matmul %32, %34, %cst_26 {dimension_numbers = #tpu.dot_dimension_numbers<[1], [0], [0], [1], [0, 0, 1, 1], [], []>} : vector<8x128xbf16>, vector<128x128xbf16>, vector<8x128xf32> -> vector<8x128xf32>
    %36 = arith.addf %27, %35 : vector<8x128xf32>
    %c0_i32_27 = arith.constant 0 : i32
    %37 = arith.addi %arg1, %c0_i32_27 : i32
    %c0_28 = arith.constant 0 : index
    %38 = arith.index_cast %37 : i32 to index
    %c0_29 = arith.constant 0 : index
    %c0_30 = arith.constant 0 : index
    %39 = vector.load %arg4[%c0_28, %38, %c0_29, %c0_30] : memref<1x9x9x128xf32, #tpu.memory_space<vmem>>, vector<1x1x8x128xf32>
    %40 = vector.shape_cast %39 : vector<1x1x8x128xf32> to vector<8x128xf32>
    %41 = arith.truncf %40 : vector<8x128xf32> to vector<8x128xbf16>
    %c4 = arith.constant 4 : index
    %c0_31 = arith.constant 0 : index
    %c0_32 = arith.constant 0 : index
    %42 = vector.load %arg6[%c4, %c0_31, %c0_32] : memref<16x128x128xbf16, #tpu.memory_space<vmem>>, vector<1x128x128xbf16>
    %43 = vector.shape_cast %42 : vector<1x128x128xbf16> to vector<128x128xbf16>
    %cst_33 = arith.constant dense<0.000000e+00> : vector<8x128xf32>
    %44 = tpu.matmul %41, %43, %cst_33 {dimension_numbers = #tpu.dot_dimension_numbers<[1], [0], [0], [1], [0, 0, 1, 1], [], []>} : vector<8x128xbf16>, vector<128x128xbf16>, vector<8x128xf32> -> vector<8x128xf32>
    %45 = arith.addf %36, %44 : vector<8x128xf32>
    %c0_i32_34 = arith.constant 0 : i32
    %46 = arith.addi %arg1, %c0_i32_34 : i32
    %c0_35 = arith.constant 0 : index
    %47 = arith.index_cast %46 : i32 to index
    %c0_36 = arith.constant 0 : index
    %c0_37 = arith.constant 0 : index
    %48 = vector.load %arg5[%c0_35, %47, %c0_36, %c0_37] : memref<1x9x9x128xf32, #tpu.memory_space<vmem>>, vector<1x1x8x128xf32>
    %49 = vector.shape_cast %48 : vector<1x1x8x128xf32> to vector<8x128xf32>
    %50 = arith.truncf %49 : vector<8x128xf32> to vector<8x128xbf16>
    %c5 = arith.constant 5 : index
    %c0_38 = arith.constant 0 : index
    %c0_39 = arith.constant 0 : index
    %51 = vector.load %arg6[%c5, %c0_38, %c0_39] : memref<16x128x128xbf16, #tpu.memory_space<vmem>>, vector<1x128x128xbf16>
    %52 = vector.shape_cast %51 : vector<1x128x128xbf16> to vector<128x128xbf16>
    %cst_40 = arith.constant dense<0.000000e+00> : vector<8x128xf32>
    %53 = tpu.matmul %50, %52, %cst_40 {dimension_numbers = #tpu.dot_dimension_numbers<[1], [0], [0], [1], [0, 0, 1, 1], [], []>} : vector<8x128xbf16>, vector<128x128xbf16>, vector<8x128xf32> -> vector<8x128xf32>
    %54 = arith.addf %45, %53 : vector<8x128xf32>
    %c0_i32_41 = arith.constant 0 : i32
    %55 = arith.addi %arg1, %c0_i32_41 : i32
    %c0_42 = arith.constant 0 : index
    %56 = arith.index_cast %55 : i32 to index
    %c1_43 = arith.constant 1 : index
    %c0_44 = arith.constant 0 : index
    %57 = vector.load %arg4[%c0_42, %56, %c1_43, %c0_44] : memref<1x9x9x128xf32, #tpu.memory_space<vmem>>, vector<1x1x8x128xf32>
    %58 = vector.shape_cast %57 : vector<1x1x8x128xf32> to vector<8x128xf32>
    %59 = arith.truncf %58 : vector<8x128xf32> to vector<8x128xbf16>
    %c6 = arith.constant 6 : index
    %c0_45 = arith.constant 0 : index
    %c0_46 = arith.constant 0 : index
    %60 = vector.load %arg6[%c6, %c0_45, %c0_46] : memref<16x128x128xbf16, #tpu.memory_space<vmem>>, vector<1x128x128xbf16>
    %61 = vector.shape_cast %60 : vector<1x128x128xbf16> to vector<128x128xbf16>
    %cst_47 = arith.constant dense<0.000000e+00> : vector<8x128xf32>
    %62 = tpu.matmul %59, %61, %cst_47 {dimension_numbers = #tpu.dot_dimension_numbers<[1], [0], [0], [1], [0, 0, 1, 1], [], []>} : vector<8x128xbf16>, vector<128x128xbf16>, vector<8x128xf32> -> vector<8x128xf32>
    %63 = arith.addf %54, %62 : vector<8x128xf32>
    %c0_i32_48 = arith.constant 0 : i32
    %64 = arith.addi %arg1, %c0_i32_48 : i32
    %c0_49 = arith.constant 0 : index
    %65 = arith.index_cast %64 : i32 to index
    %c1_50 = arith.constant 1 : index
    %c0_51 = arith.constant 0 : index
    %66 = vector.load %arg5[%c0_49, %65, %c1_50, %c0_51] : memref<1x9x9x128xf32, #tpu.memory_space<vmem>>, vector<1x1x8x128xf32>
    %67 = vector.shape_cast %66 : vector<1x1x8x128xf32> to vector<8x128xf32>
    %68 = arith.truncf %67 : vector<8x128xf32> to vector<8x128xbf16>
    %c7 = arith.constant 7 : index
    %c0_52 = arith.constant 0 : index
    %c0_53 = arith.constant 0 : index
    %69 = vector.load %arg6[%c7, %c0_52, %c0_53] : memref<16x128x128xbf16, #tpu.memory_space<vmem>>, vector<1x128x128xbf16>
    %70 = vector.shape_cast %69 : vector<1x128x128xbf16> to vector<128x128xbf16>
    %cst_54 = arith.constant dense<0.000000e+00> : vector<8x128xf32>
    %71 = tpu.matmul %68, %70, %cst_54 {dimension_numbers = #tpu.dot_dimension_numbers<[1], [0], [0], [1], [0, 0, 1, 1], [], []>} : vector<8x128xbf16>, vector<128x128xbf16>, vector<8x128xf32> -> vector<8x128xf32>
    %72 = arith.addf %63, %71 : vector<8x128xf32>
    %c1_i32 = arith.constant 1 : i32
    %73 = arith.addi %arg1, %c1_i32 : i32
    %c0_55 = arith.constant 0 : index
    %74 = arith.index_cast %73 : i32 to index
    %c0_56 = arith.constant 0 : index
    %c0_57 = arith.constant 0 : index
    %75 = vector.load %arg2[%c0_55, %74, %c0_56, %c0_57] : memref<1x9x9x128xf32, #tpu.memory_space<vmem>>, vector<1x1x8x128xf32>
    %76 = vector.shape_cast %75 : vector<1x1x8x128xf32> to vector<8x128xf32>
    %77 = arith.truncf %76 : vector<8x128xf32> to vector<8x128xbf16>
    %c8 = arith.constant 8 : index
    %c0_58 = arith.constant 0 : index
    %c0_59 = arith.constant 0 : index
    %78 = vector.load %arg6[%c8, %c0_58, %c0_59] : memref<16x128x128xbf16, #tpu.memory_space<vmem>>, vector<1x128x128xbf16>
    %79 = vector.shape_cast %78 : vector<1x128x128xbf16> to vector<128x128xbf16>
    %cst_60 = arith.constant dense<0.000000e+00> : vector<8x128xf32>
    %80 = tpu.matmul %77, %79, %cst_60 {dimension_numbers = #tpu.dot_dimension_numbers<[1], [0], [0], [1], [0, 0, 1, 1], [], []>} : vector<8x128xbf16>, vector<128x128xbf16>, vector<8x128xf32> -> vector<8x128xf32>
    %81 = arith.addf %72, %80 : vector<8x128xf32>
    %c1_i32_61 = arith.constant 1 : i32
    %82 = arith.addi %arg1, %c1_i32_61 : i32
    %c0_62 = arith.constant 0 : index
    %83 = arith.index_cast %82 : i32 to index
    %c0_63 = arith.constant 0 : index
    %c0_64 = arith.constant 0 : index
    %84 = vector.load %arg3[%c0_62, %83, %c0_63, %c0_64] : memref<1x9x9x128xf32, #tpu.memory_space<vmem>>, vector<1x1x8x128xf32>
    %85 = vector.shape_cast %84 : vector<1x1x8x128xf32> to vector<8x128xf32>
    %86 = arith.truncf %85 : vector<8x128xf32> to vector<8x128xbf16>
    %c9 = arith.constant 9 : index
    %c0_65 = arith.constant 0 : index
    %c0_66 = arith.constant 0 : index
    %87 = vector.load %arg6[%c9, %c0_65, %c0_66] : memref<16x128x128xbf16, #tpu.memory_space<vmem>>, vector<1x128x128xbf16>
    %88 = vector.shape_cast %87 : vector<1x128x128xbf16> to vector<128x128xbf16>
    %cst_67 = arith.constant dense<0.000000e+00> : vector<8x128xf32>
    %89 = tpu.matmul %86, %88, %cst_67 {dimension_numbers = #tpu.dot_dimension_numbers<[1], [0], [0], [1], [0, 0, 1, 1], [], []>} : vector<8x128xbf16>, vector<128x128xbf16>, vector<8x128xf32> -> vector<8x128xf32>
    %90 = arith.addf %81, %89 : vector<8x128xf32>
    %c1_i32_68 = arith.constant 1 : i32
    %91 = arith.addi %arg1, %c1_i32_68 : i32
    %c0_69 = arith.constant 0 : index
    %92 = arith.index_cast %91 : i32 to index
    %c1_70 = arith.constant 1 : index
    %c0_71 = arith.constant 0 : index
    %93 = vector.load %arg2[%c0_69, %92, %c1_70, %c0_71] : memref<1x9x9x128xf32, #tpu.memory_space<vmem>>, vector<1x1x8x128xf32>
    %94 = vector.shape_cast %93 : vector<1x1x8x128xf32> to vector<8x128xf32>
    %95 = arith.truncf %94 : vector<8x128xf32> to vector<8x128xbf16>
    %c10 = arith.constant 10 : index
    %c0_72 = arith.constant 0 : index
    %c0_73 = arith.constant 0 : index
    %96 = vector.load %arg6[%c10, %c0_72, %c0_73] : memref<16x128x128xbf16, #tpu.memory_space<vmem>>, vector<1x128x128xbf16>
    %97 = vector.shape_cast %96 : vector<1x128x128xbf16> to vector<128x128xbf16>
    %cst_74 = arith.constant dense<0.000000e+00> : vector<8x128xf32>
    %98 = tpu.matmul %95, %97, %cst_74 {dimension_numbers = #tpu.dot_dimension_numbers<[1], [0], [0], [1], [0, 0, 1, 1], [], []>} : vector<8x128xbf16>, vector<128x128xbf16>, vector<8x128xf32> -> vector<8x128xf32>
    %99 = arith.addf %90, %98 : vector<8x128xf32>
    %c1_i32_75 = arith.constant 1 : i32
    %100 = arith.addi %arg1, %c1_i32_75 : i32
    %c0_76 = arith.constant 0 : index
    %101 = arith.index_cast %100 : i32 to index
    %c1_77 = arith.constant 1 : index
    %c0_78 = arith.constant 0 : index
    %102 = vector.load %arg3[%c0_76, %101, %c1_77, %c0_78] : memref<1x9x9x128xf32, #tpu.memory_space<vmem>>, vector<1x1x8x128xf32>
    %103 = vector.shape_cast %102 : vector<1x1x8x128xf32> to vector<8x128xf32>
    %104 = arith.truncf %103 : vector<8x128xf32> to vector<8x128xbf16>
    %c11 = arith.constant 11 : index
    %c0_79 = arith.constant 0 : index
    %c0_80 = arith.constant 0 : index
    %105 = vector.load %arg6[%c11, %c0_79, %c0_80] : memref<16x128x128xbf16, #tpu.memory_space<vmem>>, vector<1x128x128xbf16>
    %106 = vector.shape_cast %105 : vector<1x128x128xbf16> to vector<128x128xbf16>
    %cst_81 = arith.constant dense<0.000000e+00> : vector<8x128xf32>
    %107 = tpu.matmul %104, %106, %cst_81 {dimension_numbers = #tpu.dot_dimension_numbers<[1], [0], [0], [1], [0, 0, 1, 1], [], []>} : vector<8x128xbf16>, vector<128x128xbf16>, vector<8x128xf32> -> vector<8x128xf32>
    %108 = arith.addf %99, %107 : vector<8x128xf32>
    %c1_i32_82 = arith.constant 1 : i32
    %109 = arith.addi %arg1, %c1_i32_82 : i32
    %c0_83 = arith.constant 0 : index
    %110 = arith.index_cast %109 : i32 to index
    %c0_84 = arith.constant 0 : index
    %c0_85 = arith.constant 0 : index
    %111 = vector.load %arg4[%c0_83, %110, %c0_84, %c0_85] : memref<1x9x9x128xf32, #tpu.memory_space<vmem>>, vector<1x1x8x128xf32>
    %112 = vector.shape_cast %111 : vector<1x1x8x128xf32> to vector<8x128xf32>
    %113 = arith.truncf %112 : vector<8x128xf32> to vector<8x128xbf16>
    %c12 = arith.constant 12 : index
    %c0_86 = arith.constant 0 : index
    %c0_87 = arith.constant 0 : index
    %114 = vector.load %arg6[%c12, %c0_86, %c0_87] : memref<16x128x128xbf16, #tpu.memory_space<vmem>>, vector<1x128x128xbf16>
    %115 = vector.shape_cast %114 : vector<1x128x128xbf16> to vector<128x128xbf16>
    %cst_88 = arith.constant dense<0.000000e+00> : vector<8x128xf32>
    %116 = tpu.matmul %113, %115, %cst_88 {dimension_numbers = #tpu.dot_dimension_numbers<[1], [0], [0], [1], [0, 0, 1, 1], [], []>} : vector<8x128xbf16>, vector<128x128xbf16>, vector<8x128xf32> -> vector<8x128xf32>
    %117 = arith.addf %108, %116 : vector<8x128xf32>
    %c1_i32_89 = arith.constant 1 : i32
    %118 = arith.addi %arg1, %c1_i32_89 : i32
    %c0_90 = arith.constant 0 : index
    %119 = arith.index_cast %118 : i32 to index
    %c0_91 = arith.constant 0 : index
    %c0_92 = arith.constant 0 : index
    %120 = vector.load %arg5[%c0_90, %119, %c0_91, %c0_92] : memref<1x9x9x128xf32, #tpu.memory_space<vmem>>, vector<1x1x8x128xf32>
    %121 = vector.shape_cast %120 : vector<1x1x8x128xf32> to vector<8x128xf32>
    %122 = arith.truncf %121 : vector<8x128xf32> to vector<8x128xbf16>
    %c13 = arith.constant 13 : index
    %c0_93 = arith.constant 0 : index
    %c0_94 = arith.constant 0 : index
    %123 = vector.load %arg6[%c13, %c0_93, %c0_94] : memref<16x128x128xbf16, #tpu.memory_space<vmem>>, vector<1x128x128xbf16>
    %124 = vector.shape_cast %123 : vector<1x128x128xbf16> to vector<128x128xbf16>
    %cst_95 = arith.constant dense<0.000000e+00> : vector<8x128xf32>
    %125 = tpu.matmul %122, %124, %cst_95 {dimension_numbers = #tpu.dot_dimension_numbers<[1], [0], [0], [1], [0, 0, 1, 1], [], []>} : vector<8x128xbf16>, vector<128x128xbf16>, vector<8x128xf32> -> vector<8x128xf32>
    %126 = arith.addf %117, %125 : vector<8x128xf32>
    %c1_i32_96 = arith.constant 1 : i32
    %127 = arith.addi %arg1, %c1_i32_96 : i32
    %c0_97 = arith.constant 0 : index
    %128 = arith.index_cast %127 : i32 to index
    %c1_98 = arith.constant 1 : index
    %c0_99 = arith.constant 0 : index
    %129 = vector.load %arg4[%c0_97, %128, %c1_98, %c0_99] : memref<1x9x9x128xf32, #tpu.memory_space<vmem>>, vector<1x1x8x128xf32>
    %130 = vector.shape_cast %129 : vector<1x1x8x128xf32> to vector<8x128xf32>
    %131 = arith.truncf %130 : vector<8x128xf32> to vector<8x128xbf16>
    %c14 = arith.constant 14 : index
    %c0_100 = arith.constant 0 : index
    %c0_101 = arith.constant 0 : index
    %132 = vector.load %arg6[%c14, %c0_100, %c0_101] : memref<16x128x128xbf16, #tpu.memory_space<vmem>>, vector<1x128x128xbf16>
    %133 = vector.shape_cast %132 : vector<1x128x128xbf16> to vector<128x128xbf16>
    %cst_102 = arith.constant dense<0.000000e+00> : vector<8x128xf32>
    %134 = tpu.matmul %131, %133, %cst_102 {dimension_numbers = #tpu.dot_dimension_numbers<[1], [0], [0], [1], [0, 0, 1, 1], [], []>} : vector<8x128xbf16>, vector<128x128xbf16>, vector<8x128xf32> -> vector<8x128xf32>
    %135 = arith.addf %126, %134 : vector<8x128xf32>
    %c1_i32_103 = arith.constant 1 : i32
    %136 = arith.addi %arg1, %c1_i32_103 : i32
    %c0_104 = arith.constant 0 : index
    %137 = arith.index_cast %136 : i32 to index
    %c1_105 = arith.constant 1 : index
    %c0_106 = arith.constant 0 : index
    %138 = vector.load %arg5[%c0_104, %137, %c1_105, %c0_106] : memref<1x9x9x128xf32, #tpu.memory_space<vmem>>, vector<1x1x8x128xf32>
    %139 = vector.shape_cast %138 : vector<1x1x8x128xf32> to vector<8x128xf32>
    %140 = arith.truncf %139 : vector<8x128xf32> to vector<8x128xbf16>
    %c15 = arith.constant 15 : index
    %c0_107 = arith.constant 0 : index
    %c0_108 = arith.constant 0 : index
    %141 = vector.load %arg6[%c15, %c0_107, %c0_108] : memref<16x128x128xbf16, #tpu.memory_space<vmem>>, vector<1x128x128xbf16>
    %142 = vector.shape_cast %141 : vector<1x128x128xbf16> to vector<128x128xbf16>
    %cst_109 = arith.constant dense<0.000000e+00> : vector<8x128xf32>
    %143 = tpu.matmul %140, %142, %cst_109 {dimension_numbers = #tpu.dot_dimension_numbers<[1], [0], [0], [1], [0, 0, 1, 1], [], []>} : vector<8x128xbf16>, vector<128x128xbf16>, vector<8x128xf32> -> vector<8x128xf32>
    %144 = arith.addf %135, %143 : vector<8x128xf32>
    %c0_110 = arith.constant 0 : index
    %c0_111 = arith.constant 0 : index
    %c0_112 = arith.constant 0 : index
    %c0_113 = arith.constant 0 : index
    %145 = vector.load %arg7[%c0_110, %c0_111, %c0_112, %c0_113] : memref<1x1x8x128xf32, #tpu.memory_space<vmem>>, vector<1x1x8x128xf32>
    %146 = vector.shape_cast %145 : vector<1x1x8x128xf32> to vector<8x128xf32>
    %147 = vector.shape_cast %144 : vector<8x128xf32> to vector<1x1x8x128xf32>
    tpu.vector_store %arg7[%c0_110, %c0_111, %c0_112, %c0_113], %147 {strides = array<i32>} : memref<1x1x8x128xf32, #tpu.memory_space<vmem>>, vector<1x1x8x128xf32>,
    %c0_i32_114 = arith.constant 0 : i32
    %148 = arith.cmpi eq, %arg0, %c0_i32_114 : i32
    %c0_i32_115 = arith.constant 0 : i32
    %149 = arith.cmpi eq, %arg1, %c0_i32_115 : i32
    %150 = arith.andi %148, %149 : i1
    %151 = arith.extui %150 : i1 to i32
    %c0_i32_116 = arith.constant 0 : i32
    %152 = arith.cmpi ne, %151, %c0_i32_116 : i32
    scf.if %152 {
      %cst_127 = arith.constant 0.000000e+00 : f32
      %164 = vector.broadcast %cst_127 : f32 to vector<1x128xf32>
      %c0_128 = arith.constant 0 : index
      %c0_129 = arith.constant 0 : index
      %165 = vector.load %arg8[%c0_128, %c0_129] : memref<1x128xf32, #tpu.memory_space<vmem>>, vector<1x128xf32>
      tpu.vector_store %arg8[%c0_128, %c0_129], %164 {strides = array<i32>} : memref<1x128xf32, #tpu.memory_space<vmem>>, vector<1x128xf32>,
      %cst_130 = arith.constant 0.000000e+00 : f32
      %166 = vector.broadcast %cst_130 : f32 to vector<1x128xf32>
      %c0_131 = arith.constant 0 : index
      %c0_132 = arith.constant 0 : index
      %167 = vector.load %arg9[%c0_131, %c0_132] : memref<1x128xf32, #tpu.memory_space<vmem>>, vector<1x128xf32>
      tpu.vector_store %arg9[%c0_131, %c0_132], %166 {strides = array<i32>} : memref<1x128xf32, #tpu.memory_space<vmem>>, vector<1x128xf32>,
    } else {
    }
    %c0_117 = arith.constant 0 : index
    %c0_118 = arith.constant 0 : index
    %153 = vector.load %arg8[%c0_117, %c0_118] : memref<1x128xf32, #tpu.memory_space<vmem>>, vector<1x128xf32>
    %cst_119 = arith.constant dense<0.000000e+00> : vector<128xf32>
    %154 = vector.multi_reduction <add>, %144, %cst_119 [0] : vector<8x128xf32> to vector<128xf32>
    %155 = vector.shape_cast %154 : vector<128xf32> to vector<1x128xf32>
    %156 = arith.addf %153, %155 : vector<1x128xf32>
    %c0_120 = arith.constant 0 : index
    %c0_121 = arith.constant 0 : index
    %157 = vector.load %arg8[%c0_120, %c0_121] : memref<1x128xf32, #tpu.memory_space<vmem>>, vector<1x128xf32>
    tpu.vector_store %arg8[%c0_120, %c0_121], %156 {strides = array<i32>} : memref<1x128xf32, #tpu.memory_space<vmem>>, vector<1x128xf32>,
    %c0_122 = arith.constant 0 : index
    %c0_123 = arith.constant 0 : index
    %158 = vector.load %arg9[%c0_122, %c0_123] : memref<1x128xf32, #tpu.memory_space<vmem>>, vector<1x128xf32>
    %159 = arith.mulf %144, %144 : vector<8x128xf32>
    %cst_124 = arith.constant dense<0.000000e+00> : vector<128xf32>
    %160 = vector.multi_reduction <add>, %159, %cst_124 [0] : vector<8x128xf32> to vector<128xf32>
    %161 = vector.shape_cast %160 : vector<128xf32> to vector<1x128xf32>
    %162 = arith.addf %158, %161 : vector<1x128xf32>
    %c0_125 = arith.constant 0 : index
    %c0_126 = arith.constant 0 : index
    %163 = vector.load %arg9[%c0_125, %c0_126] : memref<1x128xf32, #tpu.memory_space<vmem>>, vector<1x128xf32>
    tpu.vector_store %arg9[%c0_125, %c0_126], %162 {strides = array<i32>} : memref<1x128xf32, #tpu.memory_space<vmem>>, vector<1x128xf32>,
    return
  }
  func.func @transform_0(%arg0: i32, %arg1: i32) -> (i32, i32, i32, i32) {
    %c0_i32 = arith.constant 0 : i32
    %c0_i32_0 = arith.constant 0 : i32
    %c0_i32_1 = arith.constant 0 : i32
    %c0_i32_2 = arith.constant 0 : i32
    return %arg0, %c0_i32, %c0_i32_0, %c0_i32_1 : i32, i32, i32, i32
  }
  func.func @transform_1(%arg0: i32, %arg1: i32) -> (i32, i32, i32, i32) {
    %c0_i32 = arith.constant 0 : i32
    %c0_i32_0 = arith.constant 0 : i32
    %c0_i32_1 = arith.constant 0 : i32
    %c0_i32_2 = arith.constant 0 : i32
    return %arg0, %c0_i32, %c0_i32_0, %c0_i32_1 : i32, i32, i32, i32
  }
  func.func @transform_2(%arg0: i32, %arg1: i32) -> (i32, i32, i32, i32) {
    %c0_i32 = arith.constant 0 : i32
    %c0_i32_0 = arith.constant 0 : i32
    %c0_i32_1 = arith.constant 0 : i32
    %c0_i32_2 = arith.constant 0 : i32
    return %arg0, %c0_i32, %c0_i32_0, %c0_i32_1 : i32, i32, i32, i32
  }
  func.func @transform_3(%arg0: i32, %arg1: i32) -> (i32, i32, i32, i32) {
    %c0_i32 = arith.constant 0 : i32
    %c0_i32_0 = arith.constant 0 : i32
    %c0_i32_1 = arith.constant 0 : i32
    %c0_i32_2 = arith.constant 0 : i32
    return %arg0, %c0_i32, %c0_i32_0, %c0_i32_1 : i32, i32, i32, i32
  }
  func.func @transform_4(%arg0: i32, %arg1: i32) -> (i32, i32, i32) {
    %c0_i32 = arith.constant 0 : i32
    %c0_i32_0 = arith.constant 0 : i32
    %c0_i32_1 = arith.constant 0 : i32
    %c0_i32_2 = arith.constant 0 : i32
    return %c0_i32, %c0_i32_0, %c0_i32_1 : i32, i32, i32
  }
  func.func @transform_5(%arg0: i32, %arg1: i32) -> (i32, i32, i32, i32) {
    %c0_i32 = arith.constant 0 : i32
    %c0_i32_0 = arith.constant 0 : i32
    %c0_i32_1 = arith.constant 0 : i32
    return %arg0, %arg1, %c0_i32, %c0_i32_0 : i32, i32, i32, i32
  }
  func.func @transform_6(%arg0: i32, %arg1: i32) -> (i32, i32) {
    %c0_i32 = arith.constant 0 : i32
    %c0_i32_0 = arith.constant 0 : i32
    %c0_i32_1 = arith.constant 0 : i32
    return %c0_i32, %c0_i32_0 : i32, i32
  }
  func.func @transform_7(%arg0: i32, %arg1: i32) -> (i32, i32) {
    %c0_i32 = arith.constant 0 : i32
    %c0_i32_0 = arith.constant 0 : i32
    %c0_i32_1 = arith.constant 0 : i32
    return %c0_i32, %c0_i32_0 : i32, i32
  }
}

module attributes {stable_mosaic.version = 11 : i64} {
  func.func @_affine_lrelu_kernel(%arg0: i32, %arg1: memref<1x4x4x128xf32, #tpu.memory_space<vmem>>, %arg2: memref<1x1x128xf32, #tpu.memory_space<vmem>>, %arg3: memref<1x1x128xf32, #tpu.memory_space<vmem>>, %arg4: memref<1x4x4x128xf32, #tpu.memory_space<vmem>>) attributes {dimension_semantics = [#tpu.dimension_semantics<parallel>], iteration_bounds = array<i64: 2>, scalar_prefetch = 0 : i64, scratch_operands = 0 : i64, tpu.core_type = #tpu.core_type<tc>, window_params = [{transform_indices = @transform_0, window_bounds = array<i64: 1, 4, 4, 128>}, {pipeline_mode = #tpu.pipeline_mode<synchronous>, transform_indices = @transform_1, window_bounds = array<i64: 1, 1, 128>}, {pipeline_mode = #tpu.pipeline_mode<synchronous>, transform_indices = @transform_2, window_bounds = array<i64: 1, 1, 128>}, {transform_indices = @transform_3, window_bounds = array<i64: 1, 4, 4, 128>}]} {
    %c0 = arith.constant 0 : index
    %c0_0 = arith.constant 0 : index
    %c0_1 = arith.constant 0 : index
    %c0_2 = arith.constant 0 : index
    %0 = vector.load %arg1[%c0, %c0_0, %c0_1, %c0_2] : memref<1x4x4x128xf32, #tpu.memory_space<vmem>>, vector<1x4x4x128xf32>
    %1 = vector.shape_cast %0 : vector<1x4x4x128xf32> to vector<4x4x128xf32>
    %c0_3 = arith.constant 0 : index
    %c0_4 = arith.constant 0 : index
    %c0_5 = arith.constant 0 : index
    %2 = vector.load %arg2[%c0_3, %c0_4, %c0_5] : memref<1x1x128xf32, #tpu.memory_space<vmem>>, vector<1x1x128xf32>
    %3 = vector.broadcast %2 : vector<1x1x128xf32> to vector<4x4x128xf32>
    %4 = arith.mulf %1, %3 : vector<4x4x128xf32>
    %c0_6 = arith.constant 0 : index
    %c0_7 = arith.constant 0 : index
    %c0_8 = arith.constant 0 : index
    %5 = vector.load %arg3[%c0_6, %c0_7, %c0_8] : memref<1x1x128xf32, #tpu.memory_space<vmem>>, vector<1x1x128xf32>
    %6 = vector.broadcast %5 : vector<1x1x128xf32> to vector<4x4x128xf32>
    %7 = arith.addf %4, %6 : vector<4x4x128xf32>
    %cst = arith.constant 2.000000e-01 : f32
    %8 = vector.broadcast %cst : f32 to vector<4x4x128xf32>
    %9 = arith.mulf %8, %7 : vector<4x4x128xf32>
    %10 = arith.maximumf %7, %9 : vector<4x4x128xf32>
    %c0_9 = arith.constant 0 : index
    %c0_10 = arith.constant 0 : index
    %c0_11 = arith.constant 0 : index
    %c0_12 = arith.constant 0 : index
    %11 = vector.load %arg4[%c0_9, %c0_10, %c0_11, %c0_12] : memref<1x4x4x128xf32, #tpu.memory_space<vmem>>, vector<1x4x4x128xf32>
    %12 = vector.shape_cast %11 : vector<1x4x4x128xf32> to vector<4x4x128xf32>
    %13 = vector.shape_cast %10 : vector<4x4x128xf32> to vector<1x4x4x128xf32>
    tpu.vector_store %arg4[%c0_9, %c0_10, %c0_11, %c0_12], %13 {strides = array<i32>} : memref<1x4x4x128xf32, #tpu.memory_space<vmem>>, vector<1x4x4x128xf32>,
    return
  }
  func.func @transform_0(%arg0: i32) -> (i32, i32, i32, i32) {
    %c0_i32 = arith.constant 0 : i32
    %c0_i32_0 = arith.constant 0 : i32
    %c0_i32_1 = arith.constant 0 : i32
    %c0_i32_2 = arith.constant 0 : i32
    return %arg0, %c0_i32, %c0_i32_0, %c0_i32_1 : i32, i32, i32, i32
  }
  func.func @transform_1(%arg0: i32) -> (i32, i32, i32) {
    %c0_i32 = arith.constant 0 : i32
    %c0_i32_0 = arith.constant 0 : i32
    %c0_i32_1 = arith.constant 0 : i32
    %c0_i32_2 = arith.constant 0 : i32
    return %c0_i32, %c0_i32_0, %c0_i32_1 : i32, i32, i32
  }
  func.func @transform_2(%arg0: i32) -> (i32, i32, i32) {
    %c0_i32 = arith.constant 0 : i32
    %c0_i32_0 = arith.constant 0 : i32
    %c0_i32_1 = arith.constant 0 : i32
    %c0_i32_2 = arith.constant 0 : i32
    return %c0_i32, %c0_i32_0, %c0_i32_1 : i32, i32, i32
  }
  func.func @transform_3(%arg0: i32) -> (i32, i32, i32, i32) {
    %c0_i32 = arith.constant 0 : i32
    %c0_i32_0 = arith.constant 0 : i32
    %c0_i32_1 = arith.constant 0 : i32
    %c0_i32_2 = arith.constant 0 : i32
    return %arg0, %c0_i32, %c0_i32_0, %c0_i32_1 : i32, i32, i32, i32
  }
}

module attributes {stable_mosaic.version = 11 : i64} {
  func.func @kernel(%arg0: i32, %arg1: i32, %arg2: memref<1x5x5x128xf32, #tpu.memory_space<vmem>>, %arg3: memref<1x5x5x128xf32, #tpu.memory_space<vmem>>, %arg4: memref<1x5x5x128xf32, #tpu.memory_space<vmem>>, %arg5: memref<1x5x5x128xf32, #tpu.memory_space<vmem>>, %arg6: memref<16x128x128xbf16, #tpu.memory_space<vmem>>, %arg7: memref<1x1x4x128xf32, #tpu.memory_space<vmem>>, %arg8: memref<1x128xf32, #tpu.memory_space<vmem>>, %arg9: memref<1x128xf32, #tpu.memory_space<vmem>>) attributes {dimension_semantics = [#tpu.dimension_semantics<arbitrary>, #tpu.dimension_semantics<arbitrary>], iteration_bounds = array<i64: 2, 4>, scalar_prefetch = 0 : i64, scratch_operands = 0 : i64, tpu.core_type = #tpu.core_type<tc>, window_params = [{transform_indices = @transform_0, window_bounds = array<i64: 1, 5, 5, 128>}, {transform_indices = @transform_1, window_bounds = array<i64: 1, 5, 5, 128>}, {transform_indices = @transform_2, window_bounds = array<i64: 1, 5, 5, 128>}, {transform_indices = @transform_3, window_bounds = array<i64: 1, 5, 5, 128>}, {pipeline_mode = #tpu.pipeline_mode<synchronous>, transform_indices = @transform_4, window_bounds = array<i64: 16, 128, 128>}, {transform_indices = @transform_5, window_bounds = array<i64: 1, 1, 4, 128>}, {pipeline_mode = #tpu.pipeline_mode<synchronous>, transform_indices = @transform_6, window_bounds = array<i64: 1, 128>}, {pipeline_mode = #tpu.pipeline_mode<synchronous>, transform_indices = @transform_7, window_bounds = array<i64: 1, 128>}]} {
    %cst = arith.constant 0.000000e+00 : f32
    %0 = vector.broadcast %cst : f32 to vector<4x128xf32>
    %c0_i32 = arith.constant 0 : i32
    %1 = arith.addi %arg1, %c0_i32 : i32
    %c0 = arith.constant 0 : index
    %2 = arith.index_cast %1 : i32 to index
    %c0_0 = arith.constant 0 : index
    %c0_1 = arith.constant 0 : index
    %3 = vector.load %arg2[%c0, %2, %c0_0, %c0_1] : memref<1x5x5x128xf32, #tpu.memory_space<vmem>>, vector<1x1x4x128xf32>
    %4 = vector.shape_cast %3 : vector<1x1x4x128xf32> to vector<4x128xf32>
    %5 = arith.truncf %4 : vector<4x128xf32> to vector<4x128xbf16>
    %c0_2 = arith.constant 0 : index
    %c0_3 = arith.constant 0 : index
    %c0_4 = arith.constant 0 : index
    %6 = vector.load %arg6[%c0_2, %c0_3, %c0_4] : memref<16x128x128xbf16, #tpu.memory_space<vmem>>, vector<1x128x128xbf16>
    %7 = vector.shape_cast %6 : vector<1x128x128xbf16> to vector<128x128xbf16>
    %cst_5 = arith.constant dense<0.000000e+00> : vector<4x128xf32>
    %8 = tpu.matmul %5, %7, %cst_5 {dimension_numbers = #tpu.dot_dimension_numbers<[1], [0], [0], [1], [0, 0, 1, 1], [], []>} : vector<4x128xbf16>, vector<128x128xbf16>, vector<4x128xf32> -> vector<4x128xf32>
    %9 = arith.addf %0, %8 : vector<4x128xf32>
    %c0_i32_6 = arith.constant 0 : i32
    %10 = arith.addi %arg1, %c0_i32_6 : i32
    %c0_7 = arith.constant 0 : index
    %11 = arith.index_cast %10 : i32 to index
    %c0_8 = arith.constant 0 : index
    %c0_9 = arith.constant 0 : index
    %12 = vector.load %arg3[%c0_7, %11, %c0_8, %c0_9] : memref<1x5x5x128xf32, #tpu.memory_space<vmem>>, vector<1x1x4x128xf32>
    %13 = vector.shape_cast %12 : vector<1x1x4x128xf32> to vector<4x128xf32>
    %14 = arith.truncf %13 : vector<4x128xf32> to vector<4x128xbf16>
    %c1 = arith.constant 1 : index
    %c0_10 = arith.constant 0 : index
    %c0_11 = arith.constant 0 : index
    %15 = vector.load %arg6[%c1, %c0_10, %c0_11] : memref<16x128x128xbf16, #tpu.memory_space<vmem>>, vector<1x128x128xbf16>
    %16 = vector.shape_cast %15 : vector<1x128x128xbf16> to vector<128x128xbf16>
    %cst_12 = arith.constant dense<0.000000e+00> : vector<4x128xf32>
    %17 = tpu.matmul %14, %16, %cst_12 {dimension_numbers = #tpu.dot_dimension_numbers<[1], [0], [0], [1], [0, 0, 1, 1], [], []>} : vector<4x128xbf16>, vector<128x128xbf16>, vector<4x128xf32> -> vector<4x128xf32>
    %18 = arith.addf %9, %17 : vector<4x128xf32>
    %c0_i32_13 = arith.constant 0 : i32
    %19 = arith.addi %arg1, %c0_i32_13 : i32
    %c0_14 = arith.constant 0 : index
    %20 = arith.index_cast %19 : i32 to index
    %c1_15 = arith.constant 1 : index
    %c0_16 = arith.constant 0 : index
    %21 = vector.load %arg2[%c0_14, %20, %c1_15, %c0_16] : memref<1x5x5x128xf32, #tpu.memory_space<vmem>>, vector<1x1x4x128xf32>
    %22 = vector.shape_cast %21 : vector<1x1x4x128xf32> to vector<4x128xf32>
    %23 = arith.truncf %22 : vector<4x128xf32> to vector<4x128xbf16>
    %c2 = arith.constant 2 : index
    %c0_17 = arith.constant 0 : index
    %c0_18 = arith.constant 0 : index
    %24 = vector.load %arg6[%c2, %c0_17, %c0_18] : memref<16x128x128xbf16, #tpu.memory_space<vmem>>, vector<1x128x128xbf16>
    %25 = vector.shape_cast %24 : vector<1x128x128xbf16> to vector<128x128xbf16>
    %cst_19 = arith.constant dense<0.000000e+00> : vector<4x128xf32>
    %26 = tpu.matmul %23, %25, %cst_19 {dimension_numbers = #tpu.dot_dimension_numbers<[1], [0], [0], [1], [0, 0, 1, 1], [], []>} : vector<4x128xbf16>, vector<128x128xbf16>, vector<4x128xf32> -> vector<4x128xf32>
    %27 = arith.addf %18, %26 : vector<4x128xf32>
    %c0_i32_20 = arith.constant 0 : i32
    %28 = arith.addi %arg1, %c0_i32_20 : i32
    %c0_21 = arith.constant 0 : index
    %29 = arith.index_cast %28 : i32 to index
    %c1_22 = arith.constant 1 : index
    %c0_23 = arith.constant 0 : index
    %30 = vector.load %arg3[%c0_21, %29, %c1_22, %c0_23] : memref<1x5x5x128xf32, #tpu.memory_space<vmem>>, vector<1x1x4x128xf32>
    %31 = vector.shape_cast %30 : vector<1x1x4x128xf32> to vector<4x128xf32>
    %32 = arith.truncf %31 : vector<4x128xf32> to vector<4x128xbf16>
    %c3 = arith.constant 3 : index
    %c0_24 = arith.constant 0 : index
    %c0_25 = arith.constant 0 : index
    %33 = vector.load %arg6[%c3, %c0_24, %c0_25] : memref<16x128x128xbf16, #tpu.memory_space<vmem>>, vector<1x128x128xbf16>
    %34 = vector.shape_cast %33 : vector<1x128x128xbf16> to vector<128x128xbf16>
    %cst_26 = arith.constant dense<0.000000e+00> : vector<4x128xf32>
    %35 = tpu.matmul %32, %34, %cst_26 {dimension_numbers = #tpu.dot_dimension_numbers<[1], [0], [0], [1], [0, 0, 1, 1], [], []>} : vector<4x128xbf16>, vector<128x128xbf16>, vector<4x128xf32> -> vector<4x128xf32>
    %36 = arith.addf %27, %35 : vector<4x128xf32>
    %c0_i32_27 = arith.constant 0 : i32
    %37 = arith.addi %arg1, %c0_i32_27 : i32
    %c0_28 = arith.constant 0 : index
    %38 = arith.index_cast %37 : i32 to index
    %c0_29 = arith.constant 0 : index
    %c0_30 = arith.constant 0 : index
    %39 = vector.load %arg4[%c0_28, %38, %c0_29, %c0_30] : memref<1x5x5x128xf32, #tpu.memory_space<vmem>>, vector<1x1x4x128xf32>
    %40 = vector.shape_cast %39 : vector<1x1x4x128xf32> to vector<4x128xf32>
    %41 = arith.truncf %40 : vector<4x128xf32> to vector<4x128xbf16>
    %c4 = arith.constant 4 : index
    %c0_31 = arith.constant 0 : index
    %c0_32 = arith.constant 0 : index
    %42 = vector.load %arg6[%c4, %c0_31, %c0_32] : memref<16x128x128xbf16, #tpu.memory_space<vmem>>, vector<1x128x128xbf16>
    %43 = vector.shape_cast %42 : vector<1x128x128xbf16> to vector<128x128xbf16>
    %cst_33 = arith.constant dense<0.000000e+00> : vector<4x128xf32>
    %44 = tpu.matmul %41, %43, %cst_33 {dimension_numbers = #tpu.dot_dimension_numbers<[1], [0], [0], [1], [0, 0, 1, 1], [], []>} : vector<4x128xbf16>, vector<128x128xbf16>, vector<4x128xf32> -> vector<4x128xf32>
    %45 = arith.addf %36, %44 : vector<4x128xf32>
    %c0_i32_34 = arith.constant 0 : i32
    %46 = arith.addi %arg1, %c0_i32_34 : i32
    %c0_35 = arith.constant 0 : index
    %47 = arith.index_cast %46 : i32 to index
    %c0_36 = arith.constant 0 : index
    %c0_37 = arith.constant 0 : index
    %48 = vector.load %arg5[%c0_35, %47, %c0_36, %c0_37] : memref<1x5x5x128xf32, #tpu.memory_space<vmem>>, vector<1x1x4x128xf32>
    %49 = vector.shape_cast %48 : vector<1x1x4x128xf32> to vector<4x128xf32>
    %50 = arith.truncf %49 : vector<4x128xf32> to vector<4x128xbf16>
    %c5 = arith.constant 5 : index
    %c0_38 = arith.constant 0 : index
    %c0_39 = arith.constant 0 : index
    %51 = vector.load %arg6[%c5, %c0_38, %c0_39] : memref<16x128x128xbf16, #tpu.memory_space<vmem>>, vector<1x128x128xbf16>
    %52 = vector.shape_cast %51 : vector<1x128x128xbf16> to vector<128x128xbf16>
    %cst_40 = arith.constant dense<0.000000e+00> : vector<4x128xf32>
    %53 = tpu.matmul %50, %52, %cst_40 {dimension_numbers = #tpu.dot_dimension_numbers<[1], [0], [0], [1], [0, 0, 1, 1], [], []>} : vector<4x128xbf16>, vector<128x128xbf16>, vector<4x128xf32> -> vector<4x128xf32>
    %54 = arith.addf %45, %53 : vector<4x128xf32>
    %c0_i32_41 = arith.constant 0 : i32
    %55 = arith.addi %arg1, %c0_i32_41 : i32
    %c0_42 = arith.constant 0 : index
    %56 = arith.index_cast %55 : i32 to index
    %c1_43 = arith.constant 1 : index
    %c0_44 = arith.constant 0 : index
    %57 = vector.load %arg4[%c0_42, %56, %c1_43, %c0_44] : memref<1x5x5x128xf32, #tpu.memory_space<vmem>>, vector<1x1x4x128xf32>
    %58 = vector.shape_cast %57 : vector<1x1x4x128xf32> to vector<4x128xf32>
    %59 = arith.truncf %58 : vector<4x128xf32> to vector<4x128xbf16>
    %c6 = arith.constant 6 : index
    %c0_45 = arith.constant 0 : index
    %c0_46 = arith.constant 0 : index
    %60 = vector.load %arg6[%c6, %c0_45, %c0_46] : memref<16x128x128xbf16, #tpu.memory_space<vmem>>, vector<1x128x128xbf16>
    %61 = vector.shape_cast %60 : vector<1x128x128xbf16> to vector<128x128xbf16>
    %cst_47 = arith.constant dense<0.000000e+00> : vector<4x128xf32>
    %62 = tpu.matmul %59, %61, %cst_47 {dimension_numbers = #tpu.dot_dimension_numbers<[1], [0], [0], [1], [0, 0, 1, 1], [], []>} : vector<4x128xbf16>, vector<128x128xbf16>, vector<4x128xf32> -> vector<4x128xf32>
    %63 = arith.addf %54, %62 : vector<4x128xf32>
    %c0_i32_48 = arith.constant 0 : i32
    %64 = arith.addi %arg1, %c0_i32_48 : i32
    %c0_49 = arith.constant 0 : index
    %65 = arith.index_cast %64 : i32 to index
    %c1_50 = arith.constant 1 : index
    %c0_51 = arith.constant 0 : index
    %66 = vector.load %arg5[%c0_49, %65, %c1_50, %c0_51] : memref<1x5x5x128xf32, #tpu.memory_space<vmem>>, vector<1x1x4x128xf32>
    %67 = vector.shape_cast %66 : vector<1x1x4x128xf32> to vector<4x128xf32>
    %68 = arith.truncf %67 : vector<4x128xf32> to vector<4x128xbf16>
    %c7 = arith.constant 7 : index
    %c0_52 = arith.constant 0 : index
    %c0_53 = arith.constant 0 : index
    %69 = vector.load %arg6[%c7, %c0_52, %c0_53] : memref<16x128x128xbf16, #tpu.memory_space<vmem>>, vector<1x128x128xbf16>
    %70 = vector.shape_cast %69 : vector<1x128x128xbf16> to vector<128x128xbf16>
    %cst_54 = arith.constant dense<0.000000e+00> : vector<4x128xf32>
    %71 = tpu.matmul %68, %70, %cst_54 {dimension_numbers = #tpu.dot_dimension_numbers<[1], [0], [0], [1], [0, 0, 1, 1], [], []>} : vector<4x128xbf16>, vector<128x128xbf16>, vector<4x128xf32> -> vector<4x128xf32>
    %72 = arith.addf %63, %71 : vector<4x128xf32>
    %c1_i32 = arith.constant 1 : i32
    %73 = arith.addi %arg1, %c1_i32 : i32
    %c0_55 = arith.constant 0 : index
    %74 = arith.index_cast %73 : i32 to index
    %c0_56 = arith.constant 0 : index
    %c0_57 = arith.constant 0 : index
    %75 = vector.load %arg2[%c0_55, %74, %c0_56, %c0_57] : memref<1x5x5x128xf32, #tpu.memory_space<vmem>>, vector<1x1x4x128xf32>
    %76 = vector.shape_cast %75 : vector<1x1x4x128xf32> to vector<4x128xf32>
    %77 = arith.truncf %76 : vector<4x128xf32> to vector<4x128xbf16>
    %c8 = arith.constant 8 : index
    %c0_58 = arith.constant 0 : index
    %c0_59 = arith.constant 0 : index
    %78 = vector.load %arg6[%c8, %c0_58, %c0_59] : memref<16x128x128xbf16, #tpu.memory_space<vmem>>, vector<1x128x128xbf16>
    %79 = vector.shape_cast %78 : vector<1x128x128xbf16> to vector<128x128xbf16>
    %cst_60 = arith.constant dense<0.000000e+00> : vector<4x128xf32>
    %80 = tpu.matmul %77, %79, %cst_60 {dimension_numbers = #tpu.dot_dimension_numbers<[1], [0], [0], [1], [0, 0, 1, 1], [], []>} : vector<4x128xbf16>, vector<128x128xbf16>, vector<4x128xf32> -> vector<4x128xf32>
    %81 = arith.addf %72, %80 : vector<4x128xf32>
    %c1_i32_61 = arith.constant 1 : i32
    %82 = arith.addi %arg1, %c1_i32_61 : i32
    %c0_62 = arith.constant 0 : index
    %83 = arith.index_cast %82 : i32 to index
    %c0_63 = arith.constant 0 : index
    %c0_64 = arith.constant 0 : index
    %84 = vector.load %arg3[%c0_62, %83, %c0_63, %c0_64] : memref<1x5x5x128xf32, #tpu.memory_space<vmem>>, vector<1x1x4x128xf32>
    %85 = vector.shape_cast %84 : vector<1x1x4x128xf32> to vector<4x128xf32>
    %86 = arith.truncf %85 : vector<4x128xf32> to vector<4x128xbf16>
    %c9 = arith.constant 9 : index
    %c0_65 = arith.constant 0 : index
    %c0_66 = arith.constant 0 : index
    %87 = vector.load %arg6[%c9, %c0_65, %c0_66] : memref<16x128x128xbf16, #tpu.memory_space<vmem>>, vector<1x128x128xbf16>
    %88 = vector.shape_cast %87 : vector<1x128x128xbf16> to vector<128x128xbf16>
    %cst_67 = arith.constant dense<0.000000e+00> : vector<4x128xf32>
    %89 = tpu.matmul %86, %88, %cst_67 {dimension_numbers = #tpu.dot_dimension_numbers<[1], [0], [0], [1], [0, 0, 1, 1], [], []>} : vector<4x128xbf16>, vector<128x128xbf16>, vector<4x128xf32> -> vector<4x128xf32>
    %90 = arith.addf %81, %89 : vector<4x128xf32>
    %c1_i32_68 = arith.constant 1 : i32
    %91 = arith.addi %arg1, %c1_i32_68 : i32
    %c0_69 = arith.constant 0 : index
    %92 = arith.index_cast %91 : i32 to index
    %c1_70 = arith.constant 1 : index
    %c0_71 = arith.constant 0 : index
    %93 = vector.load %arg2[%c0_69, %92, %c1_70, %c0_71] : memref<1x5x5x128xf32, #tpu.memory_space<vmem>>, vector<1x1x4x128xf32>
    %94 = vector.shape_cast %93 : vector<1x1x4x128xf32> to vector<4x128xf32>
    %95 = arith.truncf %94 : vector<4x128xf32> to vector<4x128xbf16>
    %c10 = arith.constant 10 : index
    %c0_72 = arith.constant 0 : index
    %c0_73 = arith.constant 0 : index
    %96 = vector.load %arg6[%c10, %c0_72, %c0_73] : memref<16x128x128xbf16, #tpu.memory_space<vmem>>, vector<1x128x128xbf16>
    %97 = vector.shape_cast %96 : vector<1x128x128xbf16> to vector<128x128xbf16>
    %cst_74 = arith.constant dense<0.000000e+00> : vector<4x128xf32>
    %98 = tpu.matmul %95, %97, %cst_74 {dimension_numbers = #tpu.dot_dimension_numbers<[1], [0], [0], [1], [0, 0, 1, 1], [], []>} : vector<4x128xbf16>, vector<128x128xbf16>, vector<4x128xf32> -> vector<4x128xf32>
    %99 = arith.addf %90, %98 : vector<4x128xf32>
    %c1_i32_75 = arith.constant 1 : i32
    %100 = arith.addi %arg1, %c1_i32_75 : i32
    %c0_76 = arith.constant 0 : index
    %101 = arith.index_cast %100 : i32 to index
    %c1_77 = arith.constant 1 : index
    %c0_78 = arith.constant 0 : index
    %102 = vector.load %arg3[%c0_76, %101, %c1_77, %c0_78] : memref<1x5x5x128xf32, #tpu.memory_space<vmem>>, vector<1x1x4x128xf32>
    %103 = vector.shape_cast %102 : vector<1x1x4x128xf32> to vector<4x128xf32>
    %104 = arith.truncf %103 : vector<4x128xf32> to vector<4x128xbf16>
    %c11 = arith.constant 11 : index
    %c0_79 = arith.constant 0 : index
    %c0_80 = arith.constant 0 : index
    %105 = vector.load %arg6[%c11, %c0_79, %c0_80] : memref<16x128x128xbf16, #tpu.memory_space<vmem>>, vector<1x128x128xbf16>
    %106 = vector.shape_cast %105 : vector<1x128x128xbf16> to vector<128x128xbf16>
    %cst_81 = arith.constant dense<0.000000e+00> : vector<4x128xf32>
    %107 = tpu.matmul %104, %106, %cst_81 {dimension_numbers = #tpu.dot_dimension_numbers<[1], [0], [0], [1], [0, 0, 1, 1], [], []>} : vector<4x128xbf16>, vector<128x128xbf16>, vector<4x128xf32> -> vector<4x128xf32>
    %108 = arith.addf %99, %107 : vector<4x128xf32>
    %c1_i32_82 = arith.constant 1 : i32
    %109 = arith.addi %arg1, %c1_i32_82 : i32
    %c0_83 = arith.constant 0 : index
    %110 = arith.index_cast %109 : i32 to index
    %c0_84 = arith.constant 0 : index
    %c0_85 = arith.constant 0 : index
    %111 = vector.load %arg4[%c0_83, %110, %c0_84, %c0_85] : memref<1x5x5x128xf32, #tpu.memory_space<vmem>>, vector<1x1x4x128xf32>
    %112 = vector.shape_cast %111 : vector<1x1x4x128xf32> to vector<4x128xf32>
    %113 = arith.truncf %112 : vector<4x128xf32> to vector<4x128xbf16>
    %c12 = arith.constant 12 : index
    %c0_86 = arith.constant 0 : index
    %c0_87 = arith.constant 0 : index
    %114 = vector.load %arg6[%c12, %c0_86, %c0_87] : memref<16x128x128xbf16, #tpu.memory_space<vmem>>, vector<1x128x128xbf16>
    %115 = vector.shape_cast %114 : vector<1x128x128xbf16> to vector<128x128xbf16>
    %cst_88 = arith.constant dense<0.000000e+00> : vector<4x128xf32>
    %116 = tpu.matmul %113, %115, %cst_88 {dimension_numbers = #tpu.dot_dimension_numbers<[1], [0], [0], [1], [0, 0, 1, 1], [], []>} : vector<4x128xbf16>, vector<128x128xbf16>, vector<4x128xf32> -> vector<4x128xf32>
    %117 = arith.addf %108, %116 : vector<4x128xf32>
    %c1_i32_89 = arith.constant 1 : i32
    %118 = arith.addi %arg1, %c1_i32_89 : i32
    %c0_90 = arith.constant 0 : index
    %119 = arith.index_cast %118 : i32 to index
    %c0_91 = arith.constant 0 : index
    %c0_92 = arith.constant 0 : index
    %120 = vector.load %arg5[%c0_90, %119, %c0_91, %c0_92] : memref<1x5x5x128xf32, #tpu.memory_space<vmem>>, vector<1x1x4x128xf32>
    %121 = vector.shape_cast %120 : vector<1x1x4x128xf32> to vector<4x128xf32>
    %122 = arith.truncf %121 : vector<4x128xf32> to vector<4x128xbf16>
    %c13 = arith.constant 13 : index
    %c0_93 = arith.constant 0 : index
    %c0_94 = arith.constant 0 : index
    %123 = vector.load %arg6[%c13, %c0_93, %c0_94] : memref<16x128x128xbf16, #tpu.memory_space<vmem>>, vector<1x128x128xbf16>
    %124 = vector.shape_cast %123 : vector<1x128x128xbf16> to vector<128x128xbf16>
    %cst_95 = arith.constant dense<0.000000e+00> : vector<4x128xf32>
    %125 = tpu.matmul %122, %124, %cst_95 {dimension_numbers = #tpu.dot_dimension_numbers<[1], [0], [0], [1], [0, 0, 1, 1], [], []>} : vector<4x128xbf16>, vector<128x128xbf16>, vector<4x128xf32> -> vector<4x128xf32>
    %126 = arith.addf %117, %125 : vector<4x128xf32>
    %c1_i32_96 = arith.constant 1 : i32
    %127 = arith.addi %arg1, %c1_i32_96 : i32
    %c0_97 = arith.constant 0 : index
    %128 = arith.index_cast %127 : i32 to index
    %c1_98 = arith.constant 1 : index
    %c0_99 = arith.constant 0 : index
    %129 = vector.load %arg4[%c0_97, %128, %c1_98, %c0_99] : memref<1x5x5x128xf32, #tpu.memory_space<vmem>>, vector<1x1x4x128xf32>
    %130 = vector.shape_cast %129 : vector<1x1x4x128xf32> to vector<4x128xf32>
    %131 = arith.truncf %130 : vector<4x128xf32> to vector<4x128xbf16>
    %c14 = arith.constant 14 : index
    %c0_100 = arith.constant 0 : index
    %c0_101 = arith.constant 0 : index
    %132 = vector.load %arg6[%c14, %c0_100, %c0_101] : memref<16x128x128xbf16, #tpu.memory_space<vmem>>, vector<1x128x128xbf16>
    %133 = vector.shape_cast %132 : vector<1x128x128xbf16> to vector<128x128xbf16>
    %cst_102 = arith.constant dense<0.000000e+00> : vector<4x128xf32>
    %134 = tpu.matmul %131, %133, %cst_102 {dimension_numbers = #tpu.dot_dimension_numbers<[1], [0], [0], [1], [0, 0, 1, 1], [], []>} : vector<4x128xbf16>, vector<128x128xbf16>, vector<4x128xf32> -> vector<4x128xf32>
    %135 = arith.addf %126, %134 : vector<4x128xf32>
    %c1_i32_103 = arith.constant 1 : i32
    %136 = arith.addi %arg1, %c1_i32_103 : i32
    %c0_104 = arith.constant 0 : index
    %137 = arith.index_cast %136 : i32 to index
    %c1_105 = arith.constant 1 : index
    %c0_106 = arith.constant 0 : index
    %138 = vector.load %arg5[%c0_104, %137, %c1_105, %c0_106] : memref<1x5x5x128xf32, #tpu.memory_space<vmem>>, vector<1x1x4x128xf32>
    %139 = vector.shape_cast %138 : vector<1x1x4x128xf32> to vector<4x128xf32>
    %140 = arith.truncf %139 : vector<4x128xf32> to vector<4x128xbf16>
    %c15 = arith.constant 15 : index
    %c0_107 = arith.constant 0 : index
    %c0_108 = arith.constant 0 : index
    %141 = vector.load %arg6[%c15, %c0_107, %c0_108] : memref<16x128x128xbf16, #tpu.memory_space<vmem>>, vector<1x128x128xbf16>
    %142 = vector.shape_cast %141 : vector<1x128x128xbf16> to vector<128x128xbf16>
    %cst_109 = arith.constant dense<0.000000e+00> : vector<4x128xf32>
    %143 = tpu.matmul %140, %142, %cst_109 {dimension_numbers = #tpu.dot_dimension_numbers<[1], [0], [0], [1], [0, 0, 1, 1], [], []>} : vector<4x128xbf16>, vector<128x128xbf16>, vector<4x128xf32> -> vector<4x128xf32>
    %144 = arith.addf %135, %143 : vector<4x128xf32>
    %c0_110 = arith.constant 0 : index
    %c0_111 = arith.constant 0 : index
    %c0_112 = arith.constant 0 : index
    %c0_113 = arith.constant 0 : index
    %145 = vector.load %arg7[%c0_110, %c0_111, %c0_112, %c0_113] : memref<1x1x4x128xf32, #tpu.memory_space<vmem>>, vector<1x1x4x128xf32>
    %146 = vector.shape_cast %145 : vector<1x1x4x128xf32> to vector<4x128xf32>
    %147 = vector.shape_cast %144 : vector<4x128xf32> to vector<1x1x4x128xf32>
    tpu.vector_store %arg7[%c0_110, %c0_111, %c0_112, %c0_113], %147 {strides = array<i32>} : memref<1x1x4x128xf32, #tpu.memory_space<vmem>>, vector<1x1x4x128xf32>,
    %c0_i32_114 = arith.constant 0 : i32
    %148 = arith.cmpi eq, %arg0, %c0_i32_114 : i32
    %c0_i32_115 = arith.constant 0 : i32
    %149 = arith.cmpi eq, %arg1, %c0_i32_115 : i32
    %150 = arith.andi %148, %149 : i1
    %151 = arith.extui %150 : i1 to i32
    %c0_i32_116 = arith.constant 0 : i32
    %152 = arith.cmpi ne, %151, %c0_i32_116 : i32
    scf.if %152 {
      %cst_127 = arith.constant 0.000000e+00 : f32
      %164 = vector.broadcast %cst_127 : f32 to vector<1x128xf32>
      %c0_128 = arith.constant 0 : index
      %c0_129 = arith.constant 0 : index
      %165 = vector.load %arg8[%c0_128, %c0_129] : memref<1x128xf32, #tpu.memory_space<vmem>>, vector<1x128xf32>
      tpu.vector_store %arg8[%c0_128, %c0_129], %164 {strides = array<i32>} : memref<1x128xf32, #tpu.memory_space<vmem>>, vector<1x128xf32>,
      %cst_130 = arith.constant 0.000000e+00 : f32
      %166 = vector.broadcast %cst_130 : f32 to vector<1x128xf32>
      %c0_131 = arith.constant 0 : index
      %c0_132 = arith.constant 0 : index
      %167 = vector.load %arg9[%c0_131, %c0_132] : memref<1x128xf32, #tpu.memory_space<vmem>>, vector<1x128xf32>
      tpu.vector_store %arg9[%c0_131, %c0_132], %166 {strides = array<i32>} : memref<1x128xf32, #tpu.memory_space<vmem>>, vector<1x128xf32>,
    } else {
    }
    %c0_117 = arith.constant 0 : index
    %c0_118 = arith.constant 0 : index
    %153 = vector.load %arg8[%c0_117, %c0_118] : memref<1x128xf32, #tpu.memory_space<vmem>>, vector<1x128xf32>
    %cst_119 = arith.constant dense<0.000000e+00> : vector<128xf32>
    %154 = vector.multi_reduction <add>, %144, %cst_119 [0] : vector<4x128xf32> to vector<128xf32>
    %155 = vector.shape_cast %154 : vector<128xf32> to vector<1x128xf32>
    %156 = arith.addf %153, %155 : vector<1x128xf32>
    %c0_120 = arith.constant 0 : index
    %c0_121 = arith.constant 0 : index
    %157 = vector.load %arg8[%c0_120, %c0_121] : memref<1x128xf32, #tpu.memory_space<vmem>>, vector<1x128xf32>
    tpu.vector_store %arg8[%c0_120, %c0_121], %156 {strides = array<i32>} : memref<1x128xf32, #tpu.memory_space<vmem>>, vector<1x128xf32>,
    %c0_122 = arith.constant 0 : index
    %c0_123 = arith.constant 0 : index
    %158 = vector.load %arg9[%c0_122, %c0_123] : memref<1x128xf32, #tpu.memory_space<vmem>>, vector<1x128xf32>
    %159 = arith.mulf %144, %144 : vector<4x128xf32>
    %cst_124 = arith.constant dense<0.000000e+00> : vector<128xf32>
    %160 = vector.multi_reduction <add>, %159, %cst_124 [0] : vector<4x128xf32> to vector<128xf32>
    %161 = vector.shape_cast %160 : vector<128xf32> to vector<1x128xf32>
    %162 = arith.addf %158, %161 : vector<1x128xf32>
    %c0_125 = arith.constant 0 : index
    %c0_126 = arith.constant 0 : index
    %163 = vector.load %arg9[%c0_125, %c0_126] : memref<1x128xf32, #tpu.memory_space<vmem>>, vector<1x128xf32>
    tpu.vector_store %arg9[%c0_125, %c0_126], %162 {strides = array<i32>} : memref<1x128xf32, #tpu.memory_space<vmem>>, vector<1x128xf32>,
    return
  }
  func.func @transform_0(%arg0: i32, %arg1: i32) -> (i32, i32, i32, i32) {
    %c0_i32 = arith.constant 0 : i32
    %c0_i32_0 = arith.constant 0 : i32
    %c0_i32_1 = arith.constant 0 : i32
    %c0_i32_2 = arith.constant 0 : i32
    return %arg0, %c0_i32, %c0_i32_0, %c0_i32_1 : i32, i32, i32, i32
  }
  func.func @transform_1(%arg0: i32, %arg1: i32) -> (i32, i32, i32, i32) {
    %c0_i32 = arith.constant 0 : i32
    %c0_i32_0 = arith.constant 0 : i32
    %c0_i32_1 = arith.constant 0 : i32
    %c0_i32_2 = arith.constant 0 : i32
    return %arg0, %c0_i32, %c0_i32_0, %c0_i32_1 : i32, i32, i32, i32
  }
  func.func @transform_2(%arg0: i32, %arg1: i32) -> (i32, i32, i32, i32) {
    %c0_i32 = arith.constant 0 : i32
    %c0_i32_0 = arith.constant 0 : i32
    %c0_i32_1 = arith.constant 0 : i32
    %c0_i32_2 = arith.constant 0 : i32
    return %arg0, %c0_i32, %c0_i32_0, %c0_i32_1 : i32, i32, i32, i32
  }
  func.func @transform_3(%arg0: i32, %arg1: i32) -> (i32, i32, i32, i32) {
    %c0_i32 = arith.constant 0 : i32
    %c0_i32_0 = arith.constant 0 : i32
    %c0_i32_1 = arith.constant 0 : i32
    %c0_i32_2 = arith.constant 0 : i32
    return %arg0, %c0_i32, %c0_i32_0, %c0_i32_1 : i32, i32, i32, i32
  }
  func.func @transform_4(%arg0: i32, %arg1: i32) -> (i32, i32, i32) {
    %c0_i32 = arith.constant 0 : i32
    %c0_i32_0 = arith.constant 0 : i32
    %c0_i32_1 = arith.constant 0 : i32
    %c0_i32_2 = arith.constant 0 : i32
    return %c0_i32, %c0_i32_0, %c0_i32_1 : i32, i32, i32
  }
  func.func @transform_5(%arg0: i32, %arg1: i32) -> (i32, i32, i32, i32) {
    %c0_i32 = arith.constant 0 : i32
    %c0_i32_0 = arith.constant 0 : i32
    %c0_i32_1 = arith.constant 0 : i32
    return %arg0, %arg1, %c0_i32, %c0_i32_0 : i32, i32, i32, i32
  }
  func.func @transform_6(%arg0: i32, %arg1: i32) -> (i32, i32) {
    %c0_i32 = arith.constant 0 : i32
    %c0_i32_0 = arith.constant 0 : i32
    %c0_i32_1 = arith.constant 0 : i32
    return %c0_i32, %c0_i32_0 : i32, i32
  }
  func.func @transform_7(%arg0: i32, %arg1: i32) -> (i32, i32) {
    %c0_i32 = arith.constant 0 : i32
    %c0_i32_0 = arith.constant 0 : i32
    %c0_i32_1 = arith.constant 0 : i32
    return %c0_i32, %c0_i32_0 : i32, i32
  }
}

module attributes {stable_mosaic.version = 11 : i64} {
  func.func @kernel(%arg0: i32, %arg1: i32, %arg2: memref<1x4x4x128xf32, #tpu.memory_space<vmem>>, %arg3: memref<16x128x128xbf16, #tpu.memory_space<vmem>>, %arg4: memref<1x1x1x128xf32, #tpu.memory_space<vmem>>) attributes {dimension_semantics = [#tpu.dimension_semantics<parallel>, #tpu.dimension_semantics<arbitrary>], iteration_bounds = array<i64: 2, 1>, scalar_prefetch = 0 : i64, scratch_operands = 0 : i64, tpu.core_type = #tpu.core_type<tc>, window_params = [{transform_indices = @transform_0, window_bounds = array<i64: 1, 4, 4, 128>}, {pipeline_mode = #tpu.pipeline_mode<synchronous>, transform_indices = @transform_1, window_bounds = array<i64: 16, 128, 128>}, {transform_indices = @transform_2, window_bounds = array<i64: 1, 1, 1, 128>}]} {
    %cst = arith.constant 0.000000e+00 : f32
    %0 = vector.broadcast %cst : f32 to vector<1x128xf32>
    %c0_i32 = arith.constant 0 : i32
    %1 = arith.addi %arg1, %c0_i32 : i32
    %c0 = arith.constant 0 : index
    %2 = arith.index_cast %1 : i32 to index
    %c0_0 = arith.constant 0 : index
    %c0_1 = arith.constant 0 : index
    %3 = vector.load %arg2[%c0, %2, %c0_0, %c0_1] : memref<1x4x4x128xf32, #tpu.memory_space<vmem>>, vector<1x1x1x128xf32>
    %4 = vector.shape_cast %3 : vector<1x1x1x128xf32> to vector<1x128xf32>
    %5 = arith.truncf %4 : vector<1x128xf32> to vector<1x128xbf16>
    %c0_2 = arith.constant 0 : index
    %c0_3 = arith.constant 0 : index
    %c0_4 = arith.constant 0 : index
    %6 = vector.load %arg3[%c0_2, %c0_3, %c0_4] : memref<16x128x128xbf16, #tpu.memory_space<vmem>>, vector<1x128x128xbf16>
    %7 = vector.shape_cast %6 : vector<1x128x128xbf16> to vector<128x128xbf16>
    %cst_5 = arith.constant dense<0.000000e+00> : vector<1x128xf32>
    %8 = tpu.matmul %5, %7, %cst_5 {dimension_numbers = #tpu.dot_dimension_numbers<[1], [0], [0], [1], [0, 0, 1, 1], [], []>} : vector<1x128xbf16>, vector<128x128xbf16>, vector<1x128xf32> -> vector<1x128xf32>
    %9 = arith.addf %0, %8 : vector<1x128xf32>
    %c0_i32_6 = arith.constant 0 : i32
    %10 = arith.addi %arg1, %c0_i32_6 : i32
    %c0_7 = arith.constant 0 : index
    %11 = arith.index_cast %10 : i32 to index
    %c1 = arith.constant 1 : index
    %c0_8 = arith.constant 0 : index
    %12 = vector.load %arg2[%c0_7, %11, %c1, %c0_8] : memref<1x4x4x128xf32, #tpu.memory_space<vmem>>, vector<1x1x1x128xf32>
    %13 = vector.shape_cast %12 : vector<1x1x1x128xf32> to vector<1x128xf32>
    %14 = arith.truncf %13 : vector<1x128xf32> to vector<1x128xbf16>
    %c1_9 = arith.constant 1 : index
    %c0_10 = arith.constant 0 : index
    %c0_11 = arith.constant 0 : index
    %15 = vector.load %arg3[%c1_9, %c0_10, %c0_11] : memref<16x128x128xbf16, #tpu.memory_space<vmem>>, vector<1x128x128xbf16>
    %16 = vector.shape_cast %15 : vector<1x128x128xbf16> to vector<128x128xbf16>
    %cst_12 = arith.constant dense<0.000000e+00> : vector<1x128xf32>
    %17 = tpu.matmul %14, %16, %cst_12 {dimension_numbers = #tpu.dot_dimension_numbers<[1], [0], [0], [1], [0, 0, 1, 1], [], []>} : vector<1x128xbf16>, vector<128x128xbf16>, vector<1x128xf32> -> vector<1x128xf32>
    %18 = arith.addf %9, %17 : vector<1x128xf32>
    %c0_i32_13 = arith.constant 0 : i32
    %19 = arith.addi %arg1, %c0_i32_13 : i32
    %c0_14 = arith.constant 0 : index
    %20 = arith.index_cast %19 : i32 to index
    %c2 = arith.constant 2 : index
    %c0_15 = arith.constant 0 : index
    %21 = vector.load %arg2[%c0_14, %20, %c2, %c0_15] : memref<1x4x4x128xf32, #tpu.memory_space<vmem>>, vector<1x1x1x128xf32>
    %22 = vector.shape_cast %21 : vector<1x1x1x128xf32> to vector<1x128xf32>
    %23 = arith.truncf %22 : vector<1x128xf32> to vector<1x128xbf16>
    %c2_16 = arith.constant 2 : index
    %c0_17 = arith.constant 0 : index
    %c0_18 = arith.constant 0 : index
    %24 = vector.load %arg3[%c2_16, %c0_17, %c0_18] : memref<16x128x128xbf16, #tpu.memory_space<vmem>>, vector<1x128x128xbf16>
    %25 = vector.shape_cast %24 : vector<1x128x128xbf16> to vector<128x128xbf16>
    %cst_19 = arith.constant dense<0.000000e+00> : vector<1x128xf32>
    %26 = tpu.matmul %23, %25, %cst_19 {dimension_numbers = #tpu.dot_dimension_numbers<[1], [0], [0], [1], [0, 0, 1, 1], [], []>} : vector<1x128xbf16>, vector<128x128xbf16>, vector<1x128xf32> -> vector<1x128xf32>
    %27 = arith.addf %18, %26 : vector<1x128xf32>
    %c0_i32_20 = arith.constant 0 : i32
    %28 = arith.addi %arg1, %c0_i32_20 : i32
    %c0_21 = arith.constant 0 : index
    %29 = arith.index_cast %28 : i32 to index
    %c3 = arith.constant 3 : index
    %c0_22 = arith.constant 0 : index
    %30 = vector.load %arg2[%c0_21, %29, %c3, %c0_22] : memref<1x4x4x128xf32, #tpu.memory_space<vmem>>, vector<1x1x1x128xf32>
    %31 = vector.shape_cast %30 : vector<1x1x1x128xf32> to vector<1x128xf32>
    %32 = arith.truncf %31 : vector<1x128xf32> to vector<1x128xbf16>
    %c3_23 = arith.constant 3 : index
    %c0_24 = arith.constant 0 : index
    %c0_25 = arith.constant 0 : index
    %33 = vector.load %arg3[%c3_23, %c0_24, %c0_25] : memref<16x128x128xbf16, #tpu.memory_space<vmem>>, vector<1x128x128xbf16>
    %34 = vector.shape_cast %33 : vector<1x128x128xbf16> to vector<128x128xbf16>
    %cst_26 = arith.constant dense<0.000000e+00> : vector<1x128xf32>
    %35 = tpu.matmul %32, %34, %cst_26 {dimension_numbers = #tpu.dot_dimension_numbers<[1], [0], [0], [1], [0, 0, 1, 1], [], []>} : vector<1x128xbf16>, vector<128x128xbf16>, vector<1x128xf32> -> vector<1x128xf32>
    %36 = arith.addf %27, %35 : vector<1x128xf32>
    %c1_i32 = arith.constant 1 : i32
    %37 = arith.addi %arg1, %c1_i32 : i32
    %c0_27 = arith.constant 0 : index
    %38 = arith.index_cast %37 : i32 to index
    %c0_28 = arith.constant 0 : index
    %c0_29 = arith.constant 0 : index
    %39 = vector.load %arg2[%c0_27, %38, %c0_28, %c0_29] : memref<1x4x4x128xf32, #tpu.memory_space<vmem>>, vector<1x1x1x128xf32>
    %40 = vector.shape_cast %39 : vector<1x1x1x128xf32> to vector<1x128xf32>
    %41 = arith.truncf %40 : vector<1x128xf32> to vector<1x128xbf16>
    %c4 = arith.constant 4 : index
    %c0_30 = arith.constant 0 : index
    %c0_31 = arith.constant 0 : index
    %42 = vector.load %arg3[%c4, %c0_30, %c0_31] : memref<16x128x128xbf16, #tpu.memory_space<vmem>>, vector<1x128x128xbf16>
    %43 = vector.shape_cast %42 : vector<1x128x128xbf16> to vector<128x128xbf16>
    %cst_32 = arith.constant dense<0.000000e+00> : vector<1x128xf32>
    %44 = tpu.matmul %41, %43, %cst_32 {dimension_numbers = #tpu.dot_dimension_numbers<[1], [0], [0], [1], [0, 0, 1, 1], [], []>} : vector<1x128xbf16>, vector<128x128xbf16>, vector<1x128xf32> -> vector<1x128xf32>
    %45 = arith.addf %36, %44 : vector<1x128xf32>
    %c1_i32_33 = arith.constant 1 : i32
    %46 = arith.addi %arg1, %c1_i32_33 : i32
    %c0_34 = arith.constant 0 : index
    %47 = arith.index_cast %46 : i32 to index
    %c1_35 = arith.constant 1 : index
    %c0_36 = arith.constant 0 : index
    %48 = vector.load %arg2[%c0_34, %47, %c1_35, %c0_36] : memref<1x4x4x128xf32, #tpu.memory_space<vmem>>, vector<1x1x1x128xf32>
    %49 = vector.shape_cast %48 : vector<1x1x1x128xf32> to vector<1x128xf32>
    %50 = arith.truncf %49 : vector<1x128xf32> to vector<1x128xbf16>
    %c5 = arith.constant 5 : index
    %c0_37 = arith.constant 0 : index
    %c0_38 = arith.constant 0 : index
    %51 = vector.load %arg3[%c5, %c0_37, %c0_38] : memref<16x128x128xbf16, #tpu.memory_space<vmem>>, vector<1x128x128xbf16>
    %52 = vector.shape_cast %51 : vector<1x128x128xbf16> to vector<128x128xbf16>
    %cst_39 = arith.constant dense<0.000000e+00> : vector<1x128xf32>
    %53 = tpu.matmul %50, %52, %cst_39 {dimension_numbers = #tpu.dot_dimension_numbers<[1], [0], [0], [1], [0, 0, 1, 1], [], []>} : vector<1x128xbf16>, vector<128x128xbf16>, vector<1x128xf32> -> vector<1x128xf32>
    %54 = arith.addf %45, %53 : vector<1x128xf32>
    %c1_i32_40 = arith.constant 1 : i32
    %55 = arith.addi %arg1, %c1_i32_40 : i32
    %c0_41 = arith.constant 0 : index
    %56 = arith.index_cast %55 : i32 to index
    %c2_42 = arith.constant 2 : index
    %c0_43 = arith.constant 0 : index
    %57 = vector.load %arg2[%c0_41, %56, %c2_42, %c0_43] : memref<1x4x4x128xf32, #tpu.memory_space<vmem>>, vector<1x1x1x128xf32>
    %58 = vector.shape_cast %57 : vector<1x1x1x128xf32> to vector<1x128xf32>
    %59 = arith.truncf %58 : vector<1x128xf32> to vector<1x128xbf16>
    %c6 = arith.constant 6 : index
    %c0_44 = arith.constant 0 : index
    %c0_45 = arith.constant 0 : index
    %60 = vector.load %arg3[%c6, %c0_44, %c0_45] : memref<16x128x128xbf16, #tpu.memory_space<vmem>>, vector<1x128x128xbf16>
    %61 = vector.shape_cast %60 : vector<1x128x128xbf16> to vector<128x128xbf16>
    %cst_46 = arith.constant dense<0.000000e+00> : vector<1x128xf32>
    %62 = tpu.matmul %59, %61, %cst_46 {dimension_numbers = #tpu.dot_dimension_numbers<[1], [0], [0], [1], [0, 0, 1, 1], [], []>} : vector<1x128xbf16>, vector<128x128xbf16>, vector<1x128xf32> -> vector<1x128xf32>
    %63 = arith.addf %54, %62 : vector<1x128xf32>
    %c1_i32_47 = arith.constant 1 : i32
    %64 = arith.addi %arg1, %c1_i32_47 : i32
    %c0_48 = arith.constant 0 : index
    %65 = arith.index_cast %64 : i32 to index
    %c3_49 = arith.constant 3 : index
    %c0_50 = arith.constant 0 : index
    %66 = vector.load %arg2[%c0_48, %65, %c3_49, %c0_50] : memref<1x4x4x128xf32, #tpu.memory_space<vmem>>, vector<1x1x1x128xf32>
    %67 = vector.shape_cast %66 : vector<1x1x1x128xf32> to vector<1x128xf32>
    %68 = arith.truncf %67 : vector<1x128xf32> to vector<1x128xbf16>
    %c7 = arith.constant 7 : index
    %c0_51 = arith.constant 0 : index
    %c0_52 = arith.constant 0 : index
    %69 = vector.load %arg3[%c7, %c0_51, %c0_52] : memref<16x128x128xbf16, #tpu.memory_space<vmem>>, vector<1x128x128xbf16>
    %70 = vector.shape_cast %69 : vector<1x128x128xbf16> to vector<128x128xbf16>
    %cst_53 = arith.constant dense<0.000000e+00> : vector<1x128xf32>
    %71 = tpu.matmul %68, %70, %cst_53 {dimension_numbers = #tpu.dot_dimension_numbers<[1], [0], [0], [1], [0, 0, 1, 1], [], []>} : vector<1x128xbf16>, vector<128x128xbf16>, vector<1x128xf32> -> vector<1x128xf32>
    %72 = arith.addf %63, %71 : vector<1x128xf32>
    %c2_i32 = arith.constant 2 : i32
    %73 = arith.addi %arg1, %c2_i32 : i32
    %c0_54 = arith.constant 0 : index
    %74 = arith.index_cast %73 : i32 to index
    %c0_55 = arith.constant 0 : index
    %c0_56 = arith.constant 0 : index
    %75 = vector.load %arg2[%c0_54, %74, %c0_55, %c0_56] : memref<1x4x4x128xf32, #tpu.memory_space<vmem>>, vector<1x1x1x128xf32>
    %76 = vector.shape_cast %75 : vector<1x1x1x128xf32> to vector<1x128xf32>
    %77 = arith.truncf %76 : vector<1x128xf32> to vector<1x128xbf16>
    %c8 = arith.constant 8 : index
    %c0_57 = arith.constant 0 : index
    %c0_58 = arith.constant 0 : index
    %78 = vector.load %arg3[%c8, %c0_57, %c0_58] : memref<16x128x128xbf16, #tpu.memory_space<vmem>>, vector<1x128x128xbf16>
    %79 = vector.shape_cast %78 : vector<1x128x128xbf16> to vector<128x128xbf16>
    %cst_59 = arith.constant dense<0.000000e+00> : vector<1x128xf32>
    %80 = tpu.matmul %77, %79, %cst_59 {dimension_numbers = #tpu.dot_dimension_numbers<[1], [0], [0], [1], [0, 0, 1, 1], [], []>} : vector<1x128xbf16>, vector<128x128xbf16>, vector<1x128xf32> -> vector<1x128xf32>
    %81 = arith.addf %72, %80 : vector<1x128xf32>
    %c2_i32_60 = arith.constant 2 : i32
    %82 = arith.addi %arg1, %c2_i32_60 : i32
    %c0_61 = arith.constant 0 : index
    %83 = arith.index_cast %82 : i32 to index
    %c1_62 = arith.constant 1 : index
    %c0_63 = arith.constant 0 : index
    %84 = vector.load %arg2[%c0_61, %83, %c1_62, %c0_63] : memref<1x4x4x128xf32, #tpu.memory_space<vmem>>, vector<1x1x1x128xf32>
    %85 = vector.shape_cast %84 : vector<1x1x1x128xf32> to vector<1x128xf32>
    %86 = arith.truncf %85 : vector<1x128xf32> to vector<1x128xbf16>
    %c9 = arith.constant 9 : index
    %c0_64 = arith.constant 0 : index
    %c0_65 = arith.constant 0 : index
    %87 = vector.load %arg3[%c9, %c0_64, %c0_65] : memref<16x128x128xbf16, #tpu.memory_space<vmem>>, vector<1x128x128xbf16>
    %88 = vector.shape_cast %87 : vector<1x128x128xbf16> to vector<128x128xbf16>
    %cst_66 = arith.constant dense<0.000000e+00> : vector<1x128xf32>
    %89 = tpu.matmul %86, %88, %cst_66 {dimension_numbers = #tpu.dot_dimension_numbers<[1], [0], [0], [1], [0, 0, 1, 1], [], []>} : vector<1x128xbf16>, vector<128x128xbf16>, vector<1x128xf32> -> vector<1x128xf32>
    %90 = arith.addf %81, %89 : vector<1x128xf32>
    %c2_i32_67 = arith.constant 2 : i32
    %91 = arith.addi %arg1, %c2_i32_67 : i32
    %c0_68 = arith.constant 0 : index
    %92 = arith.index_cast %91 : i32 to index
    %c2_69 = arith.constant 2 : index
    %c0_70 = arith.constant 0 : index
    %93 = vector.load %arg2[%c0_68, %92, %c2_69, %c0_70] : memref<1x4x4x128xf32, #tpu.memory_space<vmem>>, vector<1x1x1x128xf32>
    %94 = vector.shape_cast %93 : vector<1x1x1x128xf32> to vector<1x128xf32>
    %95 = arith.truncf %94 : vector<1x128xf32> to vector<1x128xbf16>
    %c10 = arith.constant 10 : index
    %c0_71 = arith.constant 0 : index
    %c0_72 = arith.constant 0 : index
    %96 = vector.load %arg3[%c10, %c0_71, %c0_72] : memref<16x128x128xbf16, #tpu.memory_space<vmem>>, vector<1x128x128xbf16>
    %97 = vector.shape_cast %96 : vector<1x128x128xbf16> to vector<128x128xbf16>
    %cst_73 = arith.constant dense<0.000000e+00> : vector<1x128xf32>
    %98 = tpu.matmul %95, %97, %cst_73 {dimension_numbers = #tpu.dot_dimension_numbers<[1], [0], [0], [1], [0, 0, 1, 1], [], []>} : vector<1x128xbf16>, vector<128x128xbf16>, vector<1x128xf32> -> vector<1x128xf32>
    %99 = arith.addf %90, %98 : vector<1x128xf32>
    %c2_i32_74 = arith.constant 2 : i32
    %100 = arith.addi %arg1, %c2_i32_74 : i32
    %c0_75 = arith.constant 0 : index
    %101 = arith.index_cast %100 : i32 to index
    %c3_76 = arith.constant 3 : index
    %c0_77 = arith.constant 0 : index
    %102 = vector.load %arg2[%c0_75, %101, %c3_76, %c0_77] : memref<1x4x4x128xf32, #tpu.memory_space<vmem>>, vector<1x1x1x128xf32>
    %103 = vector.shape_cast %102 : vector<1x1x1x128xf32> to vector<1x128xf32>
    %104 = arith.truncf %103 : vector<1x128xf32> to vector<1x128xbf16>
    %c11 = arith.constant 11 : index
    %c0_78 = arith.constant 0 : index
    %c0_79 = arith.constant 0 : index
    %105 = vector.load %arg3[%c11, %c0_78, %c0_79] : memref<16x128x128xbf16, #tpu.memory_space<vmem>>, vector<1x128x128xbf16>
    %106 = vector.shape_cast %105 : vector<1x128x128xbf16> to vector<128x128xbf16>
    %cst_80 = arith.constant dense<0.000000e+00> : vector<1x128xf32>
    %107 = tpu.matmul %104, %106, %cst_80 {dimension_numbers = #tpu.dot_dimension_numbers<[1], [0], [0], [1], [0, 0, 1, 1], [], []>} : vector<1x128xbf16>, vector<128x128xbf16>, vector<1x128xf32> -> vector<1x128xf32>
    %108 = arith.addf %99, %107 : vector<1x128xf32>
    %c3_i32 = arith.constant 3 : i32
    %109 = arith.addi %arg1, %c3_i32 : i32
    %c0_81 = arith.constant 0 : index
    %110 = arith.index_cast %109 : i32 to index
    %c0_82 = arith.constant 0 : index
    %c0_83 = arith.constant 0 : index
    %111 = vector.load %arg2[%c0_81, %110, %c0_82, %c0_83] : memref<1x4x4x128xf32, #tpu.memory_space<vmem>>, vector<1x1x1x128xf32>
    %112 = vector.shape_cast %111 : vector<1x1x1x128xf32> to vector<1x128xf32>
    %113 = arith.truncf %112 : vector<1x128xf32> to vector<1x128xbf16>
    %c12 = arith.constant 12 : index
    %c0_84 = arith.constant 0 : index
    %c0_85 = arith.constant 0 : index
    %114 = vector.load %arg3[%c12, %c0_84, %c0_85] : memref<16x128x128xbf16, #tpu.memory_space<vmem>>, vector<1x128x128xbf16>
    %115 = vector.shape_cast %114 : vector<1x128x128xbf16> to vector<128x128xbf16>
    %cst_86 = arith.constant dense<0.000000e+00> : vector<1x128xf32>
    %116 = tpu.matmul %113, %115, %cst_86 {dimension_numbers = #tpu.dot_dimension_numbers<[1], [0], [0], [1], [0, 0, 1, 1], [], []>} : vector<1x128xbf16>, vector<128x128xbf16>, vector<1x128xf32> -> vector<1x128xf32>
    %117 = arith.addf %108, %116 : vector<1x128xf32>
    %c3_i32_87 = arith.constant 3 : i32
    %118 = arith.addi %arg1, %c3_i32_87 : i32
    %c0_88 = arith.constant 0 : index
    %119 = arith.index_cast %118 : i32 to index
    %c1_89 = arith.constant 1 : index
    %c0_90 = arith.constant 0 : index
    %120 = vector.load %arg2[%c0_88, %119, %c1_89, %c0_90] : memref<1x4x4x128xf32, #tpu.memory_space<vmem>>, vector<1x1x1x128xf32>
    %121 = vector.shape_cast %120 : vector<1x1x1x128xf32> to vector<1x128xf32>
    %122 = arith.truncf %121 : vector<1x128xf32> to vector<1x128xbf16>
    %c13 = arith.constant 13 : index
    %c0_91 = arith.constant 0 : index
    %c0_92 = arith.constant 0 : index
    %123 = vector.load %arg3[%c13, %c0_91, %c0_92] : memref<16x128x128xbf16, #tpu.memory_space<vmem>>, vector<1x128x128xbf16>
    %124 = vector.shape_cast %123 : vector<1x128x128xbf16> to vector<128x128xbf16>
    %cst_93 = arith.constant dense<0.000000e+00> : vector<1x128xf32>
    %125 = tpu.matmul %122, %124, %cst_93 {dimension_numbers = #tpu.dot_dimension_numbers<[1], [0], [0], [1], [0, 0, 1, 1], [], []>} : vector<1x128xbf16>, vector<128x128xbf16>, vector<1x128xf32> -> vector<1x128xf32>
    %126 = arith.addf %117, %125 : vector<1x128xf32>
    %c3_i32_94 = arith.constant 3 : i32
    %127 = arith.addi %arg1, %c3_i32_94 : i32
    %c0_95 = arith.constant 0 : index
    %128 = arith.index_cast %127 : i32 to index
    %c2_96 = arith.constant 2 : index
    %c0_97 = arith.constant 0 : index
    %129 = vector.load %arg2[%c0_95, %128, %c2_96, %c0_97] : memref<1x4x4x128xf32, #tpu.memory_space<vmem>>, vector<1x1x1x128xf32>
    %130 = vector.shape_cast %129 : vector<1x1x1x128xf32> to vector<1x128xf32>
    %131 = arith.truncf %130 : vector<1x128xf32> to vector<1x128xbf16>
    %c14 = arith.constant 14 : index
    %c0_98 = arith.constant 0 : index
    %c0_99 = arith.constant 0 : index
    %132 = vector.load %arg3[%c14, %c0_98, %c0_99] : memref<16x128x128xbf16, #tpu.memory_space<vmem>>, vector<1x128x128xbf16>
    %133 = vector.shape_cast %132 : vector<1x128x128xbf16> to vector<128x128xbf16>
    %cst_100 = arith.constant dense<0.000000e+00> : vector<1x128xf32>
    %134 = tpu.matmul %131, %133, %cst_100 {dimension_numbers = #tpu.dot_dimension_numbers<[1], [0], [0], [1], [0, 0, 1, 1], [], []>} : vector<1x128xbf16>, vector<128x128xbf16>, vector<1x128xf32> -> vector<1x128xf32>
    %135 = arith.addf %126, %134 : vector<1x128xf32>
    %c3_i32_101 = arith.constant 3 : i32
    %136 = arith.addi %arg1, %c3_i32_101 : i32
    %c0_102 = arith.constant 0 : index
    %137 = arith.index_cast %136 : i32 to index
    %c3_103 = arith.constant 3 : index
    %c0_104 = arith.constant 0 : index
    %138 = vector.load %arg2[%c0_102, %137, %c3_103, %c0_104] : memref<1x4x4x128xf32, #tpu.memory_space<vmem>>, vector<1x1x1x128xf32>
    %139 = vector.shape_cast %138 : vector<1x1x1x128xf32> to vector<1x128xf32>
    %140 = arith.truncf %139 : vector<1x128xf32> to vector<1x128xbf16>
    %c15 = arith.constant 15 : index
    %c0_105 = arith.constant 0 : index
    %c0_106 = arith.constant 0 : index
    %141 = vector.load %arg3[%c15, %c0_105, %c0_106] : memref<16x128x128xbf16, #tpu.memory_space<vmem>>, vector<1x128x128xbf16>
    %142 = vector.shape_cast %141 : vector<1x128x128xbf16> to vector<128x128xbf16>
    %cst_107 = arith.constant dense<0.000000e+00> : vector<1x128xf32>
    %143 = tpu.matmul %140, %142, %cst_107 {dimension_numbers = #tpu.dot_dimension_numbers<[1], [0], [0], [1], [0, 0, 1, 1], [], []>} : vector<1x128xbf16>, vector<128x128xbf16>, vector<1x128xf32> -> vector<1x128xf32>
    %144 = arith.addf %135, %143 : vector<1x128xf32>
    %cst_108 = arith.constant 0.000000e+00 : f32
    %145 = vector.broadcast %cst_108 : f32 to vector<1x128xf32>
    %146 = arith.subf %145, %144 : vector<1x128xf32>
    %147 = math.exp %146 : vector<1x128xf32>
    %cst_109 = arith.constant 1.000000e+00 : f32
    %148 = vector.broadcast %cst_109 : f32 to vector<1x128xf32>
    %149 = arith.addf %148, %147 : vector<1x128xf32>
    %cst_110 = arith.constant 1.000000e+00 : f32
    %150 = vector.broadcast %cst_110 : f32 to vector<1x128xf32>
    %151 = arith.divf %150, %149 : vector<1x128xf32>
    %c0_111 = arith.constant 0 : index
    %c0_112 = arith.constant 0 : index
    %c0_113 = arith.constant 0 : index
    %c0_114 = arith.constant 0 : index
    %152 = vector.load %arg4[%c0_111, %c0_112, %c0_113, %c0_114] : memref<1x1x1x128xf32, #tpu.memory_space<vmem>>, vector<1x1x1x128xf32>
    %153 = vector.shape_cast %152 : vector<1x1x1x128xf32> to vector<1x128xf32>
    %154 = vector.shape_cast %151 : vector<1x128xf32> to vector<1x1x1x128xf32>
    tpu.vector_store %arg4[%c0_111, %c0_112, %c0_113, %c0_114], %154 {strides = array<i32>} : memref<1x1x1x128xf32, #tpu.memory_space<vmem>>, vector<1x1x1x128xf32>,
    return
  }
  func.func @transform_0(%arg0: i32, %arg1: i32) -> (i32, i32, i32, i32) {
    %c0_i32 = arith.constant 0 : i32
    %c0_i32_0 = arith.constant 0 : i32
    %c0_i32_1 = arith.constant 0 : i32
    %c0_i32_2 = arith.constant 0 : i32
    return %arg0, %c0_i32, %c0_i32_0, %c0_i32_1 : i32, i32, i32, i32
  }
  func.func @transform_1(%arg0: i32, %arg1: i32) -> (i32, i32, i32) {
    %c0_i32 = arith.constant 0 : i32
    %c0_i32_0 = arith.constant 0 : i32
    %c0_i32_1 = arith.constant 0 : i32
    %c0_i32_2 = arith.constant 0 : i32
    return %c0_i32, %c0_i32_0, %c0_i32_1 : i32, i32, i32
  }
  func.func @transform_2(%arg0: i32, %arg1: i32) -> (i32, i32, i32, i32) {
    %c0_i32 = arith.constant 0 : i32
    %c0_i32_0 = arith.constant 0 : i32
    %c0_i32_1 = arith.constant 0 : i32
    return %arg0, %arg1, %c0_i32, %c0_i32_0 : i32, i32, i32, i32
  }
}

</mosaic_0001>

<bundles_post_ra>
// kernel: discriminator_forward.8
= control target key start
LH: loop header
LB: loop body
LE: loop exit
PB: predicated region body
PF: predicated region fallthrough
CT: control target
= control target key end

     0   :  { %s483_s12 = smov 0   ;;  %s649_s0 = inlined_call_operand.vmem [shape: f32[2,16,16,128], index: 0, kind: input, shape index: {}]   ;;  %s650_s1 = inlined_call_operand.vmem [shape: f32[1,1,128], index: 1, kind: input, shape index: {}]   ;;  %s651_s2 = inlined_call_operand.vmem [shape: f32[1,1,128], index: 2, kind: input, shape index: {}]   ;;  %s652_s3 = inlined_call_operand.vmem [shape: f32[2,16,16,128], index: 3, kind: output, shape index: {}]  }
   0x1 LB: > { %s432_s13 = sadd.s32 4294967295, %s461_s12   ;;  %p436_p0 = scmp.ge.s32.totalorder %s461_s12, 1  ;;  %s461_s12 = sphi %s483_s12, %s13_s12  }
   0x2   : > { %p137_p1 = scmp.lt.s32.totalorder %s461_s12, 3 }
   0x4   : > { %p138_p2 = pnand %p436_p0, %p137_p1 }
   0x5   : > { %p161_p3 = scmp.lt.s32.totalorder (!%p138_p2), %s432_s13, 1  ;;  %v497_v0 = vld [vmem:[%s650_s1] ss:$0 sm:$0xff] (!%p138_p2) }
   0x6   : > { %141 = sbr.rel (%p138_p2) target bundleno = 56 (0x38), region = 32  ;;  %v509_v1 = vld [vmem:[%s651_s2] ss:$0 sm:$0xff] (!%p138_p2) }
   0xd   : > { %s654_s13 = smov (!%p161_p3, %s432_s13), 1 }
   0xe   : > { %s445_s14 = sshll.u32 %s654_s13, 8 }
   0xf   : > { %s504_s19 = scalar_lea.vmem %s649_s0, %s445_s14  ;;  %s542_s24 = scalar_lea.vmem %s652_s3, %s445_s14 }
  0x10   : > { %v171_v2 = vld [vmem:[%s504_s19] sm:$0xff]  ;;  %v172_v3 = vld [vmem:[%s504_s19 + $0x8] sm:$0xff]  ;;  %v173_v4 = vld [vmem:[%s504_s19 + $0x10] sm:$0xff] }
  0x11   : > { %v210_v5 = vmul.f32 %v497_v0, %v171_v2  ;;  %v211_v6 = vmul.f32 %v497_v0, %v172_v3  ;;  %v212_v7 = vmul.f32 %v497_v0, %v173_v4  ;;  %v174_v8 = vld [vmem:[%s504_s19 + $0x18] sm:$0xff]  ;;  %v175_v9 = vld [vmem:[%s504_s19 + $0x20] sm:$0xff]  ;;  %v176_v10 = vld [vmem:[%s504_s19 + $0x28] sm:$0xff] }
  0x12   : > { %v213_v11 = vmul.f32 %v497_v0, %v174_v8  ;;  %v214_v12 = vmul.f32 %v497_v0, %v175_v9  ;;  %v215_v13 = vmul.f32 %v497_v0, %v176_v10  ;;  %v177_v14 = vld [vmem:[%s504_s19 + $0x30] sm:$0xff]  ;;  %v178_v15 = vld [vmem:[%s504_s19 + $0x38] sm:$0xff]  ;;  %v179_v24 = vld [vmem:[%s504_s19 + $0x40] sm:$0xff] }
  0x13   : > { %v249_v16 = vadd.f32 %v509_v1, %v210_v5  ;;  %v250_v17 = vadd.f32 %v509_v1, %v211_v6  ;;  %v251_v18 = vadd.f32 %v509_v1, %v212_v7  ;;  %v216_v19 = vmul.f32 %v497_v0, %v177_v14  ;;  %v180_v25 = vld [vmem:[%s504_s19 + $0x48] sm:$0xff]  ;;  %v181_v26 = vld [vmem:[%s504_s19 + $0x50] sm:$0xff]  ;;  %v182_v39 = vld [vmem:[%s504_s19 + $0x58] sm:$0xff] }
  0x14   : > { %v252_v20 = vadd.f32 %v509_v1, %v213_v11  ;;  %v253_v21 = vadd.f32 %v509_v1, %v214_v12  ;;  %v254_v22 = vadd.f32 %v509_v1, %v215_v13  ;;  %v217_v23 = vmul.f32 %v497_v0, %v178_v15  ;;  %v183_v40 = vld [vmem:[%s504_s19 + $0x60] sm:$0xff]  ;;  %v184_v41 = vld [vmem:[%s504_s19 + $0x68] sm:$0xff]  ;;  %v185_v46 = vld [vmem:[%s504_s19 + $0x70] sm:$0xff] }
  0x15   : > { %v281_v27 = vmul.f32 0.2, %v249_v16  ;;  %v282_v28 = vmul.f32 0.2, %v250_v17  ;;  %v283_v29 = vmul.f32 0.2, %v251_v18  ;;  %v255_v30 = vadd.f32 %v509_v1, %v216_v19 }
  0x16   : > { %v284_v31 = vmul.f32 0.2, %v252_v20  ;;  %v285_v32 = vmul.f32 0.2, %v253_v21  ;;  %v286_v33 = vmul.f32 0.2, %v254_v22  ;;  %v256_v34 = vadd.f32 %v509_v1, %v217_v23 }
  0x17   : > { %v313_v35 = vmax.f32 %v249_v16, %v281_v27  ;;  %v314_v36 = vmax.f32 %v250_v17, %v282_v28  ;;  %v315_v37 = vmax.f32 %v251_v18, %v283_v29  ;;  %v287_v38 = vmul.f32 0.2, %v255_v30  ;;  %v186_v51 = vld [vmem:[%s504_s19 + $0x78] sm:$0xff]  ;;  %v187_v2 = vld [vmem:[%s504_s19 + $0x80] sm:$0xff]  ;;  %v188_v3 = vld [vmem:[%s504_s19 + $0x88] sm:$0xff] }
  0x18   : > { %v316_v42 = vmax.f32 %v252_v20, %v284_v31  ;;  %v317_v43 = vmax.f32 %v253_v21, %v285_v32  ;;  %v318_v44 = vmax.f32 %v254_v22, %v286_v33  ;;  %v288_v45 = vmul.f32 0.2, %v256_v34  ;;  %v189_v4 = vld [vmem:[%s504_s19 + $0x90] sm:$0xff]  ;;  %v190_v17 = vld [vmem:[%s504_s19 + $0x98] sm:$0xff]  ;;  %v191_v18 = vld [vmem:[%s504_s19 + $0xa0] sm:$0xff] }
  0x19   : > { %345 = vst [vmem:[%s542_s24] sm:$0xff] %v313_v35  ;;  %346 = vst [vmem:[%s542_s24 + $0x8] sm:$0xff] %v314_v36  ;;  %v319_v47 = vmax.f32 %v255_v30, %v287_v38  ;;  %v218_v48 = vmul.f32 %v497_v0, %v179_v24  ;;  %v219_v49 = vmul.f32 %v497_v0, %v180_v25  ;;  %v192_v19 = vld [vmem:[%s504_s19 + $0xa8] sm:$0xff]  ;;  %v193_v24 = vld [vmem:[%s504_s19 + $0xb0] sm:$0xff] }
  0x1a   : > { %347 = vst [vmem:[%s542_s24 + $0x10] sm:$0xff] %v315_v37  ;;  %v220_v50 = vmul.f32 %v497_v0, %v181_v26  ;;  %348 = vst [vmem:[%s542_s24 + $0x18] sm:$0xff] %v316_v42  ;;  %v320_v52 = vmax.f32 %v256_v34, %v288_v45  ;;  %v221_v53 = vmul.f32 %v497_v0, %v182_v39  ;;  %v194_v29 = vld [vmem:[%s504_s19 + $0xb8] sm:$0xff]  ;;  %v195_v42 = vld [vmem:[%s504_s19 + $0xc0] sm:$0xff] }
  0x1b   : > { %349 = vst [vmem:[%s542_s24 + $0x20] sm:$0xff] %v317_v43  ;;  %350 = vst [vmem:[%s542_s24 + $0x28] sm:$0xff] %v318_v44  ;;  %v222_v54 = vmul.f32 %v497_v0, %v183_v40  ;;  %v223_v55 = vmul.f32 %v497_v0, %v184_v41  ;;  %v257_v56 = vadd.f32 %v509_v1, %v218_v48  ;;  %v196_v43 = vld [vmem:[%s504_s19 + $0xc8] sm:$0xff]  ;;  %v197_v44 = vld [vmem:[%s504_s19 + $0xd0] sm:$0xff] }
  0x1c   : > { %351 = vst [vmem:[%s542_s24 + $0x30] sm:$0xff] %v319_v47  ;;  %v258_v57 = vadd.f32 %v509_v1, %v219_v49  ;;  %v259_v58 = vadd.f32 %v509_v1, %v220_v50  ;;  %v224_v59 = vmul.f32 %v497_v0, %v185_v46  ;;  %352 = vst [vmem:[%s542_s24 + $0x38] sm:$0xff] %v320_v52 }
  0x1d   : > { %v260_v60 = vadd.f32 %v509_v1, %v221_v53  ;;  %v261_v61 = vadd.f32 %v509_v1, %v222_v54  ;;  %v262_v62 = vadd.f32 %v509_v1, %v223_v55  ;;  %v225_v63 = vmul.f32 %v497_v0, %v186_v51 }
  0x1e   : > { %v289_v5 = vmul.f32 0.2, %v257_v56  ;;  %v290_v6 = vmul.f32 0.2, %v258_v57  ;;  %v291_v7 = vmul.f32 0.2, %v259_v58  ;;  %v263_v8 = vadd.f32 %v509_v1, %v224_v59 }
  0x1f   : > { %v292_v9 = vmul.f32 0.2, %v260_v60  ;;  %v293_v10 = vmul.f32 0.2, %v261_v61  ;;  %v294_v11 = vmul.f32 0.2, %v262_v62  ;;  %v264_v12 = vadd.f32 %v509_v1, %v225_v63 }
  0x20   : > { %v321_v13 = vmax.f32 %v257_v56, %v289_v5  ;;  %v322_v14 = vmax.f32 %v258_v57, %v290_v6  ;;  %v323_v15 = vmax.f32 %v259_v58, %v291_v7  ;;  %v295_v16 = vmul.f32 0.2, %v263_v8  ;;  %v198_v57 = vld [vmem:[%s504_s19 + $0xd8] sm:$0xff]  ;;  %v199_v58 = vld [vmem:[%s504_s19 + $0xe0] sm:$0xff]  ;;  %v200_v59 = vld [vmem:[%s504_s19 + $0xe8] sm:$0xff] }
  0x21   : > { %v324_v20 = vmax.f32 %v260_v60, %v292_v9  ;;  %v325_v21 = vmax.f32 %v261_v61, %v293_v10  ;;  %v326_v22 = vmax.f32 %v262_v62, %v294_v11  ;;  %v296_v23 = vmul.f32 0.2, %v264_v12  ;;  %v202_v7 = vld [vmem:[%s504_s19 + $0xf8] sm:$0xff] }
  0x22   : > { %353 = vst [vmem:[%s542_s24 + $0x40] sm:$0xff] %v321_v13  ;;  %354 = vst [vmem:[%s542_s24 + $0x48] sm:$0xff] %v322_v14  ;;  %v327_v25 = vmax.f32 %v263_v8, %v295_v16  ;;  %v226_v26 = vmul.f32 %v497_v0, %v187_v2  ;;  %v227_v27 = vmul.f32 %v497_v0, %v188_v3  ;;  %v201_v2 = vld [vmem:[%s504_s19 + $0xf0] sm:$0xff] }
  0x23   : > { %355 = vst [vmem:[%s542_s24 + $0x50] sm:$0xff] %v323_v15  ;;  %v228_v28 = vmul.f32 %v497_v0, %v189_v4  ;;  %356 = vst [vmem:[%s542_s24 + $0x58] sm:$0xff] %v324_v20  ;;  %v328_v30 = vmax.f32 %v264_v12, %v296_v23  ;;  %v229_v31 = vmul.f32 %v497_v0, %v190_v17 }
  0x24   : > { %357 = vst [vmem:[%s542_s24 + $0x60] sm:$0xff] %v325_v21  ;;  %358 = vst [vmem:[%s542_s24 + $0x68] sm:$0xff] %v326_v22  ;;  %v230_v32 = vmul.f32 %v497_v0, %v191_v18  ;;  %v231_v33 = vmul.f32 %v497_v0, %v192_v19  ;;  %v265_v34 = vadd.f32 %v509_v1, %v226_v26 }
  0x25   : > { %359 = vst [vmem:[%s542_s24 + $0x70] sm:$0xff] %v327_v25  ;;  %v266_v35 = vadd.f32 %v509_v1, %v227_v27  ;;  %v267_v36 = vadd.f32 %v509_v1, %v228_v28  ;;  %v232_v37 = vmul.f32 %v497_v0, %v193_v24  ;;  %360 = vst [vmem:[%s542_s24 + $0x78] sm:$0xff] %v328_v30 }
  0x26   : > { %v268_v38 = vadd.f32 %v509_v1, %v229_v31  ;;  %v269_v39 = vadd.f32 %v509_v1, %v230_v32  ;;  %v270_v40 = vadd.f32 %v509_v1, %v231_v33  ;;  %v233_v41 = vmul.f32 %v497_v0, %v194_v29 }
  0x27   : > { %v297_v45 = vmul.f32 0.2, %v265_v34  ;;  %v298_v46 = vmul.f32 0.2, %v266_v35  ;;  %v299_v47 = vmul.f32 0.2, %v267_v36  ;;  %v271_v48 = vadd.f32 %v509_v1, %v232_v37 }
  0x28   : > { %v300_v49 = vmul.f32 0.2, %v268_v38  ;;  %v301_v50 = vmul.f32 0.2, %v269_v39  ;;  %v302_v51 = vmul.f32 0.2, %v270_v40  ;;  %v272_v52 = vadd.f32 %v509_v1, %v233_v41 }
  0x29   : > { %v329_v53 = vmax.f32 %v265_v34, %v297_v45  ;;  %v330_v54 = vmax.f32 %v266_v35, %v298_v46  ;;  %v331_v55 = vmax.f32 %v267_v36, %v299_v47  ;;  %v303_v56 = vmul.f32 0.2, %v271_v48 }
  0x2a   : > { %v332_v60 = vmax.f32 %v268_v38, %v300_v49  ;;  %v333_v61 = vmax.f32 %v269_v39, %v301_v50  ;;  %v334_v62 = vmax.f32 %v270_v40, %v302_v51  ;;  %v304_v63 = vmul.f32 0.2, %v272_v52 }
  0x2b   : > { %361 = vst [vmem:[%s542_s24 + $0x80] sm:$0xff] %v329_v53  ;;  %362 = vst [vmem:[%s542_s24 + $0x88] sm:$0xff] %v330_v54  ;;  %v335_v3 = vmax.f32 %v271_v48, %v303_v56  ;;  %v234_v4 = vmul.f32 %v497_v0, %v195_v42  ;;  %v235_v5 = vmul.f32 %v497_v0, %v196_v43 }
  0x2c   : > { %363 = vst [vmem:[%s542_s24 + $0x90] sm:$0xff] %v331_v55  ;;  %v236_v6 = vmul.f32 %v497_v0, %v197_v44  ;;  %364 = vst [vmem:[%s542_s24 + $0x98] sm:$0xff] %v332_v60  ;;  %v336_v8 = vmax.f32 %v272_v52, %v304_v63  ;;  %v237_v9 = vmul.f32 %v497_v0, %v198_v57 }
  0x2d   : > { %365 = vst [vmem:[%s542_s24 + $0xa0] sm:$0xff] %v333_v61  ;;  %366 = vst [vmem:[%s542_s24 + $0xa8] sm:$0xff] %v334_v62  ;;  %v238_v10 = vmul.f32 %v497_v0, %v199_v58  ;;  %v239_v11 = vmul.f32 %v497_v0, %v200_v59  ;;  %v273_v12 = vadd.f32 %v509_v1, %v234_v4 }
  0x2e   : > { %367 = vst [vmem:[%s542_s24 + $0xb0] sm:$0xff] %v335_v3  ;;  %v274_v13 = vadd.f32 %v509_v1, %v235_v5  ;;  %v275_v14 = vadd.f32 %v509_v1, %v236_v6  ;;  %v240_v15 = vmul.f32 %v497_v0, %v201_v2  ;;  %368 = vst [vmem:[%s542_s24 + $0xb8] sm:$0xff] %v336_v8 }
  0x2f   : > { %v276_v16 = vadd.f32 %v509_v1, %v237_v9  ;;  %v277_v17 = vadd.f32 %v509_v1, %v238_v10  ;;  %v278_v18 = vadd.f32 %v509_v1, %v239_v11  ;;  %v241_v19 = vmul.f32 %v497_v0, %v202_v7 }
  0x30   : > { %v305_v20 = vmul.f32 0.2, %v273_v12  ;;  %v306_v21 = vmul.f32 0.2, %v274_v13  ;;  %v307_v22 = vmul.f32 0.2, %v275_v14  ;;  %v279_v23 = vadd.f32 %v509_v1, %v240_v15 }
  0x31   : > { %v308_v24 = vmul.f32 0.2, %v276_v16  ;;  %v309_v25 = vmul.f32 0.2, %v277_v17  ;;  %v310_v26 = vmul.f32 0.2, %v278_v18  ;;  %v280_v27 = vadd.f32 %v509_v1, %v241_v19 }
  0x32   : > { %v337_v28 = vmax.f32 %v273_v12, %v305_v20  ;;  %v338_v29 = vmax.f32 %v274_v13, %v306_v21  ;;  %v339_v0 = vmax.f32 %v275_v14, %v307_v22  ;;  %v311_v30 = vmul.f32 0.2, %v279_v23 }
  0x33   : > { %v340_v31 = vmax.f32 %v276_v16, %v308_v24  ;;  %v341_v32 = vmax.f32 %v277_v17, %v309_v25  ;;  %v342_v33 = vmax.f32 %v278_v18, %v310_v26  ;;  %v312_v34 = vmul.f32 0.2, %v280_v27 }
  0x34   : > { %369 = vst [vmem:[%s542_s24 + $0xc0] sm:$0xff] %v337_v28  ;;  %370 = vst [vmem:[%s542_s24 + $0xc8] sm:$0xff] %v338_v29  ;;  %v343_v35 = vmax.f32 %v279_v23, %v311_v30 }
  0x35   : > { %371 = vst [vmem:[%s542_s24 + $0xd0] sm:$0xff] %v339_v0  ;;  %372 = vst [vmem:[%s542_s24 + $0xd8] sm:$0xff] %v340_v31  ;;  %v344_v36 = vmax.f32 %v280_v27, %v312_v34 }
  0x36   : > { %373 = vst [vmem:[%s542_s24 + $0xe0] sm:$0xff] %v341_v32  ;;  %374 = vst [vmem:[%s542_s24 + $0xe8] sm:$0xff] %v342_v33 }
  0x37   : > { %375 = vst [vmem:[%s542_s24 + $0xf0] sm:$0xff] %v343_v35  ;;  %376 = vst [vmem:[%s542_s24 + $0xf8] sm:$0xff] %v344_v36 }
  0x38 PF: > { %s13_s12 = sadd.s32 1, %s461_s12  }
  0x39   : > { %p10_p4 = scmp.ge.s32.totalorder %s13_s12, 4  }
  0x3b   :  { %12 = sbr.rel (!%p10_p4) target bundleno = 1 (0x1), region = 62 }

// kernel: discriminator_forward.7
= control target key start
LH: loop header
LB: loop body
LE: loop exit
PB: predicated region body
PF: predicated region fallthrough
CT: control target
= control target key end

     0   :  { %s1789_s24 = smov 0   ;;  %s1791_s25 = smov 0   ;;  %s2068_s0 = inlined_call_operand.vmem [shape: f32[2,17,17,8], index: 0, kind: input, shape index: {}]   ;;  %s2069_s1 = inlined_call_operand.vmem [shape: f32[2,17,17,8], index: 1, kind: input, shape index: {}]   ;;  %s2070_s2 = inlined_call_operand.vmem [shape: f32[2,17,17,8], index: 2, kind: input, shape index: {}]   ;;  %s2071_s3 = inlined_call_operand.vmem [shape: f32[2,17,17,8], index: 3, kind: input, shape index: {}]   ;;  %s2072_s4 = inlined_call_operand.vmem [shape: bf16[16,8,128], index: 4, kind: input, shape index: {}]   ;;  %s2073_s5 = inlined_call_operand.vmem [shape: f32[2,16,16,128], index: 5, kind: output, shape index: {0}]   ;;  %s2074_s6 = inlined_call_operand.vmem [shape: f32[1,128], index: 6, kind: output, shape index: {1}]   ;;  %s2075_s7 = inlined_call_operand.vmem [shape: f32[1,128], index: 7, kind: output, shape index: {2}]  }
   0x1   :  { %s1793_s26 = smov 0   ;;  %s1795_s27 = smov 0  }
   0x2   :  { %s1797_s28 = smov 0  }
   0x3 LB: > { %s27_s29 = sadd.s32 1, %s1736_s26  ;;  %s30_s30 = sadd.s32 1, %s1740_s27  ;;  %s1744_s28 = sphi %s1797_s28, %s18_s28   ;;  %s1740_s27 = sphi %s1795_s27, %s2080_s27   ;;  %s1736_s26 = sphi %s1793_s26, %s2079_s26   ;;  %s1732_s25 = sphi %s1791_s25, %s2078_s25   ;;  %s1728_s24 = sphi %s1789_s24, %s2077_s24  }
   0x4   : > { %p28_p0 = scmp.ge.s32.totalorder %s27_s29, 16  ;;  %p1419_p1 = scmp.ge.s32.totalorder %s1744_s28, 1 }
   0x5   : > { %p276_p2 = scmp.lt.s32.totalorder %s1744_s28, 33 }
   0x6   : > { %s2082_s29 = smov (%p28_p0, %s27_s29), 0  ;;  %s2084_s30 = smov (!%p28_p0, %s30_s30), %s1740_s27 }
   0x7   : > { %p277_p3 = pnand %p1419_p1, %p276_p2  ;;  %p32_p4 = scmp.ge.s32.totalorder %s2084_s30, 2 }
   0x8   : > { %v1427_v0 = vld [vmem:[%s2072_s4 + $0x4] sm:$0xf] (!%p277_p3)  ;;  %vm373_vm0 = vcmask (!%p277_p3), 1043456   ;;  %v1444_v1 = vld [vmem:[%s2072_s4 + $0x20] sm:$0xf] (!%p277_p3)  ;;  %v1746_v2 = vmov (!%p277_p3), 0.0  }
   0x9   : > { %s2086_s30 = smov (%p32_p4, %s2084_s30), 0  ;;  %280 = sbr.rel (%p277_p3) target bundleno = 346 (0x15a), region = 40 }
   0xa   : > { %1508 = vmatprep.subr.bf16.mxu1 (!%p277_p3), %v1746_v2  ;;  %1556 = vmatprep.subr.bf16.mxu0 (!%p277_p3), %v1746_v2  ;;  %v375_v3 = vsel (!%p277_p3), %vm373_vm0, %v1427_v0, 0  ;;  %v803_v4 = vsel (!%p277_p3), %vm373_vm0, %v1444_v1, 0  ;;  %p327_p5 = scmp.lt.s32.totalorder (!%p277_p3), %s1732_s25, 1  ;;  %vm1747_vm1 = vmmov (!%p277_p3), 0   ;;  %s1844_s13 = smul.u32 (!%p277_p3), 24, %s1728_s24  ;;  %vm369_vm2 = vcmask (!%p277_p3), 64512  }
   0xb   : > { %1509 = vmatpush3.bf16.msra.mxu1 (!%p277_p3), %v375_v3  ;;  %1557 = vmatpush3.bf16.msra.mxu0 (!%p277_p3), %v803_v4  ;;  %v362_v5 = vld [vmem:[%s2072_s4] sm:$0xf] (!%p277_p3)  ;;  %v1448_v6 = vld [vmem:[%s2072_s4 + $0x24] sm:$0xf] (!%p277_p3)  ;;  %v1430_v19 = vld [vmem:[%s2072_s4 + $0x8] sm:$0xf] (!%p277_p3) }
   0xc   : > { %1510 = vmatprep.mubr.msk.bf16.mxu1 (!%p277_p3), %vm1747_vm1, %v1746_v2  ;;  %1514 = vmatprep.subr.bf16.mxu1 (!%p277_p3), %v1746_v2  ;;  %v422_v11 = vsel (!%p277_p3), %vm373_vm0, %v362_v5, 0  ;;  %v858_v14 = vsel (!%p277_p3), %vm373_vm0, %v1448_v6, 0  ;;  %v1452_v21 = vld [vmem:[%s2072_s4 + $0x28] sm:$0xf] (!%p277_p3)  ;;  %v474_v23 = vsel (!%p277_p3), %vm373_vm0, %v1430_v19, 0  ;;  %p1231_p6 = scmp.eq.s32.totalorder (!%p277_p3), %s1732_s25, 0 }
   0xd   : > { %1558 = vmatprep.mubr.msk.bf16.mxu0 (!%p277_p3), %vm1747_vm1, %v1746_v2  ;;  %1562 = vmatprep.subr.bf16.mxu0 (!%p277_p3), %v1746_v2  ;;  %v912_v24 = vsel (!%p277_p3), %vm373_vm0, %v1452_v21, 0  ;;  %v1432_v29 = vld [vmem:[%s2072_s4 + $0xc] sm:$0xf] (!%p277_p3)  ;;  %v1434_v39 = vld [vmem:[%s2072_s4 + $0x10] sm:$0xf] (!%p277_p3)  ;;  %p1232_p7 = scmp.eq.s32.totalorder (!%p277_p3), %s1728_s24, 0 }
   0xe   : > { %v1456_v31 = vld [vmem:[%s2072_s4 + $0x2c] sm:$0xf] (!%p277_p3)  ;;  %v528_v33 = vsel (!%p277_p3), %vm373_vm0, %v1432_v29, 0  ;;  %v1460_v41 = vld [vmem:[%s2072_s4 + $0x30] sm:$0xf] (!%p277_p3)  ;;  %v583_v43 = vsel (!%p277_p3), %vm373_vm0, %v1434_v39, 0 }
   0xf   : > { %v966_v34 = vsel (!%p277_p3), %vm373_vm0, %v1456_v31, 0  ;;  %v1021_v44 = vsel (!%p277_p3), %vm373_vm0, %v1460_v41, 0  ;;  %v1436_v49 = vld [vmem:[%s2072_s4 + $0x14] sm:$0xf] (!%p277_p3)  ;;  %v1438_v59 = vld [vmem:[%s2072_s4 + $0x18] sm:$0xf] (!%p277_p3)  ;;  %p2023_p8 = pnand (!%p277_p3), %p1232_p7, %p1231_p6 }
  0x10   : > { %s1838_s12 = scalar_select %p327_p5, %s1732_s25, 1  ;;  %v1464_v51 = vld [vmem:[%s2072_s4 + $0x34] sm:$0xf]  ;;  %v638_v53 = vsel %vm373_vm0, %v1436_v49, 0  ;;  %v1468_v61 = vld [vmem:[%s2072_s4 + $0x38] sm:$0xf] }
  0x11   : > { %v1076_v54 = vsel %vm373_vm0, %v1464_v51, 0  ;;  %v692_v63 = vsel %vm373_vm0, %v1438_v59, 0  ;;  %v1130_v0 = vsel %vm373_vm0, %v1468_v61, 0  ;;  %v1440_v6 = vld [vmem:[%s2072_s4 + $0x1c] sm:$0xf]  ;;  %p349_p9 = scmp.lt.s32.totalorder %s1728_s24, 15 }
  0x12   : > { %s1847_s14 = smul.u32 408, %s1838_s12  ;;  %s1425_s20 = sshll.u32 %s1838_s12, 5 }
  0x13   : > { %s2088_s24 = smov (!%p349_p9, %s1728_s24), 15 }
  0x14   : > { %s336_s17 = scalar_lea.vmem %s2069_s1, %s1847_s14  ;;  %s331_s22 = scalar_lea.vmem %s2068_s0, %s1847_s14 }
  0x15   : > { %s1861_s23 = scalar_lea.vmem %s336_s17, %s1844_s13  ;;  %s1864_s8 = scalar_lea.vmem %s331_s22, %s1844_s13 }
  0x16   : > { %v364_v7 = vld [vmem:[%s1861_s23] sm:$0xff]  ;;  %v365_v8 = vld [vmem:[%s1861_s23 + $0x8] sm:$0xff]  ;;  %v1442_v9 = vld [vmem:[%s1864_s8 + $0x18] sm:$0xff]  ;;  %s341_s16 = scalar_lea.vmem %s2070_s2, %s1847_s14  ;;  %s1424_s19 = sshll.u32 %s2088_s24, 1 }
  0x17   : > { %v366_v10 = vpack.c.bf16 %v365_v8, %v364_v7  ;;  %v1443_v12 = vld [vmem:[%s1864_s8 + $0x20] sm:$0xff]  ;;  %v360_v16 = vld [vmem:[%s1864_s8 + $0x8] sm:$0xff]  ;;  %v1446_v17 = vld [vmem:[%s1861_s23 + $0x18] sm:$0xff]  ;;  %s353_s21 = sadd.s32 %s1425_s20, %s1424_s19 }
  0x18   : > { %v796_v13 = vpack.c.bf16 %v1443_v12, %v1442_v9  ;;  %v359_v15 = vld [vmem:[%s1864_s8] sm:$0xff]  ;;  %v466_v26 = vld [vmem:[%s1864_s8 + $0x9] sm:$0xff]  ;;  %v1472_v8 = vld [vmem:[%s2072_s4 + $0x3c] sm:$0xf]  ;;  %s1426_s22 = sshll.u32 %s353_s21, 3 }
  0x19   : > { %1511 = vmatmul.mubr.msk.bf16.vlgmr.msra.gmra.mrb[0].mxu1 %vm369_vm2, %v366_v10  ;;  %v1447_v18 = vld [vmem:[%s1861_s23 + $0x20] sm:$0xff]  ;;  %v361_v20 = vpack.c.bf16 %v360_v16, %v359_v15  ;;  %v520_v36 = vld [vmem:[%s1861_s23 + $0x9] sm:$0xff]  ;;  %v746_v10 = vsel %vm373_vm0, %v1440_v6, 0 }
  0x1a   : > { %1515 = vmatpush3.bf16.msra.mxu1 %v422_v11  ;;  %1559 = vmatmul.mubr.msk.bf16.vlgmr.msra.gmra.mrb[0].mxu0 %vm369_vm2, %v796_v13  ;;  %v851_v22 = vpack.c.bf16 %v1447_v18, %v1446_v17  ;;  %v465_v25 = vld [vmem:[%s1864_s8 + $0x1] sm:$0xff]  ;;  %v1450_v27 = vld [vmem:[%s1864_s8 + $0x19] sm:$0xff]  ;;  %v1184_v11 = vsel %vm373_vm0, %v1472_v8, 0 }
  0x1b   : > { %1563 = vmatpush3.bf16.msra.mxu0 %v858_v14  ;;  %1516 = vmatprep.mubr.msk.bf16.mxu1 %vm1747_vm1, %v1746_v2  ;;  %v1451_v28 = vld [vmem:[%s1864_s8 + $0x21] sm:$0xff]  ;;  %v467_v30 = vpack.c.bf16 %v466_v26, %v465_v25  ;;  %v1454_v37 = vld [vmem:[%s1861_s23 + $0x19] sm:$0xff]  ;;  %s346_s8 = scalar_lea.vmem %s2071_s3, %s1847_s14  ;;  %s355_s14 = scalar_lea.vmem %s2073_s5, %s1426_s22 }
  0x1c   : > { %1520 = vmatprep.subr.bf16.mxu1 %v1746_v2  ;;  %1564 = vmatprep.mubr.msk.bf16.mxu0 %vm1747_vm1, %v1746_v2  ;;  %v905_v32 = vpack.c.bf16 %v1451_v28, %v1450_v27  ;;  %v519_v35 = vld [vmem:[%s1861_s23 + $0x1] sm:$0xff]  ;;  %s1971_s9 = scalar_lea.vmem %s346_s8, %s1844_s13  ;;  %v1748_v27 = vmov (!%p2023_p8), 0.0  }
  0x1d   : > { %1568 = vmatprep.subr.bf16.mxu0 %v1746_v2  ;;  %v1455_v38 = vld [vmem:[%s1861_s23 + $0x21] sm:$0xff]  ;;  %v521_v40 = vpack.c.bf16 %v520_v36, %v519_v35  ;;  %s1944_s23 = scalar_lea.vmem %s341_s16, %s1844_s13  ;;  %v1462_v57 = vld [vmem:[%s1971_s9 + $0x18] sm:$0xff]  ;;  %v738_v13 = vld [vmem:[%s1971_s9 + $0x9] sm:$0xff]  ;;  %1237 = vst [vmem:[%s2074_s6] sm:$0x1] (!%p2023_p8), %v1748_v27 }
  0x1e   : > { %v959_v42 = vpack.c.bf16 %v1455_v38, %v1454_v37  ;;  %v574_v45 = vld [vmem:[%s1944_s23] sm:$0xff]  ;;  %v575_v46 = vld [vmem:[%s1944_s23 + $0x8] sm:$0xff]  ;;  %v1458_v47 = vld [vmem:[%s1944_s23 + $0x18] sm:$0xff]  ;;  %1238 = vst [vmem:[%s2075_s7] sm:$0x1] (!%p2023_p8), %v1748_v27 }
  0x1f   : > { %v1459_v48 = vld [vmem:[%s1944_s23 + $0x20] sm:$0xff]  ;;  %v576_v50 = vpack.c.bf16 %v575_v46, %v574_v45  ;;  %v630_v56 = vld [vmem:[%s1971_s9 + $0x8] sm:$0xff] }
  0x20   : > { %v1014_v52 = vpack.c.bf16 %v1459_v48, %v1458_v47  ;;  %v629_v55 = vld [vmem:[%s1971_s9] sm:$0xff]  ;;  %v684_v3 = vld [vmem:[%s1944_s23 + $0x9] sm:$0xff] }
  0x21   : > { %v1463_v58 = vld [vmem:[%s1971_s9 + $0x20] sm:$0xff]  ;;  %v631_v60 = vpack.c.bf16 %v630_v56, %v629_v55 }
  0x22   : > { %v1069_v62 = vpack.c.bf16 %v1463_v58, %v1462_v57  ;;  %v683_v1 = vld [vmem:[%s1944_s23 + $0x1] sm:$0xff]  ;;  %v1466_v4 = vld [vmem:[%s1944_s23 + $0x19] sm:$0xff] }
  0x23   : > { %v1467_v5 = vld [vmem:[%s1944_s23 + $0x21] sm:$0xff]  ;;  %v685_v7 = vpack.c.bf16 %v684_v3, %v683_v1  ;;  %v1470_v14 = vld [vmem:[%s1971_s9 + $0x19] sm:$0xff] }
  0x24   : > { %v1123_v9 = vpack.c.bf16 %v1467_v5, %v1466_v4  ;;  %v737_v12 = vld [vmem:[%s1971_s9 + $0x1] sm:$0xff] }
  0x25   : > { %1517 = vmatmul.mubr.msk.bf16.vlgmr.msra.gmra.mrb[0].mxu1 %vm369_vm2, %v361_v20  ;;  %v1471_v15 = vld [vmem:[%s1971_s9 + $0x21] sm:$0xff]  ;;  %v739_v16 = vpack.c.bf16 %v738_v13, %v737_v12 }
  0x26   : > { %1521 = vmatpush3.bf16.msra.mxu1 %v474_v23  ;;  %1565 = vmatmul.mubr.msk.bf16.vlgmr.msra.gmra.mrb[0].mxu0 %vm369_vm2, %v851_v22  ;;  %v1177_v17 = vpack.c.bf16 %v1471_v15, %v1470_v14 }
  0x27   : > { %1569 = vmatpush3.bf16.msra.mxu0 %v912_v24  ;;  %1522 = vmatprep.mubr.msk.bf16.mxu1 %vm1747_vm1, %v1746_v2 }
  0x28   : > { %1526 = vmatprep.subr.bf16.mxu1 %v1746_v2  ;;  %1570 = vmatprep.mubr.msk.bf16.mxu0 %vm1747_vm1, %v1746_v2 }
  0x29   : > { %1574 = vmatprep.subr.bf16.mxu0 %v1746_v2 }
  0x31   : > { %1523 = vmatmul.mubr.msk.bf16.vlgmr.msra.gmra.mrb[0].mxu1 %vm369_vm2, %v467_v30 }
  0x32   : > { %1527 = vmatpush3.bf16.msra.mxu1 %v528_v33  ;;  %1571 = vmatmul.mubr.msk.bf16.vlgmr.msra.gmra.mrb[0].mxu0 %vm369_vm2, %v905_v32 }
  0x33   : > { %1575 = vmatpush3.bf16.msra.mxu0 %v966_v34  ;;  %1528 = vmatprep.mubr.msk.bf16.mxu1 %vm1747_vm1, %v1746_v2 }
  0x34   : > { %1532 = vmatprep.subr.bf16.mxu1 %v1746_v2  ;;  %1576 = vmatprep.mubr.msk.bf16.mxu0 %vm1747_vm1, %v1746_v2 }
  0x35   : > { %1580 = vmatprep.subr.bf16.mxu0 %v1746_v2 }
  0x3d   : > { %1529 = vmatmul.mubr.msk.bf16.vlgmr.msra.gmra.mrb[0].mxu1 %vm369_vm2, %v521_v40 }
  0x3e   : > { %1533 = vmatpush3.bf16.msra.mxu1 %v583_v43  ;;  %1577 = vmatmul.mubr.msk.bf16.vlgmr.msra.gmra.mrb[0].mxu0 %vm369_vm2, %v959_v42 }
  0x3f   : > { %1581 = vmatpush3.bf16.msra.mxu0 %v1021_v44  ;;  %1534 = vmatprep.mubr.msk.bf16.mxu1 %vm1747_vm1, %v1746_v2 }
  0x40   : > { %1538 = vmatprep.subr.bf16.mxu1 %v1746_v2  ;;  %1582 = vmatprep.mubr.msk.bf16.mxu0 %vm1747_vm1, %v1746_v2 }
  0x41   : > { %1586 = vmatprep.subr.bf16.mxu0 %v1746_v2 }
  0x49   : > { %1535 = vmatmul.mubr.msk.bf16.vlgmr.msra.gmra.mrb[0].mxu1 %vm369_vm2, %v576_v50 }
  0x4a   : > { %1539 = vmatpush3.bf16.msra.mxu1 %v638_v53  ;;  %1583 = vmatmul.mubr.msk.bf16.vlgmr.msra.gmra.mrb[0].mxu0 %vm369_vm2, %v1014_v52 }
  0x4b   : > { %1587 = vmatpush3.bf16.msra.mxu0 %v1076_v54  ;;  %1540 = vmatprep.mubr.msk.bf16.mxu1 %vm1747_vm1, %v1746_v2 }
  0x4c   : > { %1544 = vmatprep.subr.bf16.mxu1 %v1746_v2  ;;  %1588 = vmatprep.mubr.msk.bf16.mxu0 %vm1747_vm1, %v1746_v2 }
  0x4d   : > { %1592 = vmatprep.subr.bf16.mxu0 %v1746_v2 }
  0x55   : > { %1541 = vmatmul.mubr.msk.bf16.vlgmr.msra.gmra.mrb[0].mxu1 %vm369_vm2, %v631_v60 }
  0x56   : > { %1545 = vmatpush3.bf16.msra.mxu1 %v692_v63  ;;  %1589 = vmatmul.mubr.msk.bf16.vlgmr.msra.gmra.mrb[0].mxu0 %vm369_vm2, %v1069_v62 }
  0x57   : > { %1593 = vmatpush3.bf16.msra.mxu0 %v1130_v0  ;;  %1546 = vmatprep.mubr.msk.bf16.mxu1 %vm1747_vm1, %v1746_v2 }
  0x58   : > { %1550 = vmatprep.subr.bf16.mxu1 %v1746_v2  ;;  %1594 = vmatprep.mubr.msk.bf16.mxu0 %vm1747_vm1, %v1746_v2 }
  0x59   : > { %1598 = vmatprep.subr.bf16.mxu0 %v1746_v2 }
  0x61   : > { %1547 = vmatmul.mubr.msk.bf16.vlgmr.msra.gmra.mrb[0].mxu1 %vm369_vm2, %v685_v7 }
  0x62   : > { %1551 = vmatpush3.bf16.msra.mxu1 %v746_v10  ;;  %1595 = vmatmul.mubr.msk.bf16.vlgmr.msra.gmra.mrb[0].mxu0 %vm369_vm2, %v1123_v9 }
  0x63   : > { %1599 = vmatpush3.bf16.msra.mxu0 %v1184_v11  ;;  %1552 = vmatprep.mubr.msk.bf16.mxu1 %vm1747_vm1, %v1746_v2 }
  0x64   : > { %1600 = vmatprep.mubr.msk.bf16.mxu0 %vm1747_vm1, %v1746_v2 }
  0x6d   : > { %1553 = vmatmul.mubr.msk.bf16.vlgmr.msra.gmra.mrb[0].mxu1 %vm369_vm2, %v739_v16 }
  0x6e   : > { %1601 = vmatmul.mubr.msk.bf16.vlgmr.msra.gmra.mrb[0].mxu0 %vm369_vm2, %v1177_v17 }
 0x140   : > { %v782_v2 = vpop.f32.mrb[0].mxu1  ;;  %1236 = sbr.rel (%p2023_p8) target bundleno = 327 (0x147), region = 44 }
 0x141   : > { %v1220_v18 = vpop.f32.mrb[0].mxu0  ;;  %v1554_v19 = vpop.f32.mrb[1].mxu1 }
 0x142   : > { %v1604_v20 = vadd.f32 %v1220_v18, %v782_v2  ;;  %v1602_v21 = vpop.f32.mrb[1].mxu0  ;;  %v785_v22 = vpop.f32.mrb[2].mxu1 }
 0x143   : > { %v1223_v23 = vpop.f32.mrb[2].mxu0  ;;  %v1555_v24 = vpop.f32.mrb[3].mxu1 }
 0x144   : > { %1229 = vst [vmem:[%s355_s14] sm:$0xff] %v1604_v20  ;;  %v1605_v25 = vadd.f32 %v1223_v23, %v785_v22  ;;  %v1603_v26 = vpop.f32.mrb[3].mxu0 }
 0x146   : > { %1230 = vst [vmem:[%s355_s14 + $0x8] sm:$0xff] %v1605_v25 }
 0x147 PF: > { %v1240_v28 = vadd.f32 %v1605_v25, %v1604_v20  ;;  %v1250_v29 = vmul.f32 %v1604_v20, %v1604_v20  ;;  %v1251_v30 = vmul.f32 %v1605_v25, %v1605_v25  ;;  %v1239_v41 = vld [vmem:[%s2074_s6] sm:$0x1] }
 0x148   : > { %v1249_v44 = vld [vmem:[%s2075_s7] sm:$0x1] }
 0x149   : > { %v1241_v31 = vrot.slane %v1240_v28, 4  ;;  %v1252_v32 = vadd.f32 %v1251_v30, %v1250_v29 }
 0x14b   : > { %v1242_v33 = vadd.f32 %v1241_v31, %v1240_v28  ;;  %v1253_v34 = vrot.slane %v1252_v32, 4 }
 0x14d   : > { %v1243_v35 = vrot.slane %v1242_v33, 2  ;;  %v1254_v36 = vadd.f32 %v1253_v34, %v1252_v32 }
 0x14f   : > { %v1244_v37 = vadd.f32 %v1243_v35, %v1242_v33  ;;  %v1255_v38 = vrot.slane %v1254_v36, 2 }
 0x151   : > { %v1245_v39 = vrot.slane %v1244_v37, 1  ;;  %v1256_v40 = vadd.f32 %v1255_v38, %v1254_v36 }
 0x153   : > { %v1246_v42 = vadd.f32 %v1245_v39, %v1244_v37  ;;  %v1257_v43 = vrot.slane %v1256_v40, 1 }
 0x155   : > { %v1247_v45 = vadd.f32 %v1246_v42, %v1239_v41  ;;  %v1258_v46 = vadd.f32 %v1257_v43, %v1256_v40 }
 0x157   : > { %1248 = vst [vmem:[%s2074_s6] sm:$0x1] %v1247_v45  ;;  %v1259_v47 = vadd.f32 %v1258_v46, %v1249_v44 }
 0x159   : > { %1260 = vst [vmem:[%s2075_s7] sm:$0x1] %v1259_v47 }
 0x15a PF: > { %s18_s28 = sadd.s32 1, %s1744_s28   ;;  %s2077_s24 = smov %s1736_s26 }
 0x15b   : > { %p15_p10 = scmp.ge.s32.totalorder %s18_s28, 34   ;;  %s2078_s25 = smov %s1740_s27 }
 0x15c   : > { %s2079_s26 = smov %s2082_s29  ;;  %s2080_s27 = smov %s2086_s30 }
 0x15d   :  { %17 = sbr.rel (!%p15_p10) target bundleno = 3 (0x3), region = 122 }

// kernel: discriminator_forward.10
= control target key start
LH: loop header
LB: loop body
LE: loop exit
PB: predicated region body
PF: predicated region fallthrough
CT: control target
= control target key end

     0   :  { %s339_s12 = smov 0   ;;  %s369_s0 = inlined_call_operand.vmem [shape: f32[2,8,8,128], index: 0, kind: input, shape index: {}]   ;;  %s370_s1 = inlined_call_operand.vmem [shape: f32[1,1,128], index: 1, kind: input, shape index: {}]   ;;  %s371_s2 = inlined_call_operand.vmem [shape: f32[1,1,128], index: 2, kind: input, shape index: {}]   ;;  %s372_s3 = inlined_call_operand.vmem [shape: f32[2,8,8,128], index: 3, kind: output, shape index: {}]  }
   0x1 LB: > { %s288_s13 = sadd.s32 4294967295, %s317_s12   ;;  %p292_p0 = scmp.ge.s32.totalorder %s317_s12, 1  ;;  %s317_s12 = sphi %s339_s12, %s13_s12  }
   0x2   : > { %p137_p1 = scmp.lt.s32.totalorder %s317_s12, 3 }
   0x4   : > { %p138_p2 = pnand %p292_p0, %p137_p1 }
   0x5   : > { %p161_p3 = scmp.lt.s32.totalorder (!%p138_p2), %s288_s13, 1  ;;  %v297_v0 = vld [vmem:[%s370_s1] ss:$0 sm:$0xff] (!%p138_p2) }
   0x6   : > { %141 = sbr.rel (%p138_p2) target bundleno = 29 (0x1d), region = 32  ;;  %v298_v1 = vld [vmem:[%s371_s2] ss:$0 sm:$0xff] (!%p138_p2) }
   0xd   : > { %s374_s13 = smov (!%p161_p3, %s288_s13), 1 }
   0xe   : > { %s301_s14 = sshll.u32 %s374_s13, 6 }
   0xf   : > { %s165_s19 = scalar_lea.vmem %s369_s0, %s301_s14  ;;  %s170_s24 = scalar_lea.vmem %s372_s3, %s301_s14 }
  0x10   : > { %v171_v2 = vld [vmem:[%s165_s19] sm:$0xff]  ;;  %v172_v3 = vld [vmem:[%s165_s19 + $0x8] sm:$0xff]  ;;  %v173_v4 = vld [vmem:[%s165_s19 + $0x10] sm:$0xff] }
  0x11   : > { %v186_v5 = vmul.f32 %v297_v0, %v171_v2  ;;  %v187_v6 = vmul.f32 %v297_v0, %v172_v3  ;;  %v188_v7 = vmul.f32 %v297_v0, %v173_v4  ;;  %v174_v8 = vld [vmem:[%s165_s19 + $0x18] sm:$0xff]  ;;  %v175_v9 = vld [vmem:[%s165_s19 + $0x20] sm:$0xff]  ;;  %v176_v10 = vld [vmem:[%s165_s19 + $0x28] sm:$0xff] }
  0x12   : > { %v189_v11 = vmul.f32 %v297_v0, %v174_v8  ;;  %v190_v12 = vmul.f32 %v297_v0, %v175_v9  ;;  %v191_v13 = vmul.f32 %v297_v0, %v176_v10  ;;  %v177_v14 = vld [vmem:[%s165_s19 + $0x30] sm:$0xff]  ;;  %v178_v15 = vld [vmem:[%s165_s19 + $0x38] sm:$0xff] }
  0x13   : > { %v201_v16 = vadd.f32 %v298_v1, %v186_v5  ;;  %v202_v17 = vadd.f32 %v298_v1, %v187_v6  ;;  %v203_v18 = vadd.f32 %v298_v1, %v188_v7  ;;  %v192_v19 = vmul.f32 %v297_v0, %v177_v14 }
  0x14   : > { %v204_v20 = vadd.f32 %v298_v1, %v189_v11  ;;  %v205_v21 = vadd.f32 %v298_v1, %v190_v12  ;;  %v206_v22 = vadd.f32 %v298_v1, %v191_v13  ;;  %v193_v23 = vmul.f32 %v297_v0, %v178_v15 }
  0x15   : > { %v209_v24 = vmul.f32 0.2, %v201_v16  ;;  %v210_v25 = vmul.f32 0.2, %v202_v17  ;;  %v211_v26 = vmul.f32 0.2, %v203_v18  ;;  %v207_v27 = vadd.f32 %v298_v1, %v192_v19 }
  0x16   : > { %v212_v28 = vmul.f32 0.2, %v204_v20  ;;  %v213_v29 = vmul.f32 0.2, %v205_v21  ;;  %v214_v30 = vmul.f32 0.2, %v206_v22  ;;  %v208_v31 = vadd.f32 %v298_v1, %v193_v23 }
  0x17   : > { %v217_v32 = vmax.f32 %v201_v16, %v209_v24  ;;  %v218_v33 = vmax.f32 %v202_v17, %v210_v25  ;;  %v219_v34 = vmax.f32 %v203_v18, %v211_v26  ;;  %v215_v35 = vmul.f32 0.2, %v207_v27 }
  0x18   : > { %v220_v36 = vmax.f32 %v204_v20, %v212_v28  ;;  %v221_v37 = vmax.f32 %v205_v21, %v213_v29  ;;  %v222_v38 = vmax.f32 %v206_v22, %v214_v30  ;;  %v216_v39 = vmul.f32 0.2, %v208_v31 }
  0x19   : > { %225 = vst [vmem:[%s170_s24] sm:$0xff] %v217_v32  ;;  %226 = vst [vmem:[%s170_s24 + $0x8] sm:$0xff] %v218_v33  ;;  %v223_v40 = vmax.f32 %v207_v27, %v215_v35 }
  0x1a   : > { %227 = vst [vmem:[%s170_s24 + $0x10] sm:$0xff] %v219_v34  ;;  %228 = vst [vmem:[%s170_s24 + $0x18] sm:$0xff] %v220_v36  ;;  %v224_v41 = vmax.f32 %v208_v31, %v216_v39 }
  0x1b   : > { %229 = vst [vmem:[%s170_s24 + $0x20] sm:$0xff] %v221_v37  ;;  %230 = vst [vmem:[%s170_s24 + $0x28] sm:$0xff] %v222_v38 }
  0x1c   : > { %231 = vst [vmem:[%s170_s24 + $0x30] sm:$0xff] %v223_v40  ;;  %232 = vst [vmem:[%s170_s24 + $0x38] sm:$0xff] %v224_v41 }
  0x1d PF: > { %s13_s12 = sadd.s32 1, %s317_s12  }
  0x1e   : > { %p10_p4 = scmp.ge.s32.totalorder %s13_s12, 4  }
  0x20   :  { %12 = sbr.rel (!%p10_p4) target bundleno = 1 (0x1), region = 62 }

// kernel: discriminator_forward.12
= control target key start
LH: loop header
LB: loop body
LE: loop exit
PB: predicated region body
PF: predicated region fallthrough
CT: control target
= control target key end

     0   :  { %s315_s12 = smov 0   ;;  %s338_s0 = inlined_call_operand.vmem [shape: f32[2,4,4,128], index: 0, kind: input, shape index: {}]   ;;  %s339_s1 = inlined_call_operand.vmem [shape: f32[1,1,128], index: 1, kind: input, shape index: {}]   ;;  %s340_s2 = inlined_call_operand.vmem [shape: f32[1,1,128], index: 2, kind: input, shape index: {}]   ;;  %s341_s3 = inlined_call_operand.vmem [shape: f32[2,4,4,128], index: 3, kind: output, shape index: {}]  }
   0x1 LB: > { %s264_s13 = sadd.s32 4294967295, %s293_s12   ;;  %p268_p0 = scmp.ge.s32.totalorder %s293_s12, 1  ;;  %s293_s12 = sphi %s315_s12, %s13_s12  }
   0x2   : > { %p137_p1 = scmp.lt.s32.totalorder %s293_s12, 3 }
   0x4   : > { %p138_p2 = pnand %p268_p0, %p137_p1 }
   0x5   : > { %p161_p3 = scmp.lt.s32.totalorder (!%p138_p2), %s264_s13, 1  ;;  %v273_v0 = vld [vmem:[%s339_s1] ss:$0 sm:$0xff] (!%p138_p2) }
   0x6   : > { %141 = sbr.rel (%p138_p2) target bundleno = 27 (0x1b), region = 32  ;;  %v274_v1 = vld [vmem:[%s340_s2] ss:$0 sm:$0xff] (!%p138_p2) }
   0xd   : > { %s343_s13 = smov (!%p161_p3, %s264_s13), 1 }
   0xe   : > { %s277_s14 = sshll.u32 %s343_s13, 4 }
   0xf   : > { %s165_s19 = scalar_lea.vmem %s338_s0, %s277_s14  ;;  %s170_s24 = scalar_lea.vmem %s341_s3, %s277_s14 }
  0x10   : > { %v171_v2 = vld [vmem:[%s165_s19] sm:$0xf]  ;;  %v172_v3 = vld [vmem:[%s165_s19 + $0x4] sm:$0xf]  ;;  %v173_v4 = vld [vmem:[%s165_s19 + $0x8] sm:$0xf] }
  0x11   : > { %v182_v5 = vmul.f32 %v273_v0, %v171_v2  ;;  %v183_v6 = vmul.f32 %v273_v0, %v172_v3  ;;  %v184_v7 = vmul.f32 %v273_v0, %v173_v4  ;;  %v174_v8 = vld [vmem:[%s165_s19 + $0xc] sm:$0xf] }
  0x12   : > { %v185_v9 = vmul.f32 %v273_v0, %v174_v8 }
  0x13   : > { %v193_v10 = vadd.f32 %v274_v1, %v182_v5  ;;  %v194_v11 = vadd.f32 %v274_v1, %v183_v6  ;;  %v195_v12 = vadd.f32 %v274_v1, %v184_v7 }
  0x14   : > { %v196_v13 = vadd.f32 %v274_v1, %v185_v9 }
  0x15   : > { %v197_v14 = vmul.f32 0.2, %v193_v10  ;;  %v198_v15 = vmul.f32 0.2, %v194_v11  ;;  %v199_v16 = vmul.f32 0.2, %v195_v12 }
  0x16   : > { %v200_v17 = vmul.f32 0.2, %v196_v13 }
  0x17   : > { %v201_v18 = vmax.f32 %v193_v10, %v197_v14  ;;  %v202_v19 = vmax.f32 %v194_v11, %v198_v15  ;;  %v203_v20 = vmax.f32 %v195_v12, %v199_v16 }
  0x18   : > { %v204_v21 = vmax.f32 %v196_v13, %v200_v17 }
  0x19   : > { %205 = vst [vmem:[%s170_s24] sm:$0xf] %v201_v18  ;;  %206 = vst [vmem:[%s170_s24 + $0x4] sm:$0xf] %v202_v19 }
  0x1a   : > { %207 = vst [vmem:[%s170_s24 + $0x8] sm:$0xf] %v203_v20  ;;  %208 = vst [vmem:[%s170_s24 + $0xc] sm:$0xf] %v204_v21 }
  0x1b PF: > { %s13_s12 = sadd.s32 1, %s293_s12  }
  0x1c   : > { %p10_p4 = scmp.ge.s32.totalorder %s13_s12, 4  }
  0x1e   :  { %12 = sbr.rel (!%p10_p4) target bundleno = 1 (0x1), region = 62 }

// kernel: discriminator_forward.9
= control target key start
LH: loop header
LB: loop body
LE: loop exit
PB: predicated region body
PF: predicated region fallthrough
CT: control target
= control target key end

     0   :  { %s3437_s24 = smov 0   ;;  %s3439_s25 = smov 0   ;;  %s4116_s0 = inlined_call_operand.vmem [shape: f32[2,9,9,128], index: 0, kind: input, shape index: {}]   ;;  %s4117_s1 = inlined_call_operand.vmem [shape: f32[2,9,9,128], index: 1, kind: input, shape index: {}]   ;;  %s4118_s2 = inlined_call_operand.vmem [shape: f32[2,9,9,128], index: 2, kind: input, shape index: {}]   ;;  %s4119_s3 = inlined_call_operand.vmem [shape: f32[2,9,9,128], index: 3, kind: input, shape index: {}]   ;;  %s4120_s4 = inlined_call_operand.vmem [shape: bf16[16,128,128], index: 4, kind: input, shape index: {}]   ;;  %s4121_s5 = inlined_call_operand.vmem [shape: f32[2,8,8,128], index: 5, kind: output, shape index: {0}]   ;;  %s4122_s6 = inlined_call_operand.vmem [shape: f32[1,128], index: 6, kind: output, shape index: {1}]   ;;  %s4123_s7 = inlined_call_operand.vmem [shape: f32[1,128], index: 7, kind: output, shape index: {2}]  }
   0x1   :  { %s3441_s26 = smov 0   ;;  %s3443_s27 = smov 0  }
   0x2   :  { %s3445_s28 = smov 0  }
   0x3 LB: > { %s27_s29 = sadd.s32 1, %s3384_s26  ;;  %s30_s30 = sadd.s32 1, %s3388_s27  ;;  %s3392_s28 = sphi %s3445_s28, %s18_s28   ;;  %s3388_s27 = sphi %s3443_s27, %s4128_s27   ;;  %s3384_s26 = sphi %s3441_s26, %s4127_s26   ;;  %s3380_s25 = sphi %s3439_s25, %s4126_s25   ;;  %s3376_s24 = sphi %s3437_s24, %s4125_s24  }
   0x4   : > { %p28_p0 = scmp.ge.s32.totalorder %s27_s29, 8  ;;  %p2271_p1 = scmp.ge.s32.totalorder %s3392_s28, 1 }
   0x5   : > { %p276_p2 = scmp.lt.s32.totalorder %s3392_s28, 17 }
   0x6   : > { %s4130_s29 = smov (%p28_p0, %s27_s29), 0  ;;  %s4132_s30 = smov (!%p28_p0, %s30_s30), %s3388_s27 }
   0x7   : > { %p277_p3 = pnand %p2271_p1, %p276_p2  ;;  %p32_p4 = scmp.ge.s32.totalorder %s4132_s30, 2 }
   0x8   : > { %v3226_v0 = vld [vmem:[%s4120_s4 + $0x40] sm:$0xff] (!%p277_p3)   ;;  %v3394_v1 = vmov (!%p277_p3), 0.0   ;;  %v3228_v3 = vld [vmem:[%s4120_s4 + $0x48] sm:$0xff] (!%p277_p3)   ;;  %vm3395_vm0 = vmmov (!%p277_p3), 0   ;;  %v3230_v5 = vld [vmem:[%s4120_s4 + $0x50] sm:$0xff] (!%p277_p3)   ;;  %p326_p5 = scmp.lt.s32.totalorder (!%p277_p3), %s3380_s25, 1 }
   0x9   : > { %s4134_s30 = smov (%p32_p4, %s4132_s30), 0  ;;  %280 = sbr.rel (%p277_p3) target bundleno = 499 (0x1f3), region = 40 }
   0xa   : > { %2805 = vmatprep.subr.bf16.mxu1 (!%p277_p3), %v3394_v1  ;;  %2965 = vmatprep.subr.bf16.mxu0 (!%p277_p3), %v3394_v1  ;;  %v3227_v2 = vld [vmem:[%s4120_s4 + $0x200] sm:$0xff] (!%p277_p3)   ;;  %v3229_v4 = vld [vmem:[%s4120_s4 + $0x208] sm:$0xff] (!%p277_p3)   ;;  %v3231_v6 = vld [vmem:[%s4120_s4 + $0x210] sm:$0xff] (!%p277_p3)   ;;  %s3535_s21 = sshll.u32 (!%p277_p3), %s3376_s24, 4  ;;  %p2092_p6 = scmp.eq.s32.totalorder (!%p277_p3), %s3380_s25, 0 }
   0xb   : > { %2806 = vmatpush3.bf16.msra.mxu1 (!%p277_p3), %v3226_v0  ;;  %2821 = vmatprep.mubr.msk.bf16.mxu1 (!%p277_p3), %vm3395_vm0, %v3394_v1  ;;  %v3232_v7 = vld [vmem:[%s4120_s4 + $0x58] sm:$0xff] (!%p277_p3)   ;;  %v3234_v9 = vld [vmem:[%s4120_s4 + $0x60] sm:$0xff] (!%p277_p3)   ;;  %v3236_v11 = vld [vmem:[%s4120_s4 + $0x68] sm:$0xff] (!%p277_p3)   ;;  %p2093_p7 = scmp.eq.s32.totalorder (!%p277_p3), %s3376_s24, 0  ;;  %p348_p9 = scmp.lt.s32.totalorder (!%p277_p3), %s3376_s24, 7 }
   0xc   : > { %2966 = vmatpush3.bf16.msra.mxu0 (!%p277_p3), %v3227_v2  ;;  %2807 = vmatprep.subr.bf16.mxu1 (!%p277_p3), %v3394_v1  ;;  %v3233_v8 = vld [vmem:[%s4120_s4 + $0x218] sm:$0xff] (!%p277_p3)   ;;  %v3235_v10 = vld [vmem:[%s4120_s4 + $0x220] sm:$0xff] (!%p277_p3)   ;;  %v3237_v12 = vld [vmem:[%s4120_s4 + $0x228] sm:$0xff] (!%p277_p3)  }
   0xd   : > { %2967 = vmatprep.subr.bf16.mxu0 (!%p277_p3), %v3394_v1  ;;  %2981 = vmatprep.mubr.msk.bf16.mxu0 (!%p277_p3), %vm3395_vm0, %v3394_v1  ;;  %v3238_v13 = vld [vmem:[%s4120_s4 + $0x70] sm:$0xff] (!%p277_p3)   ;;  %v3240_v15 = vld [vmem:[%s4120_s4 + $0x78] sm:$0xff] (!%p277_p3)   ;;  %v3242_v20 = vld [vmem:[%s4120_s4] sm:$0xff] (!%p277_p3)   ;;  %p4071_p8 = pnand (!%p277_p3), %p2093_p7, %p2092_p6 }
   0xe   : > { %v3239_v14 = vld [vmem:[%s4120_s4 + $0x230] sm:$0xff] (!%p277_p3)   ;;  %v3241_v16 = vld [vmem:[%s4120_s4 + $0x238] sm:$0xff] (!%p277_p3)   ;;  %v3243_v22 = vld [vmem:[%s4120_s4 + $0x240] sm:$0xff] (!%p277_p3)  }
   0xf   : > { %2808 = vmatpush3.bf16.msra.mxu1 (!%p277_p3), %v3228_v3  ;;  %v3244_v23 = vld [vmem:[%s4120_s4 + $0x8] sm:$0xff] (!%p277_p3)   ;;  %v3246_v25 = vld [vmem:[%s4120_s4 + $0x10] sm:$0xff] (!%p277_p3)   ;;  %v3248_v27 = vld [vmem:[%s4120_s4 + $0x18] sm:$0xff] (!%p277_p3)  }
  0x10   : > { %2968 = vmatpush3.bf16.msra.mxu0 %v3229_v4  ;;  %2809 = vmatprep.subr.bf16.mxu1 %v3394_v1  ;;  %s3509_s8 = scalar_select %p326_p5, %s3380_s25, 1  ;;  %v3245_v24 = vld [vmem:[%s4120_s4 + $0x248] sm:$0xff]   ;;  %v3247_v26 = vld [vmem:[%s4120_s4 + $0x250] sm:$0xff]   ;;  %v3249_v28 = vld [vmem:[%s4120_s4 + $0x258] sm:$0xff]  }
  0x11   : > { %2969 = vmatprep.subr.bf16.mxu0 %v3394_v1  ;;  %v3250_v29 = vld [vmem:[%s4120_s4 + $0x20] sm:$0xff]   ;;  %v3252_v31 = vld [vmem:[%s4120_s4 + $0x28] sm:$0xff]   ;;  %v3254_v33 = vld [vmem:[%s4120_s4 + $0x30] sm:$0xff]   ;;  %s4136_s24 = smov (!%p348_p9, %s3376_s24), 7 }
  0x12   : > { %s3520_s13 = smul.u32 144, %s3509_s8  ;;  %v3251_v30 = vld [vmem:[%s4120_s4 + $0x260] sm:$0xff]   ;;  %v3253_v32 = vld [vmem:[%s4120_s4 + $0x268] sm:$0xff]   ;;  %v3255_v34 = vld [vmem:[%s4120_s4 + $0x270] sm:$0xff]  }
  0x13   : > { %2810 = vmatpush3.bf16.msra.mxu1 %v3230_v5  ;;  %v3256_v35 = vld [vmem:[%s4120_s4 + $0x38] sm:$0xff]   ;;  %v3258_v40 = vld [vmem:[%s4120_s4 + $0x80] sm:$0xff]   ;;  %v3260_v43 = vld [vmem:[%s4120_s4 + $0x88] sm:$0xff]  }
  0x14   : > { %2970 = vmatpush3.bf16.msra.mxu0 %v3231_v6  ;;  %2811 = vmatprep.subr.bf16.mxu1 %v3394_v1  ;;  %s335_s20 = scalar_lea.vmem %s4117_s1, %s3520_s13  ;;  %s330_s9 = scalar_lea.vmem %s4116_s0, %s3520_s13  ;;  %v3257_v36 = vld [vmem:[%s4120_s4 + $0x278] sm:$0xff]   ;;  %v3259_v42 = vld [vmem:[%s4120_s4 + $0x280] sm:$0xff]   ;;  %v3261_v44 = vld [vmem:[%s4120_s4 + $0x288] sm:$0xff]  }
  0x15   : > { %2971 = vmatprep.subr.bf16.mxu0 %v3394_v1  ;;  %s3549_s15 = scalar_lea.vmem %s335_s20, %s3535_s21  ;;  %s3556_s18 = scalar_lea.vmem %s330_s9, %s3535_s21  ;;  %v3262_v45 = vld [vmem:[%s4120_s4 + $0x90] sm:$0xff]   ;;  %v3264_v47 = vld [vmem:[%s4120_s4 + $0x98] sm:$0xff]   ;;  %v3266_v49 = vld [vmem:[%s4120_s4 + $0xa0] sm:$0xff]  }
  0x16   : > { %v376_v17 = vld [vmem:[%s3549_s15] sm:$0xff]  ;;  %v2456_v18 = vld [vmem:[%s3556_s18 + $0x10] sm:$0xff]  ;;  %s340_s11 = scalar_lea.vmem %s4118_s2, %s3520_s13  ;;  %s345_s22 = scalar_lea.vmem %s4119_s3, %s3520_s13  ;;  %v3265_v48 = vld [vmem:[%s4120_s4 + $0x298] sm:$0xff]  }
  0x17   : > { %2812 = vmatpush3.bf16.msra.mxu1 %v3232_v7  ;;  %v377_v19 = vpack.c.bf16 %v376_v17, %v376_v17  ;;  %v1225_v21 = vpack.c.bf16 %v2456_v18, %v2456_v18  ;;  %s3577_s16 = scalar_lea.vmem %s340_s11, %s3535_s21  ;;  %v357_v37 = vld [vmem:[%s3556_s18] sm:$0xff]  ;;  %v2482_v38 = vld [vmem:[%s3549_s15 + $0x10] sm:$0xff]  ;;  %s3654_s9 = scalar_lea.vmem %s345_s22, %s3535_s21  ;;  %v3268_v51 = vld [vmem:[%s4120_s4 + $0xa8] sm:$0xff]  }
  0x18   : > { %2972 = vmatpush3.bf16.msra.mxu0 %v3233_v8  ;;  %2813 = vmatprep.subr.bf16.mxu1 %v3394_v1  ;;  %v358_v39 = vpack.c.bf16 %v357_v37, %v357_v37  ;;  %v1334_v41 = vpack.c.bf16 %v2482_v38, %v2482_v38  ;;  %v3263_v46 = vld [vmem:[%s4120_s4 + $0x290] sm:$0xff]   ;;  %v3267_v50 = vld [vmem:[%s4120_s4 + $0x2a0] sm:$0xff]   ;;  %v3269_v52 = vld [vmem:[%s4120_s4 + $0x2a8] sm:$0xff]  }
  0x19   : > { %2973 = vmatprep.subr.bf16.mxu0 %v3394_v1  ;;  %v3270_v53 = vld [vmem:[%s4120_s4 + $0xb0] sm:$0xff]   ;;  %v3272_v55 = vld [vmem:[%s4120_s4 + $0xb8] sm:$0xff]   ;;  %v571_v57 = vld [vmem:[%s3556_s18 + $0x1] sm:$0xff] }
  0x1a   : > { %v3271_v54 = vld [vmem:[%s4120_s4 + $0x2b0] sm:$0xff]   ;;  %v3273_v56 = vld [vmem:[%s4120_s4 + $0x2b8] sm:$0xff]   ;;  %v572_v59 = vpack.c.bf16 %v571_v57, %v571_v57  ;;  %v3274_v60 = vld [vmem:[%s4120_s4 + $0xc0] sm:$0xff]  }
  0x1b   : > { %2814 = vmatpush3.bf16.msra.mxu1 %v3234_v9  ;;  %v2507_v58 = vld [vmem:[%s3556_s18 + $0x11] sm:$0xff]  ;;  %v3275_v62 = vld [vmem:[%s4120_s4 + $0x2c0] sm:$0xff]   ;;  %v3276_v63 = vld [vmem:[%s4120_s4 + $0xc8] sm:$0xff]   ;;  %s2276_s18 = sshll.u32 %s3509_s8, 3 }
  0x1c   : > { %2974 = vmatpush3.bf16.msra.mxu0 %v3235_v10  ;;  %2815 = vmatprep.subr.bf16.mxu1 %v3394_v1  ;;  %v1442_v61 = vpack.c.bf16 %v2507_v58, %v2507_v58  ;;  %v3277_v0 = vld [vmem:[%s4120_s4 + $0x2c8] sm:$0xff]   ;;  %v3278_v2 = vld [vmem:[%s4120_s4 + $0xd0] sm:$0xff]   ;;  %v3280_v4 = vld [vmem:[%s4120_s4 + $0xd8] sm:$0xff]   ;;  %s351_s23 = sadd.s32 %s2276_s18, %s4136_s24 }
  0x1d   : > { %2975 = vmatprep.subr.bf16.mxu0 %v3394_v1  ;;  %v3279_v3 = vld [vmem:[%s4120_s4 + $0x2d0] sm:$0xff]   ;;  %v3281_v5 = vld [vmem:[%s4120_s4 + $0x2d8] sm:$0xff]   ;;  %v3282_v6 = vld [vmem:[%s4120_s4 + $0xe0] sm:$0xff]   ;;  %s2277_s10 = sshll.u32 %s351_s23, 3 }
  0x1e   : > { %v3283_v7 = vld [vmem:[%s4120_s4 + $0x2e0] sm:$0xff]   ;;  %v3284_v8 = vld [vmem:[%s4120_s4 + $0xe8] sm:$0xff]   ;;  %v3286_v10 = vld [vmem:[%s4120_s4 + $0xf0] sm:$0xff]   ;;  %s353_s13 = scalar_lea.vmem %s4121_s5, %s2277_s10 }
  0x1f   : > { %2816 = vmatpush3.bf16.msra.mxu1 %v3236_v11  ;;  %v3285_v9 = vld [vmem:[%s4120_s4 + $0x2e8] sm:$0xff]   ;;  %v3287_v11 = vld [vmem:[%s4120_s4 + $0x2f0] sm:$0xff]   ;;  %v3290_v17 = vld [vmem:[%s4120_s4 + $0x100] sm:$0xff]  }
  0x20   : > { %2976 = vmatpush3.bf16.msra.mxu0 %v3237_v12  ;;  %2817 = vmatprep.subr.bf16.mxu1 %v3394_v1  ;;  %v3288_v12 = vld [vmem:[%s4120_s4 + $0xf8] sm:$0xff]   ;;  %v3306_v37 = vld [vmem:[%s4120_s4 + $0x140] sm:$0xff]  }
  0x21   : > { %2977 = vmatprep.subr.bf16.mxu0 %v3394_v1  ;;  %v3322_v57 = vld [vmem:[%s4120_s4 + $0x180] sm:$0xff]  }
  0x23   : > { %2818 = vmatpush3.bf16.msra.mxu1 %v3238_v13  ;;  %v3289_v13 = vld [vmem:[%s4120_s4 + $0x2f8] sm:$0xff]  }
  0x24   : > { %2978 = vmatpush3.bf16.msra.mxu0 %v3239_v14  ;;  %2819 = vmatprep.subr.bf16.mxu1 %v3394_v1  ;;  %v679_v14 = vld [vmem:[%s3549_s15 + $0x1] sm:$0xff] }
  0x25   : > { %2979 = vmatprep.subr.bf16.mxu0 %v3394_v1 }
  0x27   : > { %2820 = vmatpush3.bf16.msra.mxu1 %v3240_v15  ;;  %v2532_v15 = vld [vmem:[%s3549_s15 + $0x11] sm:$0xff] }
  0x28   : > { %2980 = vmatpush3.bf16.msra.mxu0 %v3241_v16  ;;  %2825 = vmatprep.subr.bf16.mxu1 %v3394_v1  ;;  %v680_v16 = vpack.c.bf16 %v679_v14, %v679_v14  ;;  %v1550_v18 = vpack.c.bf16 %v2532_v15, %v2532_v15  ;;  %v3338_v14 = vld [vmem:[%s4120_s4 + $0x1c0] sm:$0xff]  }
  0x29   : > { %2985 = vmatprep.subr.bf16.mxu0 %v3394_v1 }
  0x2a   : > { %2822 = vmatmul.mubr.bf16.vlgmr.msra.gmra.mrb[0].mxu1 %v377_v19  ;;  %v3291_v19 = vld [vmem:[%s4120_s4 + $0x300] sm:$0xff]  }
  0x2b   : > { %2826 = vmatpush3.bf16.msra.mxu1 %v3242_v20  ;;  %2982 = vmatmul.mubr.bf16.vlgmr.msra.gmra.mrb[0].mxu0 %v1225_v21  ;;  %v3292_v20 = vld [vmem:[%s4120_s4 + $0x108] sm:$0xff]  }
  0x2c   : > { %2986 = vmatpush3.bf16.msra.mxu0 %v3243_v22  ;;  %2827 = vmatprep.subr.bf16.mxu1 %v3394_v1  ;;  %v3293_v21 = vld [vmem:[%s4120_s4 + $0x308] sm:$0xff]   ;;  %v3294_v22 = vld [vmem:[%s4120_s4 + $0x110] sm:$0xff]  }
  0x2d   : > { %2987 = vmatprep.subr.bf16.mxu0 %v3394_v1  ;;  %2841 = vmatprep.mubr.msk.bf16.mxu1 %vm3395_vm0, %v3394_v1 }
  0x2e   : > { %3001 = vmatprep.mubr.msk.bf16.mxu0 %vm3395_vm0, %v3394_v1 }
  0x2f   : > { %2828 = vmatpush3.bf16.msra.mxu1 %v3244_v23  ;;  %v3295_v23 = vld [vmem:[%s4120_s4 + $0x310] sm:$0xff]  }
  0x30   : > { %2988 = vmatpush3.bf16.msra.mxu0 %v3245_v24  ;;  %2829 = vmatprep.subr.bf16.mxu1 %v3394_v1  ;;  %v3296_v24 = vld [vmem:[%s4120_s4 + $0x118] sm:$0xff]  }
  0x31   : > { %2989 = vmatprep.subr.bf16.mxu0 %v3394_v1 }
  0x33   : > { %2830 = vmatpush3.bf16.msra.mxu1 %v3246_v25  ;;  %v3297_v25 = vld [vmem:[%s4120_s4 + $0x318] sm:$0xff]  }
  0x34   : > { %2990 = vmatpush3.bf16.msra.mxu0 %v3247_v26  ;;  %2831 = vmatprep.subr.bf16.mxu1 %v3394_v1  ;;  %v3298_v26 = vld [vmem:[%s4120_s4 + $0x120] sm:$0xff]  }
  0x35   : > { %2991 = vmatprep.subr.bf16.mxu0 %v3394_v1 }
  0x37   : > { %2832 = vmatpush3.bf16.msra.mxu1 %v3248_v27  ;;  %v3299_v27 = vld [vmem:[%s4120_s4 + $0x320] sm:$0xff]  }
  0x38   : > { %2992 = vmatpush3.bf16.msra.mxu0 %v3249_v28  ;;  %2833 = vmatprep.subr.bf16.mxu1 %v3394_v1  ;;  %v3300_v28 = vld [vmem:[%s4120_s4 + $0x128] sm:$0xff]  }
  0x39   : > { %2993 = vmatprep.subr.bf16.mxu0 %v3394_v1 }
  0x3b   : > { %2834 = vmatpush3.bf16.msra.mxu1 %v3250_v29  ;;  %v3301_v29 = vld [vmem:[%s4120_s4 + $0x328] sm:$0xff]  }
  0x3c   : > { %2994 = vmatpush3.bf16.msra.mxu0 %v3251_v30  ;;  %2835 = vmatprep.subr.bf16.mxu1 %v3394_v1  ;;  %v3302_v30 = vld [vmem:[%s4120_s4 + $0x130] sm:$0xff]  }
  0x3d   : > { %2995 = vmatprep.subr.bf16.mxu0 %v3394_v1 }
  0x3f   : > { %2836 = vmatpush3.bf16.msra.mxu1 %v3252_v31  ;;  %v3303_v31 = vld [vmem:[%s4120_s4 + $0x330] sm:$0xff]  }
  0x40   : > { %2996 = vmatpush3.bf16.msra.mxu0 %v3253_v32  ;;  %2837 = vmatprep.subr.bf16.mxu1 %v3394_v1  ;;  %v3304_v32 = vld [vmem:[%s4120_s4 + $0x138] sm:$0xff]  }
  0x41   : > { %2997 = vmatprep.subr.bf16.mxu0 %v3394_v1 }
  0x43   : > { %2838 = vmatpush3.bf16.msra.mxu1 %v3254_v33  ;;  %v788_v33 = vld [vmem:[%s3577_s16] sm:$0xff] }
  0x44   : > { %2998 = vmatpush3.bf16.msra.mxu0 %v3255_v34  ;;  %2839 = vmatprep.subr.bf16.mxu1 %v3394_v1  ;;  %v3305_v34 = vld [vmem:[%s4120_s4 + $0x338] sm:$0xff]  }
  0x45   : > { %2999 = vmatprep.subr.bf16.mxu0 %v3394_v1 }
  0x47   : > { %2840 = vmatpush3.bf16.msra.mxu1 %v3256_v35  ;;  %v2558_v35 = vld [vmem:[%s3577_s16 + $0x10] sm:$0xff] }
  0x48   : > { %3000 = vmatpush3.bf16.msra.mxu0 %v3257_v36  ;;  %2845 = vmatprep.subr.bf16.mxu1 %v3394_v1  ;;  %v789_v36 = vpack.c.bf16 %v788_v33, %v788_v33  ;;  %v1659_v38 = vpack.c.bf16 %v2558_v35, %v2558_v35 }
  0x49   : > { %3005 = vmatprep.subr.bf16.mxu0 %v3394_v1 }
  0x4a   : > { %2842 = vmatmul.mubr.bf16.vlgmr.msra.gmra.mrb[0].mxu1 %v358_v39  ;;  %v3307_v39 = vld [vmem:[%s4120_s4 + $0x340] sm:$0xff]  }
  0x4b   : > { %2846 = vmatpush3.bf16.msra.mxu1 %v3258_v40  ;;  %3002 = vmatmul.mubr.bf16.vlgmr.msra.gmra.mrb[0].mxu0 %v1334_v41  ;;  %v3308_v40 = vld [vmem:[%s4120_s4 + $0x148] sm:$0xff]  }
  0x4c   : > { %3006 = vmatpush3.bf16.msra.mxu0 %v3259_v42  ;;  %2847 = vmatprep.subr.bf16.mxu1 %v3394_v1  ;;  %v3309_v41 = vld [vmem:[%s4120_s4 + $0x348] sm:$0xff]   ;;  %v3310_v42 = vld [vmem:[%s4120_s4 + $0x150] sm:$0xff]  }
  0x4d   : > { %3007 = vmatprep.subr.bf16.mxu0 %v3394_v1  ;;  %2861 = vmatprep.mubr.msk.bf16.mxu1 %vm3395_vm0, %v3394_v1 }
  0x4e   : > { %3021 = vmatprep.mubr.msk.bf16.mxu0 %vm3395_vm0, %v3394_v1 }
  0x4f   : > { %2848 = vmatpush3.bf16.msra.mxu1 %v3260_v43  ;;  %v3311_v43 = vld [vmem:[%s4120_s4 + $0x350] sm:$0xff]  }
  0x50   : > { %3008 = vmatpush3.bf16.msra.mxu0 %v3261_v44  ;;  %2849 = vmatprep.subr.bf16.mxu1 %v3394_v1  ;;  %v3312_v44 = vld [vmem:[%s4120_s4 + $0x158] sm:$0xff]  }
  0x51   : > { %3009 = vmatprep.subr.bf16.mxu0 %v3394_v1 }
  0x53   : > { %2850 = vmatpush3.bf16.msra.mxu1 %v3262_v45  ;;  %v3313_v45 = vld [vmem:[%s4120_s4 + $0x358] sm:$0xff]  }
  0x54   : > { %3010 = vmatpush3.bf16.msra.mxu0 %v3263_v46  ;;  %2851 = vmatprep.subr.bf16.mxu1 %v3394_v1  ;;  %v3314_v46 = vld [vmem:[%s4120_s4 + $0x160] sm:$0xff]  }
  0x55   : > { %3011 = vmatprep.subr.bf16.mxu0 %v3394_v1 }
  0x57   : > { %2852 = vmatpush3.bf16.msra.mxu1 %v3264_v47  ;;  %v3315_v47 = vld [vmem:[%s4120_s4 + $0x360] sm:$0xff]  }
  0x58   : > { %3012 = vmatpush3.bf16.msra.mxu0 %v3265_v48  ;;  %2853 = vmatprep.subr.bf16.mxu1 %v3394_v1  ;;  %v3316_v48 = vld [vmem:[%s4120_s4 + $0x168] sm:$0xff]  }
  0x59   : > { %3013 = vmatprep.subr.bf16.mxu0 %v3394_v1 }
  0x5b   : > { %2854 = vmatpush3.bf16.msra.mxu1 %v3266_v49  ;;  %v3317_v49 = vld [vmem:[%s4120_s4 + $0x368] sm:$0xff]  }
  0x5c   : > { %3014 = vmatpush3.bf16.msra.mxu0 %v3267_v50  ;;  %2855 = vmatprep.subr.bf16.mxu1 %v3394_v1  ;;  %v3318_v50 = vld [vmem:[%s4120_s4 + $0x170] sm:$0xff]  }
  0x5d   : > { %3015 = vmatprep.subr.bf16.mxu0 %v3394_v1 }
  0x5f   : > { %2856 = vmatpush3.bf16.msra.mxu1 %v3268_v51  ;;  %v3319_v51 = vld [vmem:[%s4120_s4 + $0x370] sm:$0xff]  }
  0x60   : > { %3016 = vmatpush3.bf16.msra.mxu0 %v3269_v52  ;;  %2857 = vmatprep.subr.bf16.mxu1 %v3394_v1  ;;  %v3320_v52 = vld [vmem:[%s4120_s4 + $0x178] sm:$0xff]  }
  0x61   : > { %3017 = vmatprep.subr.bf16.mxu0 %v3394_v1 }
  0x63   : > { %2858 = vmatpush3.bf16.msra.mxu1 %v3270_v53  ;;  %v897_v53 = vld [vmem:[%s3654_s9] sm:$0xff] }
  0x64   : > { %3018 = vmatpush3.bf16.msra.mxu0 %v3271_v54  ;;  %2859 = vmatprep.subr.bf16.mxu1 %v3394_v1  ;;  %v3321_v54 = vld [vmem:[%s4120_s4 + $0x378] sm:$0xff]  }
  0x65   : > { %3019 = vmatprep.subr.bf16.mxu0 %v3394_v1 }
  0x67   : > { %2860 = vmatpush3.bf16.msra.mxu1 %v3272_v55  ;;  %v2584_v55 = vld [vmem:[%s3654_s9 + $0x10] sm:$0xff] }
  0x68   : > { %3020 = vmatpush3.bf16.msra.mxu0 %v3273_v56  ;;  %2865 = vmatprep.subr.bf16.mxu1 %v3394_v1  ;;  %v898_v56 = vpack.c.bf16 %v897_v53, %v897_v53  ;;  %v1768_v58 = vpack.c.bf16 %v2584_v55, %v2584_v55 }
  0x69   : > { %3025 = vmatprep.subr.bf16.mxu0 %v3394_v1 }
  0x6a   : > { %2862 = vmatmul.mubr.bf16.vlgmr.msra.gmra.mrb[0].mxu1 %v572_v59  ;;  %v3323_v59 = vld [vmem:[%s4120_s4 + $0x380] sm:$0xff]  }
  0x6b   : > { %2866 = vmatpush3.bf16.msra.mxu1 %v3274_v60  ;;  %3022 = vmatmul.mubr.bf16.vlgmr.msra.gmra.mrb[0].mxu0 %v1442_v61  ;;  %v3324_v60 = vld [vmem:[%s4120_s4 + $0x188] sm:$0xff]  }
  0x6c   : > { %3026 = vmatpush3.bf16.msra.mxu0 %v3275_v62  ;;  %2867 = vmatprep.subr.bf16.mxu1 %v3394_v1  ;;  %v3325_v61 = vld [vmem:[%s4120_s4 + $0x388] sm:$0xff]   ;;  %v3326_v62 = vld [vmem:[%s4120_s4 + $0x190] sm:$0xff]  }
  0x6d   : > { %3027 = vmatprep.subr.bf16.mxu0 %v3394_v1  ;;  %2881 = vmatprep.mubr.msk.bf16.mxu1 %vm3395_vm0, %v3394_v1 }
  0x6e   : > { %3041 = vmatprep.mubr.msk.bf16.mxu0 %vm3395_vm0, %v3394_v1 }
  0x6f   : > { %2868 = vmatpush3.bf16.msra.mxu1 %v3276_v63  ;;  %v3327_v63 = vld [vmem:[%s4120_s4 + $0x390] sm:$0xff]  }
  0x70   : > { %3028 = vmatpush3.bf16.msra.mxu0 %v3277_v0  ;;  %2869 = vmatprep.subr.bf16.mxu1 %v3394_v1  ;;  %v3328_v0 = vld [vmem:[%s4120_s4 + $0x198] sm:$0xff]  }
  0x71   : > { %3029 = vmatprep.subr.bf16.mxu0 %v3394_v1 }
  0x73   : > { %2870 = vmatpush3.bf16.msra.mxu1 %v3278_v2  ;;  %v3329_v2 = vld [vmem:[%s4120_s4 + $0x398] sm:$0xff]  }
  0x74   : > { %3030 = vmatpush3.bf16.msra.mxu0 %v3279_v3  ;;  %2871 = vmatprep.subr.bf16.mxu1 %v3394_v1  ;;  %v3330_v3 = vld [vmem:[%s4120_s4 + $0x1a0] sm:$0xff]  }
  0x75   : > { %3031 = vmatprep.subr.bf16.mxu0 %v3394_v1 }
  0x77   : > { %2872 = vmatpush3.bf16.msra.mxu1 %v3280_v4  ;;  %v3331_v4 = vld [vmem:[%s4120_s4 + $0x3a0] sm:$0xff]  }
  0x78   : > { %3032 = vmatpush3.bf16.msra.mxu0 %v3281_v5  ;;  %2873 = vmatprep.subr.bf16.mxu1 %v3394_v1  ;;  %v3332_v5 = vld [vmem:[%s4120_s4 + $0x1a8] sm:$0xff]  }
  0x79   : > { %3033 = vmatprep.subr.bf16.mxu0 %v3394_v1 }
  0x7b   : > { %2874 = vmatpush3.bf16.msra.mxu1 %v3282_v6  ;;  %v3333_v6 = vld [vmem:[%s4120_s4 + $0x3a8] sm:$0xff]  }
  0x7c   : > { %3034 = vmatpush3.bf16.msra.mxu0 %v3283_v7  ;;  %2875 = vmatprep.subr.bf16.mxu1 %v3394_v1  ;;  %v3334_v7 = vld [vmem:[%s4120_s4 + $0x1b0] sm:$0xff]  }
  0x7d   : > { %3035 = vmatprep.subr.bf16.mxu0 %v3394_v1 }
  0x7f   : > { %2876 = vmatpush3.bf16.msra.mxu1 %v3284_v8  ;;  %v3335_v8 = vld [vmem:[%s4120_s4 + $0x3b0] sm:$0xff]  }
  0x80   : > { %3036 = vmatpush3.bf16.msra.mxu0 %v3285_v9  ;;  %2877 = vmatprep.subr.bf16.mxu1 %v3394_v1  ;;  %v3336_v9 = vld [vmem:[%s4120_s4 + $0x1b8] sm:$0xff]  }
  0x81   : > { %3037 = vmatprep.subr.bf16.mxu0 %v3394_v1 }
  0x83   : > { %2878 = vmatpush3.bf16.msra.mxu1 %v3286_v10  ;;  %v1005_v10 = vld [vmem:[%s3577_s16 + $0x1] sm:$0xff] }
  0x84   : > { %3038 = vmatpush3.bf16.msra.mxu0 %v3287_v11  ;;  %2879 = vmatprep.subr.bf16.mxu1 %v3394_v1  ;;  %v3337_v11 = vld [vmem:[%s4120_s4 + $0x3b8] sm:$0xff]  }
  0x85   : > { %3039 = vmatprep.subr.bf16.mxu0 %v3394_v1 }
  0x87   : > { %2880 = vmatpush3.bf16.msra.mxu1 %v3288_v12  ;;  %v2609_v12 = vld [vmem:[%s3577_s16 + $0x11] sm:$0xff] }
  0x88   : > { %3040 = vmatpush3.bf16.msra.mxu0 %v3289_v13  ;;  %2885 = vmatprep.subr.bf16.mxu1 %v3394_v1  ;;  %v1006_v13 = vpack.c.bf16 %v1005_v10, %v1005_v10  ;;  %v1876_v15 = vpack.c.bf16 %v2609_v12, %v2609_v12 }
  0x89   : > { %3045 = vmatprep.subr.bf16.mxu0 %v3394_v1 }
  0x8a   : > { %2882 = vmatmul.mubr.bf16.vlgmr.msra.gmra.mrb[0].mxu1 %v680_v16  ;;  %v3339_v16 = vld [vmem:[%s4120_s4 + $0x3c0] sm:$0xff]  }
  0x8b   : > { %2886 = vmatpush3.bf16.msra.mxu1 %v3290_v17  ;;  %3042 = vmatmul.mubr.bf16.vlgmr.msra.gmra.mrb[0].mxu0 %v1550_v18  ;;  %v3340_v17 = vld [vmem:[%s4120_s4 + $0x1c8] sm:$0xff]  }
  0x8c   : > { %3046 = vmatpush3.bf16.msra.mxu0 %v3291_v19  ;;  %2887 = vmatprep.subr.bf16.mxu1 %v3394_v1  ;;  %v3341_v18 = vld [vmem:[%s4120_s4 + $0x3c8] sm:$0xff]   ;;  %v3342_v19 = vld [vmem:[%s4120_s4 + $0x1d0] sm:$0xff]  }
  0x8d   : > { %3047 = vmatprep.subr.bf16.mxu0 %v3394_v1  ;;  %2901 = vmatprep.mubr.msk.bf16.mxu1 %vm3395_vm0, %v3394_v1 }
  0x8e   : > { %3061 = vmatprep.mubr.msk.bf16.mxu0 %vm3395_vm0, %v3394_v1 }
  0x8f   : > { %2888 = vmatpush3.bf16.msra.mxu1 %v3292_v20  ;;  %v3343_v20 = vld [vmem:[%s4120_s4 + $0x3d0] sm:$0xff]  }
  0x90   : > { %3048 = vmatpush3.bf16.msra.mxu0 %v3293_v21  ;;  %2889 = vmatprep.subr.bf16.mxu1 %v3394_v1  ;;  %v3344_v21 = vld [vmem:[%s4120_s4 + $0x1d8] sm:$0xff]  }
  0x91   : > { %3049 = vmatprep.subr.bf16.mxu0 %v3394_v1 }
  0x93   : > { %2890 = vmatpush3.bf16.msra.mxu1 %v3294_v22  ;;  %v3345_v22 = vld [vmem:[%s4120_s4 + $0x3d8] sm:$0xff]  }
  0x94   : > { %3050 = vmatpush3.bf16.msra.mxu0 %v3295_v23  ;;  %2891 = vmatprep.subr.bf16.mxu1 %v3394_v1  ;;  %v3346_v23 = vld [vmem:[%s4120_s4 + $0x1e0] sm:$0xff]  }
  0x95   : > { %3051 = vmatprep.subr.bf16.mxu0 %v3394_v1 }
  0x97   : > { %2892 = vmatpush3.bf16.msra.mxu1 %v3296_v24  ;;  %v3347_v24 = vld [vmem:[%s4120_s4 + $0x3e0] sm:$0xff]  }
  0x98   : > { %3052 = vmatpush3.bf16.msra.mxu0 %v3297_v25  ;;  %2893 = vmatprep.subr.bf16.mxu1 %v3394_v1  ;;  %v3348_v25 = vld [vmem:[%s4120_s4 + $0x1e8] sm:$0xff]  }
  0x99   : > { %3053 = vmatprep.subr.bf16.mxu0 %v3394_v1 }
  0x9b   : > { %2894 = vmatpush3.bf16.msra.mxu1 %v3298_v26  ;;  %v3349_v26 = vld [vmem:[%s4120_s4 + $0x3e8] sm:$0xff]  }
  0x9c   : > { %3054 = vmatpush3.bf16.msra.mxu0 %v3299_v27  ;;  %2895 = vmatprep.subr.bf16.mxu1 %v3394_v1  ;;  %v3350_v27 = vld [vmem:[%s4120_s4 + $0x1f0] sm:$0xff]  }
  0x9d   : > { %3055 = vmatprep.subr.bf16.mxu0 %v3394_v1 }
  0x9f   : > { %2896 = vmatpush3.bf16.msra.mxu1 %v3300_v28  ;;  %v3351_v28 = vld [vmem:[%s4120_s4 + $0x3f0] sm:$0xff]  }
  0xa0   : > { %3056 = vmatpush3.bf16.msra.mxu0 %v3301_v29  ;;  %2897 = vmatprep.subr.bf16.mxu1 %v3394_v1  ;;  %v3352_v29 = vld [vmem:[%s4120_s4 + $0x1f8] sm:$0xff]  }
  0xa1   : > { %3057 = vmatprep.subr.bf16.mxu0 %v3394_v1 }
  0xa3   : > { %2898 = vmatpush3.bf16.msra.mxu1 %v3302_v30  ;;  %v1113_v30 = vld [vmem:[%s3654_s9 + $0x1] sm:$0xff] }
  0xa4   : > { %3058 = vmatpush3.bf16.msra.mxu0 %v3303_v31  ;;  %2899 = vmatprep.subr.bf16.mxu1 %v3394_v1  ;;  %v3353_v31 = vld [vmem:[%s4120_s4 + $0x3f8] sm:$0xff]   ;;  %v1114_v33 = vpack.c.bf16 %v1113_v30, %v1113_v30 }
  0xa5   : > { %3059 = vmatprep.subr.bf16.mxu0 %v3394_v1 }
  0xa7   : > { %2900 = vmatpush3.bf16.msra.mxu1 %v3304_v32  ;;  %v2634_v32 = vld [vmem:[%s3654_s9 + $0x11] sm:$0xff] }
  0xa8   : > { %3060 = vmatpush3.bf16.msra.mxu0 %v3305_v34  ;;  %2905 = vmatprep.subr.bf16.mxu1 %v3394_v1  ;;  %v1984_v34 = vpack.c.bf16 %v2634_v32, %v2634_v32 }
  0xa9   : > { %3065 = vmatprep.subr.bf16.mxu0 %v3394_v1 }
  0xaa   : > { %2902 = vmatmul.mubr.bf16.vlgmr.msra.gmra.mrb[0].mxu1 %v789_v36 }
  0xab   : > { %2906 = vmatpush3.bf16.msra.mxu1 %v3306_v37  ;;  %3062 = vmatmul.mubr.bf16.vlgmr.msra.gmra.mrb[0].mxu0 %v1659_v38 }
  0xac   : > { %3066 = vmatpush3.bf16.msra.mxu0 %v3307_v39  ;;  %2907 = vmatprep.subr.bf16.mxu1 %v3394_v1 }
  0xad   : > { %3067 = vmatprep.subr.bf16.mxu0 %v3394_v1  ;;  %2921 = vmatprep.mubr.msk.bf16.mxu1 %vm3395_vm0, %v3394_v1 }
  0xae   : > { %3081 = vmatprep.mubr.msk.bf16.mxu0 %vm3395_vm0, %v3394_v1 }
  0xaf   : > { %2908 = vmatpush3.bf16.msra.mxu1 %v3308_v40 }
  0xb0   : > { %3068 = vmatpush3.bf16.msra.mxu0 %v3309_v41  ;;  %2909 = vmatprep.subr.bf16.mxu1 %v3394_v1 }
  0xb1   : > { %3069 = vmatprep.subr.bf16.mxu0 %v3394_v1 }
  0xb3   : > { %2910 = vmatpush3.bf16.msra.mxu1 %v3310_v42 }
  0xb4   : > { %3070 = vmatpush3.bf16.msra.mxu0 %v3311_v43  ;;  %2911 = vmatprep.subr.bf16.mxu1 %v3394_v1  ;;  %v3396_v43 = vmov (!%p4071_p8), 0.0  }
  0xb5   : > { %3071 = vmatprep.subr.bf16.mxu0 %v3394_v1  ;;  %2098 = vst [vmem:[%s4122_s6] sm:$0x1] (!%p4071_p8), %v3396_v43  ;;  %2099 = vst [vmem:[%s4123_s7] sm:$0x1] (!%p4071_p8), %v3396_v43 }
  0xb7   : > { %2912 = vmatpush3.bf16.msra.mxu1 %v3312_v44 }
  0xb8   : > { %3072 = vmatpush3.bf16.msra.mxu0 %v3313_v45  ;;  %2913 = vmatprep.subr.bf16.mxu1 %v3394_v1 }
  0xb9   : > { %3073 = vmatprep.subr.bf16.mxu0 %v3394_v1 }
  0xbb   : > { %2914 = vmatpush3.bf16.msra.mxu1 %v3314_v46 }
  0xbc   : > { %3074 = vmatpush3.bf16.msra.mxu0 %v3315_v47  ;;  %2915 = vmatprep.subr.bf16.mxu1 %v3394_v1 }
  0xbd   : > { %3075 = vmatprep.subr.bf16.mxu0 %v3394_v1 }
  0xbf   : > { %2916 = vmatpush3.bf16.msra.mxu1 %v3316_v48 }
  0xc0   : > { %3076 = vmatpush3.bf16.msra.mxu0 %v3317_v49  ;;  %2917 = vmatprep.subr.bf16.mxu1 %v3394_v1 }
  0xc1   : > { %3077 = vmatprep.subr.bf16.mxu0 %v3394_v1 }
  0xc3   : > { %2918 = vmatpush3.bf16.msra.mxu1 %v3318_v50 }
  0xc4   : > { %3078 = vmatpush3.bf16.msra.mxu0 %v3319_v51  ;;  %2919 = vmatprep.subr.bf16.mxu1 %v3394_v1 }
  0xc5   : > { %3079 = vmatprep.subr.bf16.mxu0 %v3394_v1 }
  0xc7   : > { %2920 = vmatpush3.bf16.msra.mxu1 %v3320_v52 }
  0xc8   : > { %3080 = vmatpush3.bf16.msra.mxu0 %v3321_v54  ;;  %2925 = vmatprep.subr.bf16.mxu1 %v3394_v1 }
  0xc9   : > { %3085 = vmatprep.subr.bf16.mxu0 %v3394_v1 }
  0xca   : > { %2922 = vmatmul.mubr.bf16.vlgmr.msra.gmra.mrb[0].mxu1 %v898_v56 }
  0xcb   : > { %2926 = vmatpush3.bf16.msra.mxu1 %v3322_v57  ;;  %3082 = vmatmul.mubr.bf16.vlgmr.msra.gmra.mrb[0].mxu0 %v1768_v58 }
  0xcc   : > { %3086 = vmatpush3.bf16.msra.mxu0 %v3323_v59  ;;  %2927 = vmatprep.subr.bf16.mxu1 %v3394_v1 }
  0xcd   : > { %3087 = vmatprep.subr.bf16.mxu0 %v3394_v1  ;;  %2941 = vmatprep.mubr.msk.bf16.mxu1 %vm3395_vm0, %v3394_v1 }
  0xce   : > { %3101 = vmatprep.mubr.msk.bf16.mxu0 %vm3395_vm0, %v3394_v1 }
  0xcf   : > { %2928 = vmatpush3.bf16.msra.mxu1 %v3324_v60 }
  0xd0   : > { %3088 = vmatpush3.bf16.msra.mxu0 %v3325_v61  ;;  %2929 = vmatprep.subr.bf16.mxu1 %v3394_v1 }
  0xd1   : > { %3089 = vmatprep.subr.bf16.mxu0 %v3394_v1 }
  0xd3   : > { %2930 = vmatpush3.bf16.msra.mxu1 %v3326_v62 }
  0xd4   : > { %3090 = vmatpush3.bf16.msra.mxu0 %v3327_v63  ;;  %2931 = vmatprep.subr.bf16.mxu1 %v3394_v1 }
  0xd5   : > { %3091 = vmatprep.subr.bf16.mxu0 %v3394_v1 }
  0xd7   : > { %2932 = vmatpush3.bf16.msra.mxu1 %v3328_v0 }
  0xd8   : > { %3092 = vmatpush3.bf16.msra.mxu0 %v3329_v2  ;;  %2933 = vmatprep.subr.bf16.mxu1 %v3394_v1 }
  0xd9   : > { %3093 = vmatprep.subr.bf16.mxu0 %v3394_v1 }
  0xdb   : > { %2934 = vmatpush3.bf16.msra.mxu1 %v3330_v3 }
  0xdc   : > { %3094 = vmatpush3.bf16.msra.mxu0 %v3331_v4  ;;  %2935 = vmatprep.subr.bf16.mxu1 %v3394_v1 }
  0xdd   : > { %3095 = vmatprep.subr.bf16.mxu0 %v3394_v1 }
  0xdf   : > { %2936 = vmatpush3.bf16.msra.mxu1 %v3332_v5 }
  0xe0   : > { %3096 = vmatpush3.bf16.msra.mxu0 %v3333_v6  ;;  %2937 = vmatprep.subr.bf16.mxu1 %v3394_v1 }
  0xe1   : > { %3097 = vmatprep.subr.bf16.mxu0 %v3394_v1 }
  0xe3   : > { %2938 = vmatpush3.bf16.msra.mxu1 %v3334_v7 }
  0xe4   : > { %3098 = vmatpush3.bf16.msra.mxu0 %v3335_v8  ;;  %2939 = vmatprep.subr.bf16.mxu1 %v3394_v1 }
  0xe5   : > { %3099 = vmatprep.subr.bf16.mxu0 %v3394_v1 }
  0xe7   : > { %2940 = vmatpush3.bf16.msra.mxu1 %v3336_v9 }
  0xe8   : > { %3100 = vmatpush3.bf16.msra.mxu0 %v3337_v11  ;;  %2945 = vmatprep.subr.bf16.mxu1 %v3394_v1 }
  0xe9   : > { %3105 = vmatprep.subr.bf16.mxu0 %v3394_v1 }
  0xea   : > { %2942 = vmatmul.mubr.bf16.vlgmr.msra.gmra.mrb[0].mxu1 %v1006_v13 }
  0xeb   : > { %2946 = vmatpush3.bf16.msra.mxu1 %v3338_v14  ;;  %3102 = vmatmul.mubr.bf16.vlgmr.msra.gmra.mrb[0].mxu0 %v1876_v15 }
  0xec   : > { %3106 = vmatpush3.bf16.msra.mxu0 %v3339_v16  ;;  %2947 = vmatprep.subr.bf16.mxu1 %v3394_v1 }
  0xed   : > { %3107 = vmatprep.subr.bf16.mxu0 %v3394_v1  ;;  %2961 = vmatprep.mubr.msk.bf16.mxu1 %vm3395_vm0, %v3394_v1 }
  0xee   : > { %3121 = vmatprep.mubr.msk.bf16.mxu0 %vm3395_vm0, %v3394_v1 }
  0xef   : > { %2948 = vmatpush3.bf16.msra.mxu1 %v3340_v17 }
  0xf0   : > { %3108 = vmatpush3.bf16.msra.mxu0 %v3341_v18  ;;  %2949 = vmatprep.subr.bf16.mxu1 %v3394_v1 }
  0xf1   : > { %3109 = vmatprep.subr.bf16.mxu0 %v3394_v1 }
  0xf3   : > { %2950 = vmatpush3.bf16.msra.mxu1 %v3342_v19 }
  0xf4   : > { %3110 = vmatpush3.bf16.msra.mxu0 %v3343_v20  ;;  %2951 = vmatprep.subr.bf16.mxu1 %v3394_v1 }
  0xf5   : > { %3111 = vmatprep.subr.bf16.mxu0 %v3394_v1 }
  0xf7   : > { %2952 = vmatpush3.bf16.msra.mxu1 %v3344_v21 }
  0xf8   : > { %3112 = vmatpush3.bf16.msra.mxu0 %v3345_v22  ;;  %2953 = vmatprep.subr.bf16.mxu1 %v3394_v1 }
  0xf9   : > { %3113 = vmatprep.subr.bf16.mxu0 %v3394_v1 }
  0xfb   : > { %2954 = vmatpush3.bf16.msra.mxu1 %v3346_v23 }
  0xfc   : > { %3114 = vmatpush3.bf16.msra.mxu0 %v3347_v24  ;;  %2955 = vmatprep.subr.bf16.mxu1 %v3394_v1 }
  0xfd   : > { %3115 = vmatprep.subr.bf16.mxu0 %v3394_v1 }
  0xff   : > { %2956 = vmatpush3.bf16.msra.mxu1 %v3348_v25 }
 0x100   : > { %3116 = vmatpush3.bf16.msra.mxu0 %v3349_v26  ;;  %2957 = vmatprep.subr.bf16.mxu1 %v3394_v1 }
 0x101   : > { %3117 = vmatprep.subr.bf16.mxu0 %v3394_v1 }
 0x103   : > { %2958 = vmatpush3.bf16.msra.mxu1 %v3350_v27 }
 0x104   : > { %3118 = vmatpush3.bf16.msra.mxu0 %v3351_v28  ;;  %2959 = vmatprep.subr.bf16.mxu1 %v3394_v1 }
 0x105   : > { %3119 = vmatprep.subr.bf16.mxu0 %v3394_v1 }
 0x107   : > { %2960 = vmatpush3.bf16.msra.mxu1 %v3352_v29 }
 0x108   : > { %3120 = vmatpush3.bf16.msra.mxu0 %v3353_v31 }
 0x10a   : > { %2962 = vmatmul.mubr.bf16.vlgmr.msra.gmra.mrb[0].mxu1 %v1114_v33 }
 0x10b   : > { %3122 = vmatmul.mubr.bf16.vlgmr.msra.gmra.mrb[0].mxu0 %v1984_v34 }
 0x1db   : > { %2097 = sbr.rel (%p4071_p8) target bundleno = 482 (0x1e2), region = 44 }
 0x1dd   : > { %v1214_v35 = vpop.f32.mrb[0].mxu1 }
 0x1de   : > { %v2084_v1 = vpop.f32.mrb[0].mxu0  ;;  %v2963_v36 = vpop.f32.mrb[1].mxu1 }
 0x1df   : > { %v3125_v37 = vadd.f32 %v2084_v1, %v1214_v35  ;;  %v3123_v38 = vpop.f32.mrb[1].mxu0  ;;  %v1217_v39 = vpop.f32.mrb[2].mxu1 }
 0x1e0   : > { %v2087_v40 = vpop.f32.mrb[2].mxu0  ;;  %v2964_v41 = vpop.f32.mrb[3].mxu1 }
 0x1e1   : > { %2091 = vst [vmem:[%s353_s13] sm:$0xff] %v3125_v37  ;;  %v3124_v42 = vpop.f32.mrb[3].mxu0 }
 0x1e2 PF: > { %v2101_v44 = vrot.slane %v3125_v37, 4  ;;  %v2110_v45 = vmul.f32 %v3125_v37, %v3125_v37  ;;  %v2100_v54 = vld [vmem:[%s4122_s6] sm:$0x1] }
 0x1e3   : > { %v2109_v57 = vld [vmem:[%s4123_s7] sm:$0x1] }
 0x1e4   : > { %v2102_v46 = vadd.f32 %v3125_v37, %v2101_v44  ;;  %v2111_v47 = vrot.slane %v2110_v45, 4 }
 0x1e6   : > { %v2103_v48 = vrot.slane %v2102_v46, 2  ;;  %v2112_v49 = vadd.f32 %v2111_v47, %v2110_v45 }
 0x1e8   : > { %v2104_v50 = vadd.f32 %v2103_v48, %v2102_v46  ;;  %v2113_v51 = vrot.slane %v2112_v49, 2 }
 0x1ea   : > { %v2105_v52 = vrot.slane %v2104_v50, 1  ;;  %v2114_v53 = vadd.f32 %v2113_v51, %v2112_v49 }
 0x1ec   : > { %v2106_v55 = vadd.f32 %v2105_v52, %v2104_v50  ;;  %v2115_v56 = vrot.slane %v2114_v53, 1 }
 0x1ee   : > { %v2107_v58 = vadd.f32 %v2106_v55, %v2100_v54  ;;  %v2116_v59 = vadd.f32 %v2115_v56, %v2114_v53 }
 0x1f0   : > { %2108 = vst [vmem:[%s4122_s6] sm:$0x1] %v2107_v58  ;;  %v2117_v60 = vadd.f32 %v2116_v59, %v2109_v57 }
 0x1f2   : > { %2118 = vst [vmem:[%s4123_s7] sm:$0x1] %v2117_v60 }
 0x1f3 PF: > { %s18_s28 = sadd.s32 1, %s3392_s28   ;;  %s4125_s24 = smov %s3384_s26 }
 0x1f4   : > { %p15_p10 = scmp.ge.s32.totalorder %s18_s28, 18   ;;  %s4126_s25 = smov %s3388_s27 }
 0x1f5   : > { %s4127_s26 = smov %s4130_s29  ;;  %s4128_s27 = smov %s4134_s30 }
 0x1f6   :  { %17 = sbr.rel (!%p15_p10) target bundleno = 3 (0x3), region = 122 }

// kernel: discriminator_forward.11
= control target key start
LH: loop header
LB: loop body
LE: loop exit
PB: predicated region body
PF: predicated region fallthrough
CT: control target
= control target key end

     0   :  { %s3440_s24 = smov 0   ;;  %s3442_s25 = smov 0   ;;  %s4119_s0 = inlined_call_operand.vmem [shape: f32[2,5,5,128], index: 0, kind: input, shape index: {}]   ;;  %s4120_s1 = inlined_call_operand.vmem [shape: f32[2,5,5,128], index: 1, kind: input, shape index: {}]   ;;  %s4121_s2 = inlined_call_operand.vmem [shape: f32[2,5,5,128], index: 2, kind: input, shape index: {}]   ;;  %s4122_s3 = inlined_call_operand.vmem [shape: f32[2,5,5,128], index: 3, kind: input, shape index: {}]   ;;  %s4123_s4 = inlined_call_operand.vmem [shape: bf16[16,128,128], index: 4, kind: input, shape index: {}]   ;;  %s4124_s5 = inlined_call_operand.vmem [shape: f32[2,4,4,128], index: 5, kind: output, shape index: {0}]   ;;  %s4125_s6 = inlined_call_operand.vmem [shape: f32[1,128], index: 6, kind: output, shape index: {1}]   ;;  %s4126_s7 = inlined_call_operand.vmem [shape: f32[1,128], index: 7, kind: output, shape index: {2}]  }
   0x1   :  { %s3444_s26 = smov 0   ;;  %s3446_s27 = smov 0  }
   0x2   :  { %s3448_s28 = smov 0  }
   0x3 LB: > { %s27_s29 = sadd.s32 1, %s3387_s26  ;;  %s30_s30 = sadd.s32 1, %s3391_s27  ;;  %s3395_s28 = sphi %s3448_s28, %s18_s28   ;;  %s3391_s27 = sphi %s3446_s27, %s4131_s27   ;;  %s3387_s26 = sphi %s3444_s26, %s4130_s26   ;;  %s3383_s25 = sphi %s3442_s25, %s4129_s25   ;;  %s3379_s24 = sphi %s3440_s24, %s4128_s24  }
   0x4   : > { %p28_p0 = scmp.ge.s32.totalorder %s27_s29, 4  ;;  %p2274_p1 = scmp.ge.s32.totalorder %s3395_s28, 1 }
   0x5   : > { %p276_p2 = scmp.lt.s32.totalorder %s3395_s28, 9 }
   0x6   : > { %s4133_s29 = smov (%p28_p0, %s27_s29), 0  ;;  %s4135_s30 = smov (!%p28_p0, %s30_s30), %s3391_s27 }
   0x7   : > { %p277_p3 = pnand %p2274_p1, %p276_p2  ;;  %p32_p4 = scmp.ge.s32.totalorder %s4135_s30, 2 }
   0x8   : > { %v3229_v0 = vld [vmem:[%s4123_s4 + $0x40] sm:$0xff] (!%p277_p3)   ;;  %v3397_v1 = vmov (!%p277_p3), 0.0   ;;  %v3231_v3 = vld [vmem:[%s4123_s4 + $0x48] sm:$0xff] (!%p277_p3)   ;;  %vm3398_vm0 = vmmov (!%p277_p3), 0   ;;  %v3233_v5 = vld [vmem:[%s4123_s4 + $0x50] sm:$0xff] (!%p277_p3)   ;;  %p326_p5 = scmp.lt.s32.totalorder (!%p277_p3), %s3383_s25, 1 }
   0x9   : > { %s4137_s30 = smov (%p32_p4, %s4135_s30), 0  ;;  %280 = sbr.rel (%p277_p3) target bundleno = 500 (0x1f4), region = 40 }
   0xa   : > { %2808 = vmatprep.subr.bf16.mxu1 (!%p277_p3), %v3397_v1  ;;  %2968 = vmatprep.subr.bf16.mxu0 (!%p277_p3), %v3397_v1  ;;  %v3230_v2 = vld [vmem:[%s4123_s4 + $0x200] sm:$0xff] (!%p277_p3)   ;;  %v3232_v4 = vld [vmem:[%s4123_s4 + $0x208] sm:$0xff] (!%p277_p3)   ;;  %v3234_v6 = vld [vmem:[%s4123_s4 + $0x210] sm:$0xff] (!%p277_p3)   ;;  %s3538_s21 = sshll.u32 (!%p277_p3), %s3379_s24, 3  ;;  %p2092_p6 = scmp.eq.s32.totalorder (!%p277_p3), %s3383_s25, 0 }
   0xb   : > { %2809 = vmatpush3.bf16.msra.mxu1 (!%p277_p3), %v3229_v0  ;;  %2824 = vmatprep.mubr.msk.bf16.mxu1 (!%p277_p3), %vm3398_vm0, %v3397_v1  ;;  %v3235_v7 = vld [vmem:[%s4123_s4 + $0x58] sm:$0xff] (!%p277_p3)   ;;  %v3237_v9 = vld [vmem:[%s4123_s4 + $0x60] sm:$0xff] (!%p277_p3)   ;;  %v3239_v11 = vld [vmem:[%s4123_s4 + $0x68] sm:$0xff] (!%p277_p3)   ;;  %p2093_p7 = scmp.eq.s32.totalorder (!%p277_p3), %s3379_s24, 0  ;;  %p348_p9 = scmp.lt.s32.totalorder (!%p277_p3), %s3379_s24, 3 }
   0xc   : > { %2969 = vmatpush3.bf16.msra.mxu0 (!%p277_p3), %v3230_v2  ;;  %2810 = vmatprep.subr.bf16.mxu1 (!%p277_p3), %v3397_v1  ;;  %v3236_v8 = vld [vmem:[%s4123_s4 + $0x218] sm:$0xff] (!%p277_p3)   ;;  %v3238_v10 = vld [vmem:[%s4123_s4 + $0x220] sm:$0xff] (!%p277_p3)   ;;  %v3240_v12 = vld [vmem:[%s4123_s4 + $0x228] sm:$0xff] (!%p277_p3)  }
   0xd   : > { %2970 = vmatprep.subr.bf16.mxu0 (!%p277_p3), %v3397_v1  ;;  %2984 = vmatprep.mubr.msk.bf16.mxu0 (!%p277_p3), %vm3398_vm0, %v3397_v1  ;;  %v3241_v13 = vld [vmem:[%s4123_s4 + $0x70] sm:$0xff] (!%p277_p3)   ;;  %v3243_v15 = vld [vmem:[%s4123_s4 + $0x78] sm:$0xff] (!%p277_p3)   ;;  %v3245_v20 = vld [vmem:[%s4123_s4] sm:$0xff] (!%p277_p3)   ;;  %p4074_p8 = pnand (!%p277_p3), %p2093_p7, %p2092_p6 }
   0xe   : > { %v3242_v14 = vld [vmem:[%s4123_s4 + $0x230] sm:$0xff] (!%p277_p3)   ;;  %v3244_v16 = vld [vmem:[%s4123_s4 + $0x238] sm:$0xff] (!%p277_p3)   ;;  %v3246_v22 = vld [vmem:[%s4123_s4 + $0x240] sm:$0xff] (!%p277_p3)  }
   0xf   : > { %2811 = vmatpush3.bf16.msra.mxu1 (!%p277_p3), %v3231_v3  ;;  %v3247_v23 = vld [vmem:[%s4123_s4 + $0x8] sm:$0xff] (!%p277_p3)   ;;  %v3249_v25 = vld [vmem:[%s4123_s4 + $0x10] sm:$0xff] (!%p277_p3)   ;;  %v3251_v27 = vld [vmem:[%s4123_s4 + $0x18] sm:$0xff] (!%p277_p3)  }
  0x10   : > { %2971 = vmatpush3.bf16.msra.mxu0 %v3232_v4  ;;  %2812 = vmatprep.subr.bf16.mxu1 %v3397_v1  ;;  %s3512_s8 = scalar_select %p326_p5, %s3383_s25, 1  ;;  %v3248_v24 = vld [vmem:[%s4123_s4 + $0x248] sm:$0xff]   ;;  %v3250_v26 = vld [vmem:[%s4123_s4 + $0x250] sm:$0xff]   ;;  %v3252_v28 = vld [vmem:[%s4123_s4 + $0x258] sm:$0xff]  }
  0x11   : > { %2972 = vmatprep.subr.bf16.mxu0 %v3397_v1  ;;  %v3253_v29 = vld [vmem:[%s4123_s4 + $0x20] sm:$0xff]   ;;  %v3255_v31 = vld [vmem:[%s4123_s4 + $0x28] sm:$0xff]   ;;  %v3257_v33 = vld [vmem:[%s4123_s4 + $0x30] sm:$0xff]   ;;  %s4139_s24 = smov (!%p348_p9, %s3379_s24), 3 }
  0x12   : > { %s3523_s13 = smul.u32 40, %s3512_s8  ;;  %v3254_v30 = vld [vmem:[%s4123_s4 + $0x260] sm:$0xff]   ;;  %v3256_v32 = vld [vmem:[%s4123_s4 + $0x268] sm:$0xff]   ;;  %v3258_v34 = vld [vmem:[%s4123_s4 + $0x270] sm:$0xff]  }
  0x13   : > { %2813 = vmatpush3.bf16.msra.mxu1 %v3233_v5  ;;  %v3259_v35 = vld [vmem:[%s4123_s4 + $0x38] sm:$0xff]   ;;  %v3261_v40 = vld [vmem:[%s4123_s4 + $0x80] sm:$0xff]   ;;  %v3263_v43 = vld [vmem:[%s4123_s4 + $0x88] sm:$0xff]  }
  0x14   : > { %2973 = vmatpush3.bf16.msra.mxu0 %v3234_v6  ;;  %2814 = vmatprep.subr.bf16.mxu1 %v3397_v1  ;;  %s335_s20 = scalar_lea.vmem %s4120_s1, %s3523_s13  ;;  %s330_s9 = scalar_lea.vmem %s4119_s0, %s3523_s13  ;;  %v3260_v36 = vld [vmem:[%s4123_s4 + $0x278] sm:$0xff]   ;;  %v3262_v42 = vld [vmem:[%s4123_s4 + $0x280] sm:$0xff]   ;;  %v3264_v44 = vld [vmem:[%s4123_s4 + $0x288] sm:$0xff]  }
  0x15   : > { %2974 = vmatprep.subr.bf16.mxu0 %v3397_v1  ;;  %s3552_s15 = scalar_lea.vmem %s335_s20, %s3538_s21  ;;  %s3559_s18 = scalar_lea.vmem %s330_s9, %s3538_s21  ;;  %v3265_v45 = vld [vmem:[%s4123_s4 + $0x90] sm:$0xff]   ;;  %v3267_v47 = vld [vmem:[%s4123_s4 + $0x98] sm:$0xff]   ;;  %v3269_v49 = vld [vmem:[%s4123_s4 + $0xa0] sm:$0xff]  }
  0x16   : > { %v376_v17 = vld [vmem:[%s3552_s15] sm:$0xf]  ;;  %v2459_v18 = vld [vmem:[%s3559_s18 + $0x8] sm:$0xf]  ;;  %s340_s11 = scalar_lea.vmem %s4121_s2, %s3523_s13  ;;  %s345_s22 = scalar_lea.vmem %s4122_s3, %s3523_s13  ;;  %v3266_v46 = vld [vmem:[%s4123_s4 + $0x290] sm:$0xff]  }
  0x17   : > { %2815 = vmatpush3.bf16.msra.mxu1 %v3235_v7  ;;  %v377_v19 = vpack.c.bf16 %v376_v17, %v376_v17  ;;  %v1225_v21 = vpack.c.bf16 %v2459_v18, %v2459_v18  ;;  %s3580_s16 = scalar_lea.vmem %s340_s11, %s3538_s21  ;;  %v357_v37 = vld [vmem:[%s3559_s18] sm:$0xf]  ;;  %v2485_v38 = vld [vmem:[%s3552_s15 + $0x8] sm:$0xf]  ;;  %s3657_s9 = scalar_lea.vmem %s345_s22, %s3538_s21  ;;  %v3268_v48 = vld [vmem:[%s4123_s4 + $0x298] sm:$0xff]  }
  0x18   : > { %2975 = vmatpush3.bf16.msra.mxu0 %v3236_v8  ;;  %2816 = vmatprep.subr.bf16.mxu1 %v3397_v1  ;;  %v358_v39 = vpack.c.bf16 %v357_v37, %v357_v37  ;;  %v1334_v41 = vpack.c.bf16 %v2485_v38, %v2485_v38  ;;  %v3270_v50 = vld [vmem:[%s4123_s4 + $0x2a0] sm:$0xff]   ;;  %v3271_v51 = vld [vmem:[%s4123_s4 + $0xa8] sm:$0xff]   ;;  %v3273_v53 = vld [vmem:[%s4123_s4 + $0xb0] sm:$0xff]  }
  0x19   : > { %2976 = vmatprep.subr.bf16.mxu0 %v3397_v1  ;;  %v3272_v52 = vld [vmem:[%s4123_s4 + $0x2a8] sm:$0xff]   ;;  %v3274_v54 = vld [vmem:[%s4123_s4 + $0x2b0] sm:$0xff]   ;;  %v3275_v55 = vld [vmem:[%s4123_s4 + $0xb8] sm:$0xff]  }
  0x1a   : > { %v3276_v56 = vld [vmem:[%s4123_s4 + $0x2b8] sm:$0xff]   ;;  %v571_v57 = vld [vmem:[%s3559_s18 + $0x1] sm:$0xf]  ;;  %v2510_v58 = vld [vmem:[%s3559_s18 + $0x9] sm:$0xf]  ;;  %s2279_s18 = sshll.u32 %s3512_s8, 2 }
  0x1b   : > { %2817 = vmatpush3.bf16.msra.mxu1 %v3237_v9  ;;  %v572_v59 = vpack.c.bf16 %v571_v57, %v571_v57  ;;  %v3277_v60 = vld [vmem:[%s4123_s4 + $0xc0] sm:$0xff]   ;;  %v1442_v61 = vpack.c.bf16 %v2510_v58, %v2510_v58  ;;  %v3279_v63 = vld [vmem:[%s4123_s4 + $0xc8] sm:$0xff]   ;;  %v3281_v2 = vld [vmem:[%s4123_s4 + $0xd0] sm:$0xff]   ;;  %s351_s23 = sadd.s32 %s2279_s18, %s4139_s24 }
  0x1c   : > { %2977 = vmatpush3.bf16.msra.mxu0 %v3238_v10  ;;  %2818 = vmatprep.subr.bf16.mxu1 %v3397_v1  ;;  %v3278_v62 = vld [vmem:[%s4123_s4 + $0x2c0] sm:$0xff]   ;;  %v3280_v0 = vld [vmem:[%s4123_s4 + $0x2c8] sm:$0xff]   ;;  %v3282_v3 = vld [vmem:[%s4123_s4 + $0x2d0] sm:$0xff]   ;;  %s2280_s10 = sshll.u32 %s351_s23, 2 }
  0x1d   : > { %2978 = vmatprep.subr.bf16.mxu0 %v3397_v1  ;;  %v3283_v4 = vld [vmem:[%s4123_s4 + $0xd8] sm:$0xff]   ;;  %v3285_v6 = vld [vmem:[%s4123_s4 + $0xe0] sm:$0xff]   ;;  %v3287_v8 = vld [vmem:[%s4123_s4 + $0xe8] sm:$0xff]   ;;  %s353_s13 = scalar_lea.vmem %s4124_s5, %s2280_s10 }
  0x1e   : > { %v3284_v5 = vld [vmem:[%s4123_s4 + $0x2d8] sm:$0xff]   ;;  %v3286_v7 = vld [vmem:[%s4123_s4 + $0x2e0] sm:$0xff]   ;;  %v3288_v9 = vld [vmem:[%s4123_s4 + $0x2e8] sm:$0xff]  }
  0x1f   : > { %2819 = vmatpush3.bf16.msra.mxu1 %v3239_v11  ;;  %v3289_v10 = vld [vmem:[%s4123_s4 + $0xf0] sm:$0xff]   ;;  %v3293_v17 = vld [vmem:[%s4123_s4 + $0x100] sm:$0xff]  }
  0x20   : > { %2979 = vmatpush3.bf16.msra.mxu0 %v3240_v12  ;;  %2820 = vmatprep.subr.bf16.mxu1 %v3397_v1  ;;  %v3290_v11 = vld [vmem:[%s4123_s4 + $0x2f0] sm:$0xff]   ;;  %v3291_v12 = vld [vmem:[%s4123_s4 + $0xf8] sm:$0xff]   ;;  %v3309_v37 = vld [vmem:[%s4123_s4 + $0x140] sm:$0xff]  }
  0x21   : > { %2980 = vmatprep.subr.bf16.mxu0 %v3397_v1  ;;  %v3325_v57 = vld [vmem:[%s4123_s4 + $0x180] sm:$0xff]  }
  0x23   : > { %2821 = vmatpush3.bf16.msra.mxu1 %v3241_v13  ;;  %v3292_v13 = vld [vmem:[%s4123_s4 + $0x2f8] sm:$0xff]  }
  0x24   : > { %2981 = vmatpush3.bf16.msra.mxu0 %v3242_v14  ;;  %2822 = vmatprep.subr.bf16.mxu1 %v3397_v1  ;;  %v679_v14 = vld [vmem:[%s3552_s15 + $0x1] sm:$0xf] }
  0x25   : > { %2982 = vmatprep.subr.bf16.mxu0 %v3397_v1 }
  0x27   : > { %2823 = vmatpush3.bf16.msra.mxu1 %v3243_v15  ;;  %v2535_v15 = vld [vmem:[%s3552_s15 + $0x9] sm:$0xf] }
  0x28   : > { %2983 = vmatpush3.bf16.msra.mxu0 %v3244_v16  ;;  %2828 = vmatprep.subr.bf16.mxu1 %v3397_v1  ;;  %v680_v16 = vpack.c.bf16 %v679_v14, %v679_v14  ;;  %v1550_v18 = vpack.c.bf16 %v2535_v15, %v2535_v15  ;;  %v3341_v14 = vld [vmem:[%s4123_s4 + $0x1c0] sm:$0xff]  }
  0x29   : > { %2988 = vmatprep.subr.bf16.mxu0 %v3397_v1 }
  0x2a   : > { %2825 = vmatmul.mubr.bf16.vlgmr.msra.gmra.mrb[0].mxu1 %v377_v19  ;;  %v3294_v19 = vld [vmem:[%s4123_s4 + $0x300] sm:$0xff]  }
  0x2b   : > { %2829 = vmatpush3.bf16.msra.mxu1 %v3245_v20  ;;  %2985 = vmatmul.mubr.bf16.vlgmr.msra.gmra.mrb[0].mxu0 %v1225_v21  ;;  %v3295_v20 = vld [vmem:[%s4123_s4 + $0x108] sm:$0xff]  }
  0x2c   : > { %2989 = vmatpush3.bf16.msra.mxu0 %v3246_v22  ;;  %2830 = vmatprep.subr.bf16.mxu1 %v3397_v1  ;;  %v3296_v21 = vld [vmem:[%s4123_s4 + $0x308] sm:$0xff]   ;;  %v3297_v22 = vld [vmem:[%s4123_s4 + $0x110] sm:$0xff]  }
  0x2d   : > { %2990 = vmatprep.subr.bf16.mxu0 %v3397_v1  ;;  %2844 = vmatprep.mubr.msk.bf16.mxu1 %vm3398_vm0, %v3397_v1 }
  0x2e   : > { %3004 = vmatprep.mubr.msk.bf16.mxu0 %vm3398_vm0, %v3397_v1 }
  0x2f   : > { %2831 = vmatpush3.bf16.msra.mxu1 %v3247_v23  ;;  %v3298_v23 = vld [vmem:[%s4123_s4 + $0x310] sm:$0xff]  }
  0x30   : > { %2991 = vmatpush3.bf16.msra.mxu0 %v3248_v24  ;;  %2832 = vmatprep.subr.bf16.mxu1 %v3397_v1  ;;  %v3299_v24 = vld [vmem:[%s4123_s4 + $0x118] sm:$0xff]  }
  0x31   : > { %2992 = vmatprep.subr.bf16.mxu0 %v3397_v1 }
  0x33   : > { %2833 = vmatpush3.bf16.msra.mxu1 %v3249_v25  ;;  %v3300_v25 = vld [vmem:[%s4123_s4 + $0x318] sm:$0xff]  }
  0x34   : > { %2993 = vmatpush3.bf16.msra.mxu0 %v3250_v26  ;;  %2834 = vmatprep.subr.bf16.mxu1 %v3397_v1  ;;  %v3301_v26 = vld [vmem:[%s4123_s4 + $0x120] sm:$0xff]  }
  0x35   : > { %2994 = vmatprep.subr.bf16.mxu0 %v3397_v1 }
  0x37   : > { %2835 = vmatpush3.bf16.msra.mxu1 %v3251_v27  ;;  %v3302_v27 = vld [vmem:[%s4123_s4 + $0x320] sm:$0xff]  }
  0x38   : > { %2995 = vmatpush3.bf16.msra.mxu0 %v3252_v28  ;;  %2836 = vmatprep.subr.bf16.mxu1 %v3397_v1  ;;  %v3303_v28 = vld [vmem:[%s4123_s4 + $0x128] sm:$0xff]  }
  0x39   : > { %2996 = vmatprep.subr.bf16.mxu0 %v3397_v1 }
  0x3b   : > { %2837 = vmatpush3.bf16.msra.mxu1 %v3253_v29  ;;  %v3304_v29 = vld [vmem:[%s4123_s4 + $0x328] sm:$0xff]  }
  0x3c   : > { %2997 = vmatpush3.bf16.msra.mxu0 %v3254_v30  ;;  %2838 = vmatprep.subr.bf16.mxu1 %v3397_v1  ;;  %v3305_v30 = vld [vmem:[%s4123_s4 + $0x130] sm:$0xff]  }
  0x3d   : > { %2998 = vmatprep.subr.bf16.mxu0 %v3397_v1 }
  0x3f   : > { %2839 = vmatpush3.bf16.msra.mxu1 %v3255_v31  ;;  %v3306_v31 = vld [vmem:[%s4123_s4 + $0x330] sm:$0xff]  }
  0x40   : > { %2999 = vmatpush3.bf16.msra.mxu0 %v3256_v32  ;;  %2840 = vmatprep.subr.bf16.mxu1 %v3397_v1  ;;  %v3307_v32 = vld [vmem:[%s4123_s4 + $0x138] sm:$0xff]  }
  0x41   : > { %3000 = vmatprep.subr.bf16.mxu0 %v3397_v1 }
  0x43   : > { %2841 = vmatpush3.bf16.msra.mxu1 %v3257_v33  ;;  %v788_v33 = vld [vmem:[%s3580_s16] sm:$0xf] }
  0x44   : > { %3001 = vmatpush3.bf16.msra.mxu0 %v3258_v34  ;;  %2842 = vmatprep.subr.bf16.mxu1 %v3397_v1  ;;  %v3308_v34 = vld [vmem:[%s4123_s4 + $0x338] sm:$0xff]  }
  0x45   : > { %3002 = vmatprep.subr.bf16.mxu0 %v3397_v1 }
  0x47   : > { %2843 = vmatpush3.bf16.msra.mxu1 %v3259_v35  ;;  %v2561_v35 = vld [vmem:[%s3580_s16 + $0x8] sm:$0xf] }
  0x48   : > { %3003 = vmatpush3.bf16.msra.mxu0 %v3260_v36  ;;  %2848 = vmatprep.subr.bf16.mxu1 %v3397_v1  ;;  %v789_v36 = vpack.c.bf16 %v788_v33, %v788_v33  ;;  %v1659_v38 = vpack.c.bf16 %v2561_v35, %v2561_v35 }
  0x49   : > { %3008 = vmatprep.subr.bf16.mxu0 %v3397_v1 }
  0x4a   : > { %2845 = vmatmul.mubr.bf16.vlgmr.msra.gmra.mrb[0].mxu1 %v358_v39  ;;  %v3310_v39 = vld [vmem:[%s4123_s4 + $0x340] sm:$0xff]  }
  0x4b   : > { %2849 = vmatpush3.bf16.msra.mxu1 %v3261_v40  ;;  %3005 = vmatmul.mubr.bf16.vlgmr.msra.gmra.mrb[0].mxu0 %v1334_v41  ;;  %v3311_v40 = vld [vmem:[%s4123_s4 + $0x148] sm:$0xff]  }
  0x4c   : > { %3009 = vmatpush3.bf16.msra.mxu0 %v3262_v42  ;;  %2850 = vmatprep.subr.bf16.mxu1 %v3397_v1  ;;  %v3312_v41 = vld [vmem:[%s4123_s4 + $0x348] sm:$0xff]   ;;  %v3313_v42 = vld [vmem:[%s4123_s4 + $0x150] sm:$0xff]  }
  0x4d   : > { %3010 = vmatprep.subr.bf16.mxu0 %v3397_v1  ;;  %2864 = vmatprep.mubr.msk.bf16.mxu1 %vm3398_vm0, %v3397_v1 }
  0x4e   : > { %3024 = vmatprep.mubr.msk.bf16.mxu0 %vm3398_vm0, %v3397_v1 }
  0x4f   : > { %2851 = vmatpush3.bf16.msra.mxu1 %v3263_v43  ;;  %v3314_v43 = vld [vmem:[%s4123_s4 + $0x350] sm:$0xff]  }
  0x50   : > { %3011 = vmatpush3.bf16.msra.mxu0 %v3264_v44  ;;  %2852 = vmatprep.subr.bf16.mxu1 %v3397_v1  ;;  %v3315_v44 = vld [vmem:[%s4123_s4 + $0x158] sm:$0xff]  }
  0x51   : > { %3012 = vmatprep.subr.bf16.mxu0 %v3397_v1 }
  0x53   : > { %2853 = vmatpush3.bf16.msra.mxu1 %v3265_v45  ;;  %v3316_v45 = vld [vmem:[%s4123_s4 + $0x358] sm:$0xff]  }
  0x54   : > { %3013 = vmatpush3.bf16.msra.mxu0 %v3266_v46  ;;  %2854 = vmatprep.subr.bf16.mxu1 %v3397_v1  ;;  %v3317_v46 = vld [vmem:[%s4123_s4 + $0x160] sm:$0xff]  }
  0x55   : > { %3014 = vmatprep.subr.bf16.mxu0 %v3397_v1 }
  0x57   : > { %2855 = vmatpush3.bf16.msra.mxu1 %v3267_v47  ;;  %v3318_v47 = vld [vmem:[%s4123_s4 + $0x360] sm:$0xff]  }
  0x58   : > { %3015 = vmatpush3.bf16.msra.mxu0 %v3268_v48  ;;  %2856 = vmatprep.subr.bf16.mxu1 %v3397_v1  ;;  %v3319_v48 = vld [vmem:[%s4123_s4 + $0x168] sm:$0xff]  }
  0x59   : > { %3016 = vmatprep.subr.bf16.mxu0 %v3397_v1 }
  0x5b   : > { %2857 = vmatpush3.bf16.msra.mxu1 %v3269_v49  ;;  %v3320_v49 = vld [vmem:[%s4123_s4 + $0x368] sm:$0xff]  }
  0x5c   : > { %3017 = vmatpush3.bf16.msra.mxu0 %v3270_v50  ;;  %2858 = vmatprep.subr.bf16.mxu1 %v3397_v1  ;;  %v3321_v50 = vld [vmem:[%s4123_s4 + $0x170] sm:$0xff]  }
  0x5d   : > { %3018 = vmatprep.subr.bf16.mxu0 %v3397_v1 }
  0x5f   : > { %2859 = vmatpush3.bf16.msra.mxu1 %v3271_v51  ;;  %v3322_v51 = vld [vmem:[%s4123_s4 + $0x370] sm:$0xff]  }
  0x60   : > { %3019 = vmatpush3.bf16.msra.mxu0 %v3272_v52  ;;  %2860 = vmatprep.subr.bf16.mxu1 %v3397_v1  ;;  %v3323_v52 = vld [vmem:[%s4123_s4 + $0x178] sm:$0xff]  }
  0x61   : > { %3020 = vmatprep.subr.bf16.mxu0 %v3397_v1 }
  0x63   : > { %2861 = vmatpush3.bf16.msra.mxu1 %v3273_v53  ;;  %v897_v53 = vld [vmem:[%s3657_s9] sm:$0xf] }
  0x64   : > { %3021 = vmatpush3.bf16.msra.mxu0 %v3274_v54  ;;  %2862 = vmatprep.subr.bf16.mxu1 %v3397_v1  ;;  %v3324_v54 = vld [vmem:[%s4123_s4 + $0x378] sm:$0xff]  }
  0x65   : > { %3022 = vmatprep.subr.bf16.mxu0 %v3397_v1 }
  0x67   : > { %2863 = vmatpush3.bf16.msra.mxu1 %v3275_v55  ;;  %v2587_v55 = vld [vmem:[%s3657_s9 + $0x8] sm:$0xf] }
  0x68   : > { %3023 = vmatpush3.bf16.msra.mxu0 %v3276_v56  ;;  %2868 = vmatprep.subr.bf16.mxu1 %v3397_v1  ;;  %v898_v56 = vpack.c.bf16 %v897_v53, %v897_v53  ;;  %v1768_v58 = vpack.c.bf16 %v2587_v55, %v2587_v55 }
  0x69   : > { %3028 = vmatprep.subr.bf16.mxu0 %v3397_v1 }
  0x6a   : > { %2865 = vmatmul.mubr.bf16.vlgmr.msra.gmra.mrb[0].mxu1 %v572_v59  ;;  %v3326_v59 = vld [vmem:[%s4123_s4 + $0x380] sm:$0xff]  }
  0x6b   : > { %2869 = vmatpush3.bf16.msra.mxu1 %v3277_v60  ;;  %3025 = vmatmul.mubr.bf16.vlgmr.msra.gmra.mrb[0].mxu0 %v1442_v61  ;;  %v3327_v60 = vld [vmem:[%s4123_s4 + $0x188] sm:$0xff]  }
  0x6c   : > { %3029 = vmatpush3.bf16.msra.mxu0 %v3278_v62  ;;  %2870 = vmatprep.subr.bf16.mxu1 %v3397_v1  ;;  %v3328_v61 = vld [vmem:[%s4123_s4 + $0x388] sm:$0xff]   ;;  %v3329_v62 = vld [vmem:[%s4123_s4 + $0x190] sm:$0xff]  }
  0x6d   : > { %3030 = vmatprep.subr.bf16.mxu0 %v3397_v1  ;;  %2884 = vmatprep.mubr.msk.bf16.mxu1 %vm3398_vm0, %v3397_v1 }
  0x6e   : > { %3044 = vmatprep.mubr.msk.bf16.mxu0 %vm3398_vm0, %v3397_v1 }
  0x6f   : > { %2871 = vmatpush3.bf16.msra.mxu1 %v3279_v63  ;;  %v3330_v63 = vld [vmem:[%s4123_s4 + $0x390] sm:$0xff]  }
  0x70   : > { %3031 = vmatpush3.bf16.msra.mxu0 %v3280_v0  ;;  %2872 = vmatprep.subr.bf16.mxu1 %v3397_v1  ;;  %v3331_v0 = vld [vmem:[%s4123_s4 + $0x198] sm:$0xff]  }
  0x71   : > { %3032 = vmatprep.subr.bf16.mxu0 %v3397_v1 }
  0x73   : > { %2873 = vmatpush3.bf16.msra.mxu1 %v3281_v2  ;;  %v3332_v2 = vld [vmem:[%s4123_s4 + $0x398] sm:$0xff]  }
  0x74   : > { %3033 = vmatpush3.bf16.msra.mxu0 %v3282_v3  ;;  %2874 = vmatprep.subr.bf16.mxu1 %v3397_v1  ;;  %v3333_v3 = vld [vmem:[%s4123_s4 + $0x1a0] sm:$0xff]  }
  0x75   : > { %3034 = vmatprep.subr.bf16.mxu0 %v3397_v1 }
  0x77   : > { %2875 = vmatpush3.bf16.msra.mxu1 %v3283_v4  ;;  %v3334_v4 = vld [vmem:[%s4123_s4 + $0x3a0] sm:$0xff]  }
  0x78   : > { %3035 = vmatpush3.bf16.msra.mxu0 %v3284_v5  ;;  %2876 = vmatprep.subr.bf16.mxu1 %v3397_v1  ;;  %v3335_v5 = vld [vmem:[%s4123_s4 + $0x1a8] sm:$0xff]  }
  0x79   : > { %3036 = vmatprep.subr.bf16.mxu0 %v3397_v1 }
  0x7b   : > { %2877 = vmatpush3.bf16.msra.mxu1 %v3285_v6  ;;  %v3336_v6 = vld [vmem:[%s4123_s4 + $0x3a8] sm:$0xff]  }
  0x7c   : > { %3037 = vmatpush3.bf16.msra.mxu0 %v3286_v7  ;;  %2878 = vmatprep.subr.bf16.mxu1 %v3397_v1  ;;  %v3337_v7 = vld [vmem:[%s4123_s4 + $0x1b0] sm:$0xff]  }
  0x7d   : > { %3038 = vmatprep.subr.bf16.mxu0 %v3397_v1 }
  0x7f   : > { %2879 = vmatpush3.bf16.msra.mxu1 %v3287_v8  ;;  %v3338_v8 = vld [vmem:[%s4123_s4 + $0x3b0] sm:$0xff]  }
  0x80   : > { %3039 = vmatpush3.bf16.msra.mxu0 %v3288_v9  ;;  %2880 = vmatprep.subr.bf16.mxu1 %v3397_v1  ;;  %v3339_v9 = vld [vmem:[%s4123_s4 + $0x1b8] sm:$0xff]  }
  0x81   : > { %3040 = vmatprep.subr.bf16.mxu0 %v3397_v1 }
  0x83   : > { %2881 = vmatpush3.bf16.msra.mxu1 %v3289_v10  ;;  %v1005_v10 = vld [vmem:[%s3580_s16 + $0x1] sm:$0xf] }
  0x84   : > { %3041 = vmatpush3.bf16.msra.mxu0 %v3290_v11  ;;  %2882 = vmatprep.subr.bf16.mxu1 %v3397_v1  ;;  %v3340_v11 = vld [vmem:[%s4123_s4 + $0x3b8] sm:$0xff]  }
  0x85   : > { %3042 = vmatprep.subr.bf16.mxu0 %v3397_v1 }
  0x87   : > { %2883 = vmatpush3.bf16.msra.mxu1 %v3291_v12  ;;  %v2612_v12 = vld [vmem:[%s3580_s16 + $0x9] sm:$0xf] }
  0x88   : > { %3043 = vmatpush3.bf16.msra.mxu0 %v3292_v13  ;;  %2888 = vmatprep.subr.bf16.mxu1 %v3397_v1  ;;  %v1006_v13 = vpack.c.bf16 %v1005_v10, %v1005_v10  ;;  %v1876_v15 = vpack.c.bf16 %v2612_v12, %v2612_v12 }
  0x89   : > { %3048 = vmatprep.subr.bf16.mxu0 %v3397_v1 }
  0x8a   : > { %2885 = vmatmul.mubr.bf16.vlgmr.msra.gmra.mrb[0].mxu1 %v680_v16  ;;  %v3342_v16 = vld [vmem:[%s4123_s4 + $0x3c0] sm:$0xff]  }
  0x8b   : > { %2889 = vmatpush3.bf16.msra.mxu1 %v3293_v17  ;;  %3045 = vmatmul.mubr.bf16.vlgmr.msra.gmra.mrb[0].mxu0 %v1550_v18  ;;  %v3343_v17 = vld [vmem:[%s4123_s4 + $0x1c8] sm:$0xff]  }
  0x8c   : > { %3049 = vmatpush3.bf16.msra.mxu0 %v3294_v19  ;;  %2890 = vmatprep.subr.bf16.mxu1 %v3397_v1  ;;  %v3344_v18 = vld [vmem:[%s4123_s4 + $0x3c8] sm:$0xff]   ;;  %v3345_v19 = vld [vmem:[%s4123_s4 + $0x1d0] sm:$0xff]  }
  0x8d   : > { %3050 = vmatprep.subr.bf16.mxu0 %v3397_v1  ;;  %2904 = vmatprep.mubr.msk.bf16.mxu1 %vm3398_vm0, %v3397_v1 }
  0x8e   : > { %3064 = vmatprep.mubr.msk.bf16.mxu0 %vm3398_vm0, %v3397_v1 }
  0x8f   : > { %2891 = vmatpush3.bf16.msra.mxu1 %v3295_v20  ;;  %v3346_v20 = vld [vmem:[%s4123_s4 + $0x3d0] sm:$0xff]  }
  0x90   : > { %3051 = vmatpush3.bf16.msra.mxu0 %v3296_v21  ;;  %2892 = vmatprep.subr.bf16.mxu1 %v3397_v1  ;;  %v3347_v21 = vld [vmem:[%s4123_s4 + $0x1d8] sm:$0xff]  }
  0x91   : > { %3052 = vmatprep.subr.bf16.mxu0 %v3397_v1 }
  0x93   : > { %2893 = vmatpush3.bf16.msra.mxu1 %v3297_v22  ;;  %v3348_v22 = vld [vmem:[%s4123_s4 + $0x3d8] sm:$0xff]  }
  0x94   : > { %3053 = vmatpush3.bf16.msra.mxu0 %v3298_v23  ;;  %2894 = vmatprep.subr.bf16.mxu1 %v3397_v1  ;;  %v3349_v23 = vld [vmem:[%s4123_s4 + $0x1e0] sm:$0xff]  }
  0x95   : > { %3054 = vmatprep.subr.bf16.mxu0 %v3397_v1 }
  0x97   : > { %2895 = vmatpush3.bf16.msra.mxu1 %v3299_v24  ;;  %v3350_v24 = vld [vmem:[%s4123_s4 + $0x3e0] sm:$0xff]  }
  0x98   : > { %3055 = vmatpush3.bf16.msra.mxu0 %v3300_v25  ;;  %2896 = vmatprep.subr.bf16.mxu1 %v3397_v1  ;;  %v3351_v25 = vld [vmem:[%s4123_s4 + $0x1e8] sm:$0xff]  }
  0x99   : > { %3056 = vmatprep.subr.bf16.mxu0 %v3397_v1 }
  0x9b   : > { %2897 = vmatpush3.bf16.msra.mxu1 %v3301_v26  ;;  %v3352_v26 = vld [vmem:[%s4123_s4 + $0x3e8] sm:$0xff]  }
  0x9c   : > { %3057 = vmatpush3.bf16.msra.mxu0 %v3302_v27  ;;  %2898 = vmatprep.subr.bf16.mxu1 %v3397_v1  ;;  %v3353_v27 = vld [vmem:[%s4123_s4 + $0x1f0] sm:$0xff]  }
  0x9d   : > { %3058 = vmatprep.subr.bf16.mxu0 %v3397_v1 }
  0x9f   : > { %2899 = vmatpush3.bf16.msra.mxu1 %v3303_v28  ;;  %v3354_v28 = vld [vmem:[%s4123_s4 + $0x3f0] sm:$0xff]  }
  0xa0   : > { %3059 = vmatpush3.bf16.msra.mxu0 %v3304_v29  ;;  %2900 = vmatprep.subr.bf16.mxu1 %v3397_v1  ;;  %v3355_v29 = vld [vmem:[%s4123_s4 + $0x1f8] sm:$0xff]  }
  0xa1   : > { %3060 = vmatprep.subr.bf16.mxu0 %v3397_v1 }
  0xa3   : > { %2901 = vmatpush3.bf16.msra.mxu1 %v3305_v30  ;;  %v1113_v30 = vld [vmem:[%s3657_s9 + $0x1] sm:$0xf] }
  0xa4   : > { %3061 = vmatpush3.bf16.msra.mxu0 %v3306_v31  ;;  %2902 = vmatprep.subr.bf16.mxu1 %v3397_v1  ;;  %v3356_v31 = vld [vmem:[%s4123_s4 + $0x3f8] sm:$0xff]   ;;  %v1114_v33 = vpack.c.bf16 %v1113_v30, %v1113_v30 }
  0xa5   : > { %3062 = vmatprep.subr.bf16.mxu0 %v3397_v1 }
  0xa7   : > { %2903 = vmatpush3.bf16.msra.mxu1 %v3307_v32  ;;  %v2637_v32 = vld [vmem:[%s3657_s9 + $0x9] sm:$0xf] }
  0xa8   : > { %3063 = vmatpush3.bf16.msra.mxu0 %v3308_v34  ;;  %2908 = vmatprep.subr.bf16.mxu1 %v3397_v1  ;;  %v1984_v34 = vpack.c.bf16 %v2637_v32, %v2637_v32 }
  0xa9   : > { %3068 = vmatprep.subr.bf16.mxu0 %v3397_v1 }
  0xaa   : > { %2905 = vmatmul.mubr.bf16.vlgmr.msra.gmra.mrb[0].mxu1 %v789_v36 }
  0xab   : > { %2909 = vmatpush3.bf16.msra.mxu1 %v3309_v37  ;;  %3065 = vmatmul.mubr.bf16.vlgmr.msra.gmra.mrb[0].mxu0 %v1659_v38 }
  0xac   : > { %3069 = vmatpush3.bf16.msra.mxu0 %v3310_v39  ;;  %2910 = vmatprep.subr.bf16.mxu1 %v3397_v1 }
  0xad   : > { %3070 = vmatprep.subr.bf16.mxu0 %v3397_v1  ;;  %2924 = vmatprep.mubr.msk.bf16.mxu1 %vm3398_vm0, %v3397_v1 }
  0xae   : > { %3084 = vmatprep.mubr.msk.bf16.mxu0 %vm3398_vm0, %v3397_v1 }
  0xaf   : > { %2911 = vmatpush3.bf16.msra.mxu1 %v3311_v40 }
  0xb0   : > { %3071 = vmatpush3.bf16.msra.mxu0 %v3312_v41  ;;  %2912 = vmatprep.subr.bf16.mxu1 %v3397_v1 }
  0xb1   : > { %3072 = vmatprep.subr.bf16.mxu0 %v3397_v1 }
  0xb3   : > { %2913 = vmatpush3.bf16.msra.mxu1 %v3313_v42 }
  0xb4   : > { %3073 = vmatpush3.bf16.msra.mxu0 %v3314_v43  ;;  %2914 = vmatprep.subr.bf16.mxu1 %v3397_v1  ;;  %v3399_v43 = vmov (!%p4074_p8), 0.0  }
  0xb5   : > { %3074 = vmatprep.subr.bf16.mxu0 %v3397_v1  ;;  %2098 = vst [vmem:[%s4125_s6] sm:$0x1] (!%p4074_p8), %v3399_v43  ;;  %2099 = vst [vmem:[%s4126_s7] sm:$0x1] (!%p4074_p8), %v3399_v43 }
  0xb7   : > { %2915 = vmatpush3.bf16.msra.mxu1 %v3315_v44 }
  0xb8   : > { %3075 = vmatpush3.bf16.msra.mxu0 %v3316_v45  ;;  %2916 = vmatprep.subr.bf16.mxu1 %v3397_v1 }
  0xb9   : > { %3076 = vmatprep.subr.bf16.mxu0 %v3397_v1 }
  0xbb   : > { %2917 = vmatpush3.bf16.msra.mxu1 %v3317_v46 }
  0xbc   : > { %3077 = vmatpush3.bf16.msra.mxu0 %v3318_v47  ;;  %2918 = vmatprep.subr.bf16.mxu1 %v3397_v1 }
  0xbd   : > { %3078 = vmatprep.subr.bf16.mxu0 %v3397_v1 }
  0xbf   : > { %2919 = vmatpush3.bf16.msra.mxu1 %v3319_v48 }
  0xc0   : > { %3079 = vmatpush3.bf16.msra.mxu0 %v3320_v49  ;;  %2920 = vmatprep.subr.bf16.mxu1 %v3397_v1 }
  0xc1   : > { %3080 = vmatprep.subr.bf16.mxu0 %v3397_v1 }
  0xc3   : > { %2921 = vmatpush3.bf16.msra.mxu1 %v3321_v50 }
  0xc4   : > { %3081 = vmatpush3.bf16.msra.mxu0 %v3322_v51  ;;  %2922 = vmatprep.subr.bf16.mxu1 %v3397_v1 }
  0xc5   : > { %3082 = vmatprep.subr.bf16.mxu0 %v3397_v1 }
  0xc7   : > { %2923 = vmatpush3.bf16.msra.mxu1 %v3323_v52 }
  0xc8   : > { %3083 = vmatpush3.bf16.msra.mxu0 %v3324_v54  ;;  %2928 = vmatprep.subr.bf16.mxu1 %v3397_v1 }
  0xc9   : > { %3088 = vmatprep.subr.bf16.mxu0 %v3397_v1 }
  0xca   : > { %2925 = vmatmul.mubr.bf16.vlgmr.msra.gmra.mrb[0].mxu1 %v898_v56 }
  0xcb   : > { %2929 = vmatpush3.bf16.msra.mxu1 %v3325_v57  ;;  %3085 = vmatmul.mubr.bf16.vlgmr.msra.gmra.mrb[0].mxu0 %v1768_v58 }
  0xcc   : > { %3089 = vmatpush3.bf16.msra.mxu0 %v3326_v59  ;;  %2930 = vmatprep.subr.bf16.mxu1 %v3397_v1 }
  0xcd   : > { %3090 = vmatprep.subr.bf16.mxu0 %v3397_v1  ;;  %2944 = vmatprep.mubr.msk.bf16.mxu1 %vm3398_vm0, %v3397_v1 }
  0xce   : > { %3104 = vmatprep.mubr.msk.bf16.mxu0 %vm3398_vm0, %v3397_v1 }
  0xcf   : > { %2931 = vmatpush3.bf16.msra.mxu1 %v3327_v60 }
  0xd0   : > { %3091 = vmatpush3.bf16.msra.mxu0 %v3328_v61  ;;  %2932 = vmatprep.subr.bf16.mxu1 %v3397_v1 }
  0xd1   : > { %3092 = vmatprep.subr.bf16.mxu0 %v3397_v1 }
  0xd3   : > { %2933 = vmatpush3.bf16.msra.mxu1 %v3329_v62 }
  0xd4   : > { %3093 = vmatpush3.bf16.msra.mxu0 %v3330_v63  ;;  %2934 = vmatprep.subr.bf16.mxu1 %v3397_v1 }
  0xd5   : > { %3094 = vmatprep.subr.bf16.mxu0 %v3397_v1 }
  0xd7   : > { %2935 = vmatpush3.bf16.msra.mxu1 %v3331_v0 }
  0xd8   : > { %3095 = vmatpush3.bf16.msra.mxu0 %v3332_v2  ;;  %2936 = vmatprep.subr.bf16.mxu1 %v3397_v1 }
  0xd9   : > { %3096 = vmatprep.subr.bf16.mxu0 %v3397_v1 }
  0xdb   : > { %2937 = vmatpush3.bf16.msra.mxu1 %v3333_v3 }
  0xdc   : > { %3097 = vmatpush3.bf16.msra.mxu0 %v3334_v4  ;;  %2938 = vmatprep.subr.bf16.mxu1 %v3397_v1 }
  0xdd   : > { %3098 = vmatprep.subr.bf16.mxu0 %v3397_v1 }
  0xdf   : > { %2939 = vmatpush3.bf16.msra.mxu1 %v3335_v5 }
  0xe0   : > { %3099 = vmatpush3.bf16.msra.mxu0 %v3336_v6  ;;  %2940 = vmatprep.subr.bf16.mxu1 %v3397_v1 }
  0xe1   : > { %3100 = vmatprep.subr.bf16.mxu0 %v3397_v1 }
  0xe3   : > { %2941 = vmatpush3.bf16.msra.mxu1 %v3337_v7 }
  0xe4   : > { %3101 = vmatpush3.bf16.msra.mxu0 %v3338_v8  ;;  %2942 = vmatprep.subr.bf16.mxu1 %v3397_v1 }
  0xe5   : > { %3102 = vmatprep.subr.bf16.mxu0 %v3397_v1 }
  0xe7   : > { %2943 = vmatpush3.bf16.msra.mxu1 %v3339_v9 }
  0xe8   : > { %3103 = vmatpush3.bf16.msra.mxu0 %v3340_v11  ;;  %2948 = vmatprep.subr.bf16.mxu1 %v3397_v1 }
  0xe9   : > { %3108 = vmatprep.subr.bf16.mxu0 %v3397_v1 }
  0xea   : > { %2945 = vmatmul.mubr.bf16.vlgmr.msra.gmra.mrb[0].mxu1 %v1006_v13 }
  0xeb   : > { %2949 = vmatpush3.bf16.msra.mxu1 %v3341_v14  ;;  %3105 = vmatmul.mubr.bf16.vlgmr.msra.gmra.mrb[0].mxu0 %v1876_v15 }
  0xec   : > { %3109 = vmatpush3.bf16.msra.mxu0 %v3342_v16  ;;  %2950 = vmatprep.subr.bf16.mxu1 %v3397_v1 }
  0xed   : > { %3110 = vmatprep.subr.bf16.mxu0 %v3397_v1  ;;  %2964 = vmatprep.mubr.msk.bf16.mxu1 %vm3398_vm0, %v3397_v1 }
  0xee   : > { %3124 = vmatprep.mubr.msk.bf16.mxu0 %vm3398_vm0, %v3397_v1 }
  0xef   : > { %2951 = vmatpush3.bf16.msra.mxu1 %v3343_v17 }
  0xf0   : > { %3111 = vmatpush3.bf16.msra.mxu0 %v3344_v18  ;;  %2952 = vmatprep.subr.bf16.mxu1 %v3397_v1 }
  0xf1   : > { %3112 = vmatprep.subr.bf16.mxu0 %v3397_v1 }
  0xf3   : > { %2953 = vmatpush3.bf16.msra.mxu1 %v3345_v19 }
  0xf4   : > { %3113 = vmatpush3.bf16.msra.mxu0 %v3346_v20  ;;  %2954 = vmatprep.subr.bf16.mxu1 %v3397_v1 }
  0xf5   : > { %3114 = vmatprep.subr.bf16.mxu0 %v3397_v1 }
  0xf7   : > { %2955 = vmatpush3.bf16.msra.mxu1 %v3347_v21 }
  0xf8   : > { %3115 = vmatpush3.bf16.msra.mxu0 %v3348_v22  ;;  %2956 = vmatprep.subr.bf16.mxu1 %v3397_v1 }
  0xf9   : > { %3116 = vmatprep.subr.bf16.mxu0 %v3397_v1 }
  0xfb   : > { %2957 = vmatpush3.bf16.msra.mxu1 %v3349_v23 }
  0xfc   : > { %3117 = vmatpush3.bf16.msra.mxu0 %v3350_v24  ;;  %2958 = vmatprep.subr.bf16.mxu1 %v3397_v1 }
  0xfd   : > { %3118 = vmatprep.subr.bf16.mxu0 %v3397_v1 }
  0xff   : > { %2959 = vmatpush3.bf16.msra.mxu1 %v3351_v25 }
 0x100   : > { %3119 = vmatpush3.bf16.msra.mxu0 %v3352_v26  ;;  %2960 = vmatprep.subr.bf16.mxu1 %v3397_v1 }
 0x101   : > { %3120 = vmatprep.subr.bf16.mxu0 %v3397_v1 }
 0x103   : > { %2961 = vmatpush3.bf16.msra.mxu1 %v3353_v27 }
 0x104   : > { %3121 = vmatpush3.bf16.msra.mxu0 %v3354_v28  ;;  %2962 = vmatprep.subr.bf16.mxu1 %v3397_v1 }
 0x105   : > { %3122 = vmatprep.subr.bf16.mxu0 %v3397_v1 }
 0x107   : > { %2963 = vmatpush3.bf16.msra.mxu1 %v3355_v29 }
 0x108   : > { %3123 = vmatpush3.bf16.msra.mxu0 %v3356_v31 }
 0x10a   : > { %2965 = vmatmul.mubr.bf16.vlgmr.msra.gmra.mrb[0].mxu1 %v1114_v33 }
 0x10b   : > { %3125 = vmatmul.mubr.bf16.vlgmr.msra.gmra.mrb[0].mxu0 %v1984_v34 }
 0x1db   : > { %2097 = sbr.rel (%p4074_p8) target bundleno = 482 (0x1e2), region = 44 }
 0x1dd   : > { %v1214_v35 = vpop.f32.mrb[0].mxu1 }
 0x1de   : > { %v2084_v1 = vpop.f32.mrb[0].mxu0  ;;  %v2966_v36 = vpop.f32.mrb[1].mxu1 }
 0x1df   : > { %v3128_v37 = vadd.f32 %v2084_v1, %v1214_v35  ;;  %v3126_v38 = vpop.f32.mrb[1].mxu0  ;;  %v1217_v39 = vpop.f32.mrb[2].mxu1 }
 0x1e0   : > { %v2087_v40 = vpop.f32.mrb[2].mxu0  ;;  %v2967_v41 = vpop.f32.mrb[3].mxu1 }
 0x1e1   : > { %2091 = vst [vmem:[%s353_s13] sm:$0xf] %v3128_v37  ;;  %v3127_v42 = vpop.f32.mrb[3].mxu0 }
 0x1e2 PF: > { %vm2101_vm1 = vcmask 1043456   ;;  %v2112_v44 = vmul.f32 %v3128_v37, %v3128_v37  ;;  %v2100_v56 = vld [vmem:[%s4125_s6] sm:$0x1] }
 0x1e3   : > { %v2102_v45 = vsel %vm2101_vm1, %v3128_v37, 0.0  ;;  %v2111_v59 = vld [vmem:[%s4126_s7] sm:$0x1] }
 0x1e4   : > { %v2103_v46 = vrot.slane %v2102_v45, 4  ;;  %v2113_v47 = vsel %vm2101_vm1, %v2112_v44, 0.0 }
 0x1e5   : > { %v2114_v48 = vrot.slane %v2113_v47, 4 }
 0x1e6   : > { %v2104_v49 = vadd.f32 %v2103_v46, %v2102_v45 }
 0x1e7   : > { %v2115_v50 = vadd.f32 %v2114_v48, %v2113_v47 }
 0x1e8   : > { %v2105_v51 = vrot.slane %v2104_v49, 2 }
 0x1e9   : > { %v2116_v52 = vrot.slane %v2115_v50, 2 }
 0x1ea   : > { %v2106_v53 = vadd.f32 %v2105_v51, %v2104_v49 }
 0x1eb   : > { %v2117_v54 = vadd.f32 %v2116_v52, %v2115_v50 }
 0x1ec   : > { %v2107_v55 = vrot.slane %v2106_v53, 1 }
 0x1ed   : > { %v2118_v57 = vrot.slane %v2117_v54, 1 }
 0x1ee   : > { %v2108_v58 = vadd.f32 %v2107_v55, %v2106_v53 }
 0x1ef   : > { %v2119_v60 = vadd.f32 %v2118_v57, %v2117_v54 }
 0x1f0   : > { %v2109_v61 = vadd.f32 %v2108_v58, %v2100_v56 }
 0x1f1   : > { %v2120_v62 = vadd.f32 %v2119_v60, %v2111_v59 }
 0x1f2   : > { %2110 = vst [vmem:[%s4125_s6] sm:$0x1] %v2109_v61 }
 0x1f3   : > { %2121 = vst [vmem:[%s4126_s7] sm:$0x1] %v2120_v62 }
 0x1f4 PF: > { %s18_s28 = sadd.s32 1, %s3395_s28   ;;  %s4128_s24 = smov %s3387_s26 }
 0x1f5   : > { %p15_p10 = scmp.ge.s32.totalorder %s18_s28, 10   ;;  %s4129_s25 = smov %s3391_s27 }
 0x1f6   : > { %s4130_s26 = smov %s4133_s29  ;;  %s4131_s27 = smov %s4137_s30 }
 0x1f7   :  { %17 = sbr.rel (!%p15_p10) target bundleno = 3 (0x3), region = 122 }

// kernel: discriminator_forward.13
= control target key start
LH: loop header
LB: loop body
LE: loop exit
PB: predicated region body
PF: predicated region fallthrough
CT: control target
= control target key end

     0   :  { %s3090_s9 = smov 0   ;;  %s3092_s10 = smov 0   ;;  %s3693_s0 = inlined_call_operand.vmem [shape: f32[2,4,4,128], index: 0, kind: input, shape index: {}]   ;;  %s3694_s1 = inlined_call_operand.vmem [shape: bf16[16,128,128], index: 1, kind: input, shape index: {}]   ;;  %s3695_s2 = inlined_call_operand.vmem [shape: f32[2,1,1,128], index: 2, kind: output, shape index: {}]  }
   0x1   :  { %s3094_s11 = smov 0  }
   0x2 LB: > { %s24_s12 = sadd.s32 1, %s3067_s10  ;;  %p1984_p0 = scmp.ge.s32.totalorder %s3071_s11, 1  ;;  %s3071_s11 = sphi %s3094_s11, %s12_s11   ;;  %s3067_s10 = sphi %s3092_s10, %s3697_s10   ;;  %s3063_s9 = sphi %s3090_s9, %s3696_s9  }
   0x3   : > { %p26_p1 = scmp.ge.s32.totalorder %s24_s12, 2  ;;  %p126_p2 = scmp.lt.s32.totalorder %s3071_s11, 3 }
   0x5   : > { %s3699_s12 = smov (%p26_p1, %s24_s12), 0  ;;  %p127_p3 = pnand %p1984_p0, %p126_p2 }
   0x6   : > { %v2917_v0 = vld [vmem:[%s3694_s1 + $0x40] sm:$0xff] (!%p127_p3)   ;;  %v3073_v1 = vmov (!%p127_p3), 0.0   ;;  %v2919_v3 = vld [vmem:[%s3694_s1 + $0x48] sm:$0xff] (!%p127_p3)   ;;  %vm3074_vm0 = vmmov (!%p127_p3), 0   ;;  %v2921_v5 = vld [vmem:[%s3694_s1 + $0x50] sm:$0xff] (!%p127_p3)   ;;  %p149_p4 = scmp.lt.s32.totalorder (!%p127_p3), %s3063_s9, 1 }
   0x7   : > { %130 = sbr.rel (%p127_p3) target bundleno = 507 (0x1fb), region = 28  ;;  %2514 = vmatprep.subr.bf16.mxu1 (!%p127_p3), %v3073_v1  ;;  %2674 = vmatprep.subr.bf16.mxu0 (!%p127_p3), %v3073_v1  ;;  %v2918_v2 = vld [vmem:[%s3694_s1 + $0x200] sm:$0xff] (!%p127_p3)   ;;  %v2920_v4 = vld [vmem:[%s3694_s1 + $0x208] sm:$0xff] (!%p127_p3)   ;;  %v2922_v6 = vld [vmem:[%s3694_s1 + $0x210] sm:$0xff] (!%p127_p3)  }
   0x8   : > { %2515 = vmatpush3.bf16.msra.mxu1 (!%p127_p3), %v2917_v0  ;;  %2530 = vmatprep.mubr.msk.bf16.mxu1 (!%p127_p3), %vm3074_vm0, %v3073_v1  ;;  %v2923_v7 = vld [vmem:[%s3694_s1 + $0x58] sm:$0xff] (!%p127_p3)   ;;  %v2925_v9 = vld [vmem:[%s3694_s1 + $0x60] sm:$0xff] (!%p127_p3)   ;;  %v2927_v11 = vld [vmem:[%s3694_s1 + $0x68] sm:$0xff] (!%p127_p3)  }
   0x9   : > { %2675 = vmatpush3.bf16.msra.mxu0 (!%p127_p3), %v2918_v2  ;;  %2516 = vmatprep.subr.bf16.mxu1 (!%p127_p3), %v3073_v1  ;;  %v2924_v8 = vld [vmem:[%s3694_s1 + $0x218] sm:$0xff] (!%p127_p3)   ;;  %v2926_v10 = vld [vmem:[%s3694_s1 + $0x220] sm:$0xff] (!%p127_p3)   ;;  %v2928_v12 = vld [vmem:[%s3694_s1 + $0x228] sm:$0xff] (!%p127_p3)  }
   0xa   : > { %2676 = vmatprep.subr.bf16.mxu0 (!%p127_p3), %v3073_v1  ;;  %2690 = vmatprep.mubr.msk.bf16.mxu0 (!%p127_p3), %vm3074_vm0, %v3073_v1  ;;  %v2929_v13 = vld [vmem:[%s3694_s1 + $0x70] sm:$0xff] (!%p127_p3)   ;;  %v2931_v15 = vld [vmem:[%s3694_s1 + $0x78] sm:$0xff] (!%p127_p3)   ;;  %v2933_v20 = vld [vmem:[%s3694_s1] sm:$0xff] (!%p127_p3)  }
   0xb   : > { %v2930_v14 = vld [vmem:[%s3694_s1 + $0x230] sm:$0xff] (!%p127_p3)   ;;  %v2932_v16 = vld [vmem:[%s3694_s1 + $0x238] sm:$0xff] (!%p127_p3)   ;;  %v2934_v22 = vld [vmem:[%s3694_s1 + $0x240] sm:$0xff] (!%p127_p3)  }
   0xc   : > { %2517 = vmatpush3.bf16.msra.mxu1 (!%p127_p3), %v2919_v3  ;;  %v2935_v23 = vld [vmem:[%s3694_s1 + $0x8] sm:$0xff] (!%p127_p3)   ;;  %v2937_v25 = vld [vmem:[%s3694_s1 + $0x10] sm:$0xff] (!%p127_p3)   ;;  %v2939_v27 = vld [vmem:[%s3694_s1 + $0x18] sm:$0xff] (!%p127_p3)  }
   0xd   : > { %2677 = vmatpush3.bf16.msra.mxu0 (!%p127_p3), %v2920_v4  ;;  %2518 = vmatprep.subr.bf16.mxu1 (!%p127_p3), %v3073_v1  ;;  %v2936_v24 = vld [vmem:[%s3694_s1 + $0x248] sm:$0xff] (!%p127_p3)   ;;  %v2938_v26 = vld [vmem:[%s3694_s1 + $0x250] sm:$0xff] (!%p127_p3)   ;;  %v2940_v28 = vld [vmem:[%s3694_s1 + $0x258] sm:$0xff] (!%p127_p3)  }
   0xe   : > { %2678 = vmatprep.subr.bf16.mxu0 %v3073_v1  ;;  %s3701_s9 = smov (!%p149_p4, %s3063_s9), 1  ;;  %v2941_v29 = vld [vmem:[%s3694_s1 + $0x20] sm:$0xff]   ;;  %v2943_v31 = vld [vmem:[%s3694_s1 + $0x28] sm:$0xff]   ;;  %v2945_v33 = vld [vmem:[%s3694_s1 + $0x30] sm:$0xff]  }
   0xf   : > { %s2369_s13 = sshll.u32 %s3701_s9, 4  ;;  %v2942_v30 = vld [vmem:[%s3694_s1 + $0x260] sm:$0xff]   ;;  %v2944_v32 = vld [vmem:[%s3694_s1 + $0x268] sm:$0xff]   ;;  %v2946_v34 = vld [vmem:[%s3694_s1 + $0x270] sm:$0xff]   ;;  %s159_s19 = scalar_lea.vmem %s3695_s2, %s3701_s9 }
  0x10   : > { %2519 = vmatpush3.bf16.msra.mxu1 %v2921_v5  ;;  %s3177_s20 = scalar_lea.vmem %s3693_s0, %s2369_s13  ;;  %v2947_v35 = vld [vmem:[%s3694_s1 + $0x38] sm:$0xff]   ;;  %v2949_v40 = vld [vmem:[%s3694_s1 + $0x80] sm:$0xff]   ;;  %v2951_v43 = vld [vmem:[%s3694_s1 + $0x88] sm:$0xff]  }
  0x11   : > { %2679 = vmatpush3.bf16.msra.mxu0 %v2922_v6  ;;  %2520 = vmatprep.subr.bf16.mxu1 %v3073_v1  ;;  %v181_v17 = vld [vmem:[%s3177_s20 + $0x1] sm:$0x1]  ;;  %v2167_v18 = vld [vmem:[%s3177_s20 + $0x8] sm:$0x1]  ;;  %v2948_v36 = vld [vmem:[%s3694_s1 + $0x278] sm:$0xff]  }
  0x12   : > { %2680 = vmatprep.subr.bf16.mxu0 %v3073_v1  ;;  %v182_v19 = vpack.c.bf16 %v181_v17, %v181_v17  ;;  %v1031_v21 = vpack.c.bf16 %v2167_v18, %v2167_v18  ;;  %v163_v37 = vld [vmem:[%s3177_s20] sm:$0x1]  ;;  %v2192_v38 = vld [vmem:[%s3177_s20 + $0x9] sm:$0x1]  ;;  %v2953_v45 = vld [vmem:[%s3694_s1 + $0x90] sm:$0xff]  }
  0x13   : > { %v164_v39 = vpack.c.bf16 %v163_v37, %v163_v37  ;;  %v1139_v41 = vpack.c.bf16 %v2192_v38, %v2192_v38  ;;  %v2950_v42 = vld [vmem:[%s3694_s1 + $0x280] sm:$0xff]   ;;  %v2952_v44 = vld [vmem:[%s3694_s1 + $0x288] sm:$0xff]   ;;  %v2954_v46 = vld [vmem:[%s3694_s1 + $0x290] sm:$0xff]  }
  0x14   : > { %2521 = vmatpush3.bf16.msra.mxu1 %v2923_v7  ;;  %v2955_v47 = vld [vmem:[%s3694_s1 + $0x98] sm:$0xff]   ;;  %v2957_v49 = vld [vmem:[%s3694_s1 + $0xa0] sm:$0xff]   ;;  %v2959_v51 = vld [vmem:[%s3694_s1 + $0xa8] sm:$0xff]  }
  0x15   : > { %2681 = vmatpush3.bf16.msra.mxu0 %v2924_v8  ;;  %2522 = vmatprep.subr.bf16.mxu1 %v3073_v1  ;;  %v2956_v48 = vld [vmem:[%s3694_s1 + $0x298] sm:$0xff]   ;;  %v2958_v50 = vld [vmem:[%s3694_s1 + $0x2a0] sm:$0xff]   ;;  %v2960_v52 = vld [vmem:[%s3694_s1 + $0x2a8] sm:$0xff]  }
  0x16   : > { %2682 = vmatprep.subr.bf16.mxu0 %v3073_v1  ;;  %v2961_v53 = vld [vmem:[%s3694_s1 + $0xb0] sm:$0xff]   ;;  %v2963_v55 = vld [vmem:[%s3694_s1 + $0xb8] sm:$0xff]   ;;  %v376_v57 = vld [vmem:[%s3177_s20 + $0x2] sm:$0x1] }
  0x17   : > { %v2962_v54 = vld [vmem:[%s3694_s1 + $0x2b0] sm:$0xff]   ;;  %v2964_v56 = vld [vmem:[%s3694_s1 + $0x2b8] sm:$0xff]   ;;  %v2217_v58 = vld [vmem:[%s3177_s20 + $0xa] sm:$0x1]  ;;  %v377_v59 = vpack.c.bf16 %v376_v57, %v376_v57 }
  0x18   : > { %2523 = vmatpush3.bf16.msra.mxu1 %v2925_v9  ;;  %v2965_v60 = vld [vmem:[%s3694_s1 + $0xc0] sm:$0xff]   ;;  %v1247_v61 = vpack.c.bf16 %v2217_v58, %v2217_v58  ;;  %v2967_v63 = vld [vmem:[%s3694_s1 + $0xc8] sm:$0xff]   ;;  %v2969_v2 = vld [vmem:[%s3694_s1 + $0xd0] sm:$0xff]  }
  0x19   : > { %2683 = vmatpush3.bf16.msra.mxu0 %v2926_v10  ;;  %2524 = vmatprep.subr.bf16.mxu1 %v3073_v1  ;;  %v2966_v62 = vld [vmem:[%s3694_s1 + $0x2c0] sm:$0xff]   ;;  %v2968_v0 = vld [vmem:[%s3694_s1 + $0x2c8] sm:$0xff]   ;;  %v2970_v3 = vld [vmem:[%s3694_s1 + $0x2d0] sm:$0xff]  }
  0x1a   : > { %2684 = vmatprep.subr.bf16.mxu0 %v3073_v1  ;;  %v2971_v4 = vld [vmem:[%s3694_s1 + $0xd8] sm:$0xff]   ;;  %v2973_v6 = vld [vmem:[%s3694_s1 + $0xe0] sm:$0xff]   ;;  %v2975_v8 = vld [vmem:[%s3694_s1 + $0xe8] sm:$0xff]  }
  0x1b   : > { %v2972_v5 = vld [vmem:[%s3694_s1 + $0x2d8] sm:$0xff]   ;;  %v2974_v7 = vld [vmem:[%s3694_s1 + $0x2e0] sm:$0xff]   ;;  %v2976_v9 = vld [vmem:[%s3694_s1 + $0x2e8] sm:$0xff]  }
  0x1c   : > { %2525 = vmatpush3.bf16.msra.mxu1 %v2927_v11  ;;  %v2977_v10 = vld [vmem:[%s3694_s1 + $0xf0] sm:$0xff]   ;;  %v2981_v17 = vld [vmem:[%s3694_s1 + $0x100] sm:$0xff]  }
  0x1d   : > { %2685 = vmatpush3.bf16.msra.mxu0 %v2928_v12  ;;  %2526 = vmatprep.subr.bf16.mxu1 %v3073_v1  ;;  %v2978_v11 = vld [vmem:[%s3694_s1 + $0x2f0] sm:$0xff]   ;;  %v2979_v12 = vld [vmem:[%s3694_s1 + $0xf8] sm:$0xff]   ;;  %v2997_v37 = vld [vmem:[%s3694_s1 + $0x140] sm:$0xff]  }
  0x1e   : > { %2686 = vmatprep.subr.bf16.mxu0 %v3073_v1  ;;  %v3013_v57 = vld [vmem:[%s3694_s1 + $0x180] sm:$0xff]  }
  0x20   : > { %2527 = vmatpush3.bf16.msra.mxu1 %v2929_v13  ;;  %v2980_v13 = vld [vmem:[%s3694_s1 + $0x2f8] sm:$0xff]  }
  0x21   : > { %2687 = vmatpush3.bf16.msra.mxu0 %v2930_v14  ;;  %2528 = vmatprep.subr.bf16.mxu1 %v3073_v1  ;;  %v484_v14 = vld [vmem:[%s3177_s20 + $0x3] sm:$0x1] }
  0x22   : > { %2688 = vmatprep.subr.bf16.mxu0 %v3073_v1 }
  0x24   : > { %2529 = vmatpush3.bf16.msra.mxu1 %v2931_v15  ;;  %v2242_v15 = vld [vmem:[%s3177_s20 + $0xb] sm:$0x1] }
  0x25   : > { %2689 = vmatpush3.bf16.msra.mxu0 %v2932_v16  ;;  %2534 = vmatprep.subr.bf16.mxu1 %v3073_v1  ;;  %v485_v16 = vpack.c.bf16 %v484_v14, %v484_v14  ;;  %v1355_v18 = vpack.c.bf16 %v2242_v15, %v2242_v15  ;;  %v3029_v14 = vld [vmem:[%s3694_s1 + $0x1c0] sm:$0xff]  }
  0x26   : > { %2694 = vmatprep.subr.bf16.mxu0 %v3073_v1 }
  0x27   : > { %2531 = vmatmul.mubr.bf16.vlgmr.msra.gmra.mrb[0].mxu1 %v182_v19  ;;  %v2982_v19 = vld [vmem:[%s3694_s1 + $0x300] sm:$0xff]  }
  0x28   : > { %2535 = vmatpush3.bf16.msra.mxu1 %v2933_v20  ;;  %2691 = vmatmul.mubr.bf16.vlgmr.msra.gmra.mrb[0].mxu0 %v1031_v21  ;;  %v2983_v20 = vld [vmem:[%s3694_s1 + $0x108] sm:$0xff]  }
  0x29   : > { %2695 = vmatpush3.bf16.msra.mxu0 %v2934_v22  ;;  %2536 = vmatprep.subr.bf16.mxu1 %v3073_v1  ;;  %v2984_v21 = vld [vmem:[%s3694_s1 + $0x308] sm:$0xff]   ;;  %v2985_v22 = vld [vmem:[%s3694_s1 + $0x110] sm:$0xff]  }
  0x2a   : > { %2696 = vmatprep.subr.bf16.mxu0 %v3073_v1  ;;  %2550 = vmatprep.mubr.msk.bf16.mxu1 %vm3074_vm0, %v3073_v1 }
  0x2b   : > { %2710 = vmatprep.mubr.msk.bf16.mxu0 %vm3074_vm0, %v3073_v1 }
  0x2c   : > { %2537 = vmatpush3.bf16.msra.mxu1 %v2935_v23  ;;  %v2986_v23 = vld [vmem:[%s3694_s1 + $0x310] sm:$0xff]  }
  0x2d   : > { %2697 = vmatpush3.bf16.msra.mxu0 %v2936_v24  ;;  %2538 = vmatprep.subr.bf16.mxu1 %v3073_v1  ;;  %v2987_v24 = vld [vmem:[%s3694_s1 + $0x118] sm:$0xff]  }
  0x2e   : > { %2698 = vmatprep.subr.bf16.mxu0 %v3073_v1 }
  0x30   : > { %2539 = vmatpush3.bf16.msra.mxu1 %v2937_v25  ;;  %v2988_v25 = vld [vmem:[%s3694_s1 + $0x318] sm:$0xff]  }
  0x31   : > { %2699 = vmatpush3.bf16.msra.mxu0 %v2938_v26  ;;  %2540 = vmatprep.subr.bf16.mxu1 %v3073_v1  ;;  %v2989_v26 = vld [vmem:[%s3694_s1 + $0x120] sm:$0xff]  }
  0x32   : > { %2700 = vmatprep.subr.bf16.mxu0 %v3073_v1 }
  0x34   : > { %2541 = vmatpush3.bf16.msra.mxu1 %v2939_v27  ;;  %v2990_v27 = vld [vmem:[%s3694_s1 + $0x320] sm:$0xff]  }
  0x35   : > { %2701 = vmatpush3.bf16.msra.mxu0 %v2940_v28  ;;  %2542 = vmatprep.subr.bf16.mxu1 %v3073_v1  ;;  %v2991_v28 = vld [vmem:[%s3694_s1 + $0x128] sm:$0xff]  }
  0x36   : > { %2702 = vmatprep.subr.bf16.mxu0 %v3073_v1 }
  0x38   : > { %2543 = vmatpush3.bf16.msra.mxu1 %v2941_v29  ;;  %v2992_v29 = vld [vmem:[%s3694_s1 + $0x328] sm:$0xff]  }
  0x39   : > { %2703 = vmatpush3.bf16.msra.mxu0 %v2942_v30  ;;  %2544 = vmatprep.subr.bf16.mxu1 %v3073_v1  ;;  %v2993_v30 = vld [vmem:[%s3694_s1 + $0x130] sm:$0xff]  }
  0x3a   : > { %2704 = vmatprep.subr.bf16.mxu0 %v3073_v1 }
  0x3c   : > { %2545 = vmatpush3.bf16.msra.mxu1 %v2943_v31  ;;  %v2994_v31 = vld [vmem:[%s3694_s1 + $0x330] sm:$0xff]  }
  0x3d   : > { %2705 = vmatpush3.bf16.msra.mxu0 %v2944_v32  ;;  %2546 = vmatprep.subr.bf16.mxu1 %v3073_v1  ;;  %v2995_v32 = vld [vmem:[%s3694_s1 + $0x138] sm:$0xff]  }
  0x3e   : > { %2706 = vmatprep.subr.bf16.mxu0 %v3073_v1 }
  0x40   : > { %2547 = vmatpush3.bf16.msra.mxu1 %v2945_v33  ;;  %v2067_v33 = vld [vmem:[%s3177_s20 + $0x4] sm:$0x1] }
  0x41   : > { %2707 = vmatpush3.bf16.msra.mxu0 %v2946_v34  ;;  %2548 = vmatprep.subr.bf16.mxu1 %v3073_v1  ;;  %v2996_v34 = vld [vmem:[%s3694_s1 + $0x338] sm:$0xff]  }
  0x42   : > { %2708 = vmatprep.subr.bf16.mxu0 %v3073_v1 }
  0x44   : > { %2549 = vmatpush3.bf16.msra.mxu1 %v2947_v35  ;;  %v2267_v35 = vld [vmem:[%s3177_s20 + $0xc] sm:$0x1] }
  0x45   : > { %2709 = vmatpush3.bf16.msra.mxu0 %v2948_v36  ;;  %2554 = vmatprep.subr.bf16.mxu1 %v3073_v1  ;;  %v596_v36 = vpack.c.bf16 %v2067_v33, %v2067_v33  ;;  %v1466_v38 = vpack.c.bf16 %v2267_v35, %v2267_v35 }
  0x46   : > { %2714 = vmatprep.subr.bf16.mxu0 %v3073_v1 }
  0x47   : > { %2551 = vmatmul.mubr.bf16.vlgmr.msra.gmra.mrb[0].mxu1 %v164_v39  ;;  %v2998_v39 = vld [vmem:[%s3694_s1 + $0x340] sm:$0xff]  }
  0x48   : > { %2555 = vmatpush3.bf16.msra.mxu1 %v2949_v40  ;;  %2711 = vmatmul.mubr.bf16.vlgmr.msra.gmra.mrb[0].mxu0 %v1139_v41  ;;  %v2999_v40 = vld [vmem:[%s3694_s1 + $0x148] sm:$0xff]  }
  0x49   : > { %2715 = vmatpush3.bf16.msra.mxu0 %v2950_v42  ;;  %2556 = vmatprep.subr.bf16.mxu1 %v3073_v1  ;;  %v3000_v41 = vld [vmem:[%s3694_s1 + $0x348] sm:$0xff]   ;;  %v3001_v42 = vld [vmem:[%s3694_s1 + $0x150] sm:$0xff]  }
  0x4a   : > { %2716 = vmatprep.subr.bf16.mxu0 %v3073_v1  ;;  %2570 = vmatprep.mubr.msk.bf16.mxu1 %vm3074_vm0, %v3073_v1 }
  0x4b   : > { %2730 = vmatprep.mubr.msk.bf16.mxu0 %vm3074_vm0, %v3073_v1 }
  0x4c   : > { %2557 = vmatpush3.bf16.msra.mxu1 %v2951_v43  ;;  %v3002_v43 = vld [vmem:[%s3694_s1 + $0x350] sm:$0xff]  }
  0x4d   : > { %2717 = vmatpush3.bf16.msra.mxu0 %v2952_v44  ;;  %2558 = vmatprep.subr.bf16.mxu1 %v3073_v1  ;;  %v3003_v44 = vld [vmem:[%s3694_s1 + $0x158] sm:$0xff]  }
  0x4e   : > { %2718 = vmatprep.subr.bf16.mxu0 %v3073_v1 }
  0x50   : > { %2559 = vmatpush3.bf16.msra.mxu1 %v2953_v45  ;;  %v3004_v45 = vld [vmem:[%s3694_s1 + $0x358] sm:$0xff]  }
  0x51   : > { %2719 = vmatpush3.bf16.msra.mxu0 %v2954_v46  ;;  %2560 = vmatprep.subr.bf16.mxu1 %v3073_v1  ;;  %v3005_v46 = vld [vmem:[%s3694_s1 + $0x160] sm:$0xff]  }
  0x52   : > { %2720 = vmatprep.subr.bf16.mxu0 %v3073_v1 }
  0x54   : > { %2561 = vmatpush3.bf16.msra.mxu1 %v2955_v47  ;;  %v3006_v47 = vld [vmem:[%s3694_s1 + $0x360] sm:$0xff]  }
  0x55   : > { %2721 = vmatpush3.bf16.msra.mxu0 %v2956_v48  ;;  %2562 = vmatprep.subr.bf16.mxu1 %v3073_v1  ;;  %v3007_v48 = vld [vmem:[%s3694_s1 + $0x168] sm:$0xff]  }
  0x56   : > { %2722 = vmatprep.subr.bf16.mxu0 %v3073_v1 }
  0x58   : > { %2563 = vmatpush3.bf16.msra.mxu1 %v2957_v49  ;;  %v3008_v49 = vld [vmem:[%s3694_s1 + $0x368] sm:$0xff]  }
  0x59   : > { %2723 = vmatpush3.bf16.msra.mxu0 %v2958_v50  ;;  %2564 = vmatprep.subr.bf16.mxu1 %v3073_v1  ;;  %v3009_v50 = vld [vmem:[%s3694_s1 + $0x170] sm:$0xff]  }
  0x5a   : > { %2724 = vmatprep.subr.bf16.mxu0 %v3073_v1 }
  0x5c   : > { %2565 = vmatpush3.bf16.msra.mxu1 %v2959_v51  ;;  %v3010_v51 = vld [vmem:[%s3694_s1 + $0x370] sm:$0xff]  }
  0x5d   : > { %2725 = vmatpush3.bf16.msra.mxu0 %v2960_v52  ;;  %2566 = vmatprep.subr.bf16.mxu1 %v3073_v1  ;;  %v3011_v52 = vld [vmem:[%s3694_s1 + $0x178] sm:$0xff]  }
  0x5e   : > { %2726 = vmatprep.subr.bf16.mxu0 %v3073_v1 }
  0x60   : > { %2567 = vmatpush3.bf16.msra.mxu1 %v2961_v53  ;;  %v2092_v53 = vld [vmem:[%s3177_s20 + $0x5] sm:$0x1] }
  0x61   : > { %2727 = vmatpush3.bf16.msra.mxu0 %v2962_v54  ;;  %2568 = vmatprep.subr.bf16.mxu1 %v3073_v1  ;;  %v3012_v54 = vld [vmem:[%s3694_s1 + $0x378] sm:$0xff]  }
  0x62   : > { %2728 = vmatprep.subr.bf16.mxu0 %v3073_v1 }
  0x64   : > { %2569 = vmatpush3.bf16.msra.mxu1 %v2963_v55  ;;  %v2292_v55 = vld [vmem:[%s3177_s20 + $0xd] sm:$0x1] }
  0x65   : > { %2729 = vmatpush3.bf16.msra.mxu0 %v2964_v56  ;;  %2574 = vmatprep.subr.bf16.mxu1 %v3073_v1  ;;  %v704_v56 = vpack.c.bf16 %v2092_v53, %v2092_v53  ;;  %v1574_v58 = vpack.c.bf16 %v2292_v55, %v2292_v55 }
  0x66   : > { %2734 = vmatprep.subr.bf16.mxu0 %v3073_v1 }
  0x67   : > { %2571 = vmatmul.mubr.bf16.vlgmr.msra.gmra.mrb[0].mxu1 %v377_v59  ;;  %v3014_v59 = vld [vmem:[%s3694_s1 + $0x380] sm:$0xff]  }
  0x68   : > { %2575 = vmatpush3.bf16.msra.mxu1 %v2965_v60  ;;  %2731 = vmatmul.mubr.bf16.vlgmr.msra.gmra.mrb[0].mxu0 %v1247_v61  ;;  %v3015_v60 = vld [vmem:[%s3694_s1 + $0x188] sm:$0xff]  }
  0x69   : > { %2735 = vmatpush3.bf16.msra.mxu0 %v2966_v62  ;;  %2576 = vmatprep.subr.bf16.mxu1 %v3073_v1  ;;  %v3016_v61 = vld [vmem:[%s3694_s1 + $0x388] sm:$0xff]   ;;  %v3017_v62 = vld [vmem:[%s3694_s1 + $0x190] sm:$0xff]  }
  0x6a   : > { %2736 = vmatprep.subr.bf16.mxu0 %v3073_v1  ;;  %2590 = vmatprep.mubr.msk.bf16.mxu1 %vm3074_vm0, %v3073_v1 }
  0x6b   : > { %2750 = vmatprep.mubr.msk.bf16.mxu0 %vm3074_vm0, %v3073_v1 }
  0x6c   : > { %2577 = vmatpush3.bf16.msra.mxu1 %v2967_v63  ;;  %v3018_v63 = vld [vmem:[%s3694_s1 + $0x390] sm:$0xff]  }
  0x6d   : > { %2737 = vmatpush3.bf16.msra.mxu0 %v2968_v0  ;;  %2578 = vmatprep.subr.bf16.mxu1 %v3073_v1  ;;  %v3019_v0 = vld [vmem:[%s3694_s1 + $0x198] sm:$0xff]  }
  0x6e   : > { %2738 = vmatprep.subr.bf16.mxu0 %v3073_v1 }
  0x70   : > { %2579 = vmatpush3.bf16.msra.mxu1 %v2969_v2  ;;  %v3020_v2 = vld [vmem:[%s3694_s1 + $0x398] sm:$0xff]  }
  0x71   : > { %2739 = vmatpush3.bf16.msra.mxu0 %v2970_v3  ;;  %2580 = vmatprep.subr.bf16.mxu1 %v3073_v1  ;;  %v3021_v3 = vld [vmem:[%s3694_s1 + $0x1a0] sm:$0xff]  }
  0x72   : > { %2740 = vmatprep.subr.bf16.mxu0 %v3073_v1 }
  0x74   : > { %2581 = vmatpush3.bf16.msra.mxu1 %v2971_v4  ;;  %v3022_v4 = vld [vmem:[%s3694_s1 + $0x3a0] sm:$0xff]  }
  0x75   : > { %2741 = vmatpush3.bf16.msra.mxu0 %v2972_v5  ;;  %2582 = vmatprep.subr.bf16.mxu1 %v3073_v1  ;;  %v3023_v5 = vld [vmem:[%s3694_s1 + $0x1a8] sm:$0xff]  }
  0x76   : > { %2742 = vmatprep.subr.bf16.mxu0 %v3073_v1 }
  0x78   : > { %2583 = vmatpush3.bf16.msra.mxu1 %v2973_v6  ;;  %v3024_v6 = vld [vmem:[%s3694_s1 + $0x3a8] sm:$0xff]  }
  0x79   : > { %2743 = vmatpush3.bf16.msra.mxu0 %v2974_v7  ;;  %2584 = vmatprep.subr.bf16.mxu1 %v3073_v1  ;;  %v3025_v7 = vld [vmem:[%s3694_s1 + $0x1b0] sm:$0xff]  }
  0x7a   : > { %2744 = vmatprep.subr.bf16.mxu0 %v3073_v1 }
  0x7c   : > { %2585 = vmatpush3.bf16.msra.mxu1 %v2975_v8  ;;  %v3026_v8 = vld [vmem:[%s3694_s1 + $0x3b0] sm:$0xff]  }
  0x7d   : > { %2745 = vmatpush3.bf16.msra.mxu0 %v2976_v9  ;;  %2586 = vmatprep.subr.bf16.mxu1 %v3073_v1  ;;  %v3027_v9 = vld [vmem:[%s3694_s1 + $0x1b8] sm:$0xff]  }
  0x7e   : > { %2746 = vmatprep.subr.bf16.mxu0 %v3073_v1 }
  0x80   : > { %2587 = vmatpush3.bf16.msra.mxu1 %v2977_v10  ;;  %v2117_v10 = vld [vmem:[%s3177_s20 + $0x6] sm:$0x1] }
  0x81   : > { %2747 = vmatpush3.bf16.msra.mxu0 %v2978_v11  ;;  %2588 = vmatprep.subr.bf16.mxu1 %v3073_v1  ;;  %v3028_v11 = vld [vmem:[%s3694_s1 + $0x3b8] sm:$0xff]  }
  0x82   : > { %2748 = vmatprep.subr.bf16.mxu0 %v3073_v1 }
  0x84   : > { %2589 = vmatpush3.bf16.msra.mxu1 %v2979_v12  ;;  %v2317_v12 = vld [vmem:[%s3177_s20 + $0xe] sm:$0x1] }
  0x85   : > { %2749 = vmatpush3.bf16.msra.mxu0 %v2980_v13  ;;  %2594 = vmatprep.subr.bf16.mxu1 %v3073_v1  ;;  %v812_v13 = vpack.c.bf16 %v2117_v10, %v2117_v10  ;;  %v1682_v15 = vpack.c.bf16 %v2317_v12, %v2317_v12 }
  0x86   : > { %2754 = vmatprep.subr.bf16.mxu0 %v3073_v1 }
  0x87   : > { %2591 = vmatmul.mubr.bf16.vlgmr.msra.gmra.mrb[0].mxu1 %v485_v16  ;;  %v3030_v16 = vld [vmem:[%s3694_s1 + $0x3c0] sm:$0xff]  }
  0x88   : > { %2595 = vmatpush3.bf16.msra.mxu1 %v2981_v17  ;;  %2751 = vmatmul.mubr.bf16.vlgmr.msra.gmra.mrb[0].mxu0 %v1355_v18  ;;  %v3031_v17 = vld [vmem:[%s3694_s1 + $0x1c8] sm:$0xff]  }
  0x89   : > { %2755 = vmatpush3.bf16.msra.mxu0 %v2982_v19  ;;  %2596 = vmatprep.subr.bf16.mxu1 %v3073_v1  ;;  %v3032_v18 = vld [vmem:[%s3694_s1 + $0x3c8] sm:$0xff]   ;;  %v3033_v19 = vld [vmem:[%s3694_s1 + $0x1d0] sm:$0xff]  }
  0x8a   : > { %2756 = vmatprep.subr.bf16.mxu0 %v3073_v1  ;;  %2610 = vmatprep.mubr.msk.bf16.mxu1 %vm3074_vm0, %v3073_v1 }
  0x8b   : > { %2770 = vmatprep.mubr.msk.bf16.mxu0 %vm3074_vm0, %v3073_v1 }
  0x8c   : > { %2597 = vmatpush3.bf16.msra.mxu1 %v2983_v20  ;;  %v3034_v20 = vld [vmem:[%s3694_s1 + $0x3d0] sm:$0xff]  }
  0x8d   : > { %2757 = vmatpush3.bf16.msra.mxu0 %v2984_v21  ;;  %2598 = vmatprep.subr.bf16.mxu1 %v3073_v1  ;;  %v3035_v21 = vld [vmem:[%s3694_s1 + $0x1d8] sm:$0xff]  }
  0x8e   : > { %2758 = vmatprep.subr.bf16.mxu0 %v3073_v1 }
  0x90   : > { %2599 = vmatpush3.bf16.msra.mxu1 %v2985_v22  ;;  %v3036_v22 = vld [vmem:[%s3694_s1 + $0x3d8] sm:$0xff]  }
  0x91   : > { %2759 = vmatpush3.bf16.msra.mxu0 %v2986_v23  ;;  %2600 = vmatprep.subr.bf16.mxu1 %v3073_v1  ;;  %v3037_v23 = vld [vmem:[%s3694_s1 + $0x1e0] sm:$0xff]  }
  0x92   : > { %2760 = vmatprep.subr.bf16.mxu0 %v3073_v1 }
  0x94   : > { %2601 = vmatpush3.bf16.msra.mxu1 %v2987_v24  ;;  %v3038_v24 = vld [vmem:[%s3694_s1 + $0x3e0] sm:$0xff]  }
  0x95   : > { %2761 = vmatpush3.bf16.msra.mxu0 %v2988_v25  ;;  %2602 = vmatprep.subr.bf16.mxu1 %v3073_v1  ;;  %v3039_v25 = vld [vmem:[%s3694_s1 + $0x1e8] sm:$0xff]  }
  0x96   : > { %2762 = vmatprep.subr.bf16.mxu0 %v3073_v1 }
  0x98   : > { %2603 = vmatpush3.bf16.msra.mxu1 %v2989_v26  ;;  %v3040_v26 = vld [vmem:[%s3694_s1 + $0x3e8] sm:$0xff]  }
  0x99   : > { %2763 = vmatpush3.bf16.msra.mxu0 %v2990_v27  ;;  %2604 = vmatprep.subr.bf16.mxu1 %v3073_v1  ;;  %v3041_v27 = vld [vmem:[%s3694_s1 + $0x1f0] sm:$0xff]  }
  0x9a   : > { %2764 = vmatprep.subr.bf16.mxu0 %v3073_v1 }
  0x9c   : > { %2605 = vmatpush3.bf16.msra.mxu1 %v2991_v28  ;;  %v3042_v28 = vld [vmem:[%s3694_s1 + $0x3f0] sm:$0xff]  }
  0x9d   : > { %2765 = vmatpush3.bf16.msra.mxu0 %v2992_v29  ;;  %2606 = vmatprep.subr.bf16.mxu1 %v3073_v1  ;;  %v3043_v29 = vld [vmem:[%s3694_s1 + $0x1f8] sm:$0xff]  }
  0x9e   : > { %2766 = vmatprep.subr.bf16.mxu0 %v3073_v1 }
  0xa0   : > { %2607 = vmatpush3.bf16.msra.mxu1 %v2993_v30  ;;  %v2142_v30 = vld [vmem:[%s3177_s20 + $0x7] sm:$0x1] }
  0xa1   : > { %2767 = vmatpush3.bf16.msra.mxu0 %v2994_v31  ;;  %2608 = vmatprep.subr.bf16.mxu1 %v3073_v1  ;;  %v3044_v31 = vld [vmem:[%s3694_s1 + $0x3f8] sm:$0xff]   ;;  %v920_v33 = vpack.c.bf16 %v2142_v30, %v2142_v30 }
  0xa2   : > { %2768 = vmatprep.subr.bf16.mxu0 %v3073_v1 }
  0xa4   : > { %2609 = vmatpush3.bf16.msra.mxu1 %v2995_v32  ;;  %v2342_v32 = vld [vmem:[%s3177_s20 + $0xf] sm:$0x1] }
  0xa5   : > { %2769 = vmatpush3.bf16.msra.mxu0 %v2996_v34  ;;  %2614 = vmatprep.subr.bf16.mxu1 %v3073_v1  ;;  %v1790_v34 = vpack.c.bf16 %v2342_v32, %v2342_v32 }
  0xa6   : > { %2774 = vmatprep.subr.bf16.mxu0 %v3073_v1 }
  0xa7   : > { %2611 = vmatmul.mubr.bf16.vlgmr.msra.gmra.mrb[0].mxu1 %v596_v36 }
  0xa8   : > { %2615 = vmatpush3.bf16.msra.mxu1 %v2997_v37  ;;  %2771 = vmatmul.mubr.bf16.vlgmr.msra.gmra.mrb[0].mxu0 %v1466_v38 }
  0xa9   : > { %2775 = vmatpush3.bf16.msra.mxu0 %v2998_v39  ;;  %2616 = vmatprep.subr.bf16.mxu1 %v3073_v1 }
  0xaa   : > { %2776 = vmatprep.subr.bf16.mxu0 %v3073_v1  ;;  %2630 = vmatprep.mubr.msk.bf16.mxu1 %vm3074_vm0, %v3073_v1 }
  0xab   : > { %2790 = vmatprep.mubr.msk.bf16.mxu0 %vm3074_vm0, %v3073_v1 }
  0xac   : > { %2617 = vmatpush3.bf16.msra.mxu1 %v2999_v40 }
  0xad   : > { %2777 = vmatpush3.bf16.msra.mxu0 %v3000_v41  ;;  %2618 = vmatprep.subr.bf16.mxu1 %v3073_v1 }
  0xae   : > { %2778 = vmatprep.subr.bf16.mxu0 %v3073_v1 }
  0xb0   : > { %2619 = vmatpush3.bf16.msra.mxu1 %v3001_v42 }
  0xb1   : > { %2779 = vmatpush3.bf16.msra.mxu0 %v3002_v43  ;;  %2620 = vmatprep.subr.bf16.mxu1 %v3073_v1 }
  0xb2   : > { %2780 = vmatprep.subr.bf16.mxu0 %v3073_v1 }
  0xb4   : > { %2621 = vmatpush3.bf16.msra.mxu1 %v3003_v44 }
  0xb5   : > { %2781 = vmatpush3.bf16.msra.mxu0 %v3004_v45  ;;  %2622 = vmatprep.subr.bf16.mxu1 %v3073_v1 }
  0xb6   : > { %2782 = vmatprep.subr.bf16.mxu0 %v3073_v1 }
  0xb8   : > { %2623 = vmatpush3.bf16.msra.mxu1 %v3005_v46 }
  0xb9   : > { %2783 = vmatpush3.bf16.msra.mxu0 %v3006_v47  ;;  %2624 = vmatprep.subr.bf16.mxu1 %v3073_v1 }
  0xba   : > { %2784 = vmatprep.subr.bf16.mxu0 %v3073_v1 }
  0xbc   : > { %2625 = vmatpush3.bf16.msra.mxu1 %v3007_v48 }
  0xbd   : > { %2785 = vmatpush3.bf16.msra.mxu0 %v3008_v49  ;;  %2626 = vmatprep.subr.bf16.mxu1 %v3073_v1 }
  0xbe   : > { %2786 = vmatprep.subr.bf16.mxu0 %v3073_v1 }
  0xc0   : > { %2627 = vmatpush3.bf16.msra.mxu1 %v3009_v50 }
  0xc1   : > { %2787 = vmatpush3.bf16.msra.mxu0 %v3010_v51  ;;  %2628 = vmatprep.subr.bf16.mxu1 %v3073_v1 }
  0xc2   : > { %2788 = vmatprep.subr.bf16.mxu0 %v3073_v1 }
  0xc4   : > { %2629 = vmatpush3.bf16.msra.mxu1 %v3011_v52 }
  0xc5   : > { %2789 = vmatpush3.bf16.msra.mxu0 %v3012_v54  ;;  %2634 = vmatprep.subr.bf16.mxu1 %v3073_v1 }
  0xc6   : > { %2794 = vmatprep.subr.bf16.mxu0 %v3073_v1 }
  0xc7   : > { %2631 = vmatmul.mubr.bf16.vlgmr.msra.gmra.mrb[0].mxu1 %v704_v56 }
  0xc8   : > { %2635 = vmatpush3.bf16.msra.mxu1 %v3013_v57  ;;  %2791 = vmatmul.mubr.bf16.vlgmr.msra.gmra.mrb[0].mxu0 %v1574_v58 }
  0xc9   : > { %2795 = vmatpush3.bf16.msra.mxu0 %v3014_v59  ;;  %2636 = vmatprep.subr.bf16.mxu1 %v3073_v1 }
  0xca   : > { %2796 = vmatprep.subr.bf16.mxu0 %v3073_v1  ;;  %2650 = vmatprep.mubr.msk.bf16.mxu1 %vm3074_vm0, %v3073_v1 }
  0xcb   : > { %2810 = vmatprep.mubr.msk.bf16.mxu0 %vm3074_vm0, %v3073_v1 }
  0xcc   : > { %2637 = vmatpush3.bf16.msra.mxu1 %v3015_v60 }
  0xcd   : > { %2797 = vmatpush3.bf16.msra.mxu0 %v3016_v61  ;;  %2638 = vmatprep.subr.bf16.mxu1 %v3073_v1 }
  0xce   : > { %2798 = vmatprep.subr.bf16.mxu0 %v3073_v1 }
  0xd0   : > { %2639 = vmatpush3.bf16.msra.mxu1 %v3017_v62 }
  0xd1   : > { %2799 = vmatpush3.bf16.msra.mxu0 %v3018_v63  ;;  %2640 = vmatprep.subr.bf16.mxu1 %v3073_v1 }
  0xd2   : > { %2800 = vmatprep.subr.bf16.mxu0 %v3073_v1 }
  0xd4   : > { %2641 = vmatpush3.bf16.msra.mxu1 %v3019_v0 }
  0xd5   : > { %2801 = vmatpush3.bf16.msra.mxu0 %v3020_v2  ;;  %2642 = vmatprep.subr.bf16.mxu1 %v3073_v1 }
  0xd6   : > { %2802 = vmatprep.subr.bf16.mxu0 %v3073_v1 }
  0xd8   : > { %2643 = vmatpush3.bf16.msra.mxu1 %v3021_v3 }
  0xd9   : > { %2803 = vmatpush3.bf16.msra.mxu0 %v3022_v4  ;;  %2644 = vmatprep.subr.bf16.mxu1 %v3073_v1 }
  0xda   : > { %2804 = vmatprep.subr.bf16.mxu0 %v3073_v1 }
  0xdc   : > { %2645 = vmatpush3.bf16.msra.mxu1 %v3023_v5 }
  0xdd   : > { %2805 = vmatpush3.bf16.msra.mxu0 %v3024_v6  ;;  %2646 = vmatprep.subr.bf16.mxu1 %v3073_v1 }
  0xde   : > { %2806 = vmatprep.subr.bf16.mxu0 %v3073_v1 }
  0xe0   : > { %2647 = vmatpush3.bf16.msra.mxu1 %v3025_v7 }
  0xe1   : > { %2807 = vmatpush3.bf16.msra.mxu0 %v3026_v8  ;;  %2648 = vmatprep.subr.bf16.mxu1 %v3073_v1 }
  0xe2   : > { %2808 = vmatprep.subr.bf16.mxu0 %v3073_v1 }
  0xe4   : > { %2649 = vmatpush3.bf16.msra.mxu1 %v3027_v9 }
  0xe5   : > { %2809 = vmatpush3.bf16.msra.mxu0 %v3028_v11  ;;  %2654 = vmatprep.subr.bf16.mxu1 %v3073_v1 }
  0xe6   : > { %2814 = vmatprep.subr.bf16.mxu0 %v3073_v1 }
  0xe7   : > { %2651 = vmatmul.mubr.bf16.vlgmr.msra.gmra.mrb[0].mxu1 %v812_v13 }
  0xe8   : > { %2655 = vmatpush3.bf16.msra.mxu1 %v3029_v14  ;;  %2811 = vmatmul.mubr.bf16.vlgmr.msra.gmra.mrb[0].mxu0 %v1682_v15 }
  0xe9   : > { %2815 = vmatpush3.bf16.msra.mxu0 %v3030_v16  ;;  %2656 = vmatprep.subr.bf16.mxu1 %v3073_v1 }
  0xea   : > { %2816 = vmatprep.subr.bf16.mxu0 %v3073_v1  ;;  %2670 = vmatprep.mubr.msk.bf16.mxu1 %vm3074_vm0, %v3073_v1 }
  0xeb   : > { %2830 = vmatprep.mubr.msk.bf16.mxu0 %vm3074_vm0, %v3073_v1 }
  0xec   : > { %2657 = vmatpush3.bf16.msra.mxu1 %v3031_v17 }
  0xed   : > { %2817 = vmatpush3.bf16.msra.mxu0 %v3032_v18  ;;  %2658 = vmatprep.subr.bf16.mxu1 %v3073_v1 }
  0xee   : > { %2818 = vmatprep.subr.bf16.mxu0 %v3073_v1 }
  0xf0   : > { %2659 = vmatpush3.bf16.msra.mxu1 %v3033_v19 }
  0xf1   : > { %2819 = vmatpush3.bf16.msra.mxu0 %v3034_v20  ;;  %2660 = vmatprep.subr.bf16.mxu1 %v3073_v1 }
  0xf2   : > { %2820 = vmatprep.subr.bf16.mxu0 %v3073_v1 }
  0xf4   : > { %2661 = vmatpush3.bf16.msra.mxu1 %v3035_v21 }
  0xf5   : > { %2821 = vmatpush3.bf16.msra.mxu0 %v3036_v22  ;;  %2662 = vmatprep.subr.bf16.mxu1 %v3073_v1 }
  0xf6   : > { %2822 = vmatprep.subr.bf16.mxu0 %v3073_v1 }
  0xf8   : > { %2663 = vmatpush3.bf16.msra.mxu1 %v3037_v23 }
  0xf9   : > { %2823 = vmatpush3.bf16.msra.mxu0 %v3038_v24  ;;  %2664 = vmatprep.subr.bf16.mxu1 %v3073_v1 }
  0xfa   : > { %2824 = vmatprep.subr.bf16.mxu0 %v3073_v1 }
  0xfc   : > { %2665 = vmatpush3.bf16.msra.mxu1 %v3039_v25 }
  0xfd   : > { %2825 = vmatpush3.bf16.msra.mxu0 %v3040_v26  ;;  %2666 = vmatprep.subr.bf16.mxu1 %v3073_v1 }
  0xfe   : > { %2826 = vmatprep.subr.bf16.mxu0 %v3073_v1 }
 0x100   : > { %2667 = vmatpush3.bf16.msra.mxu1 %v3041_v27 }
 0x101   : > { %2827 = vmatpush3.bf16.msra.mxu0 %v3042_v28  ;;  %2668 = vmatprep.subr.bf16.mxu1 %v3073_v1 }
 0x102   : > { %2828 = vmatprep.subr.bf16.mxu0 %v3073_v1 }
 0x104   : > { %2669 = vmatpush3.bf16.msra.mxu1 %v3043_v29 }
 0x105   : > { %2829 = vmatpush3.bf16.msra.mxu0 %v3044_v31 }
 0x107   : > { %2671 = vmatmul.mubr.bf16.vlgmr.msra.gmra.mrb[0].mxu1 %v920_v33 }
 0x108   : > { %2831 = vmatmul.mubr.bf16.vlgmr.msra.gmra.mrb[0].mxu0 %v1790_v34 }
 0x1da   : > { %v1020_v35 = vpop.f32.mrb[0].mxu1 }
 0x1db   : > { %v1890_v36 = vpop.f32.mrb[0].mxu0  ;;  %v2672_v37 = vpop.f32.mrb[1].mxu1 }
 0x1dc   : > { %v2834_v38 = vadd.f32 %v1890_v36, %v1020_v35  ;;  %v2832_v39 = vpop.f32.mrb[1].mxu0  ;;  %v1023_v40 = vpop.f32.mrb[2].mxu1 }
 0x1dd   : > { %v1893_v41 = vpop.f32.mrb[2].mxu0  ;;  %v2673_v42 = vpop.f32.mrb[3].mxu1 }
 0x1de   : > { %v1897_v43 = vsub.f32 0.0, %v2834_v38  ;;  %v2833_v44 = vpop.f32.mrb[3].mxu0 }
 0x1e0   : > { %v1898_v45 = vmul.f32 1.442695, %v1897_v43 }
 0x1e2   : > { %3045 = vpow2.f32 %v1898_v45 }
 0x1ec   : > { %v3046_v1 = vpop.eup %3045 }
 0x1ed   : > { %v1900_v46 = vadd.f32 1.0, %v3046_v1 }
 0x1ef   : > { %3047 = vrcp.f32 %v1900_v46 }
 0x1f9   : > { %v3048_v47 = vpop.eup %3047 }
 0x1fa   : > { %1903 = vst [vmem:[%s159_s19] sm:$0x1] %v3048_v47 }
 0x1fb PF: > { %s12_s11 = sadd.s32 1, %s3071_s11   ;;  %s3696_s9 = smov %s3067_s10 }
 0x1fc   : > { %p9_p5 = scmp.ge.s32.totalorder %s12_s11, 4   ;;  %s3697_s10 = smov %s3699_s12 }
 0x1fe   :  { %11 = sbr.rel (!%p9_p5) target bundleno = 2 (0x2), region = 77 }

</bundles_post_ra>
